<compile_context>
chip_gen: v7x
topology: tpu7x:2x2x1
jax: 0.10.0
libtpu: 0.0.40
codegen_flags: <defaults>
</compile_context>

<pallas_src>
import functools

import jax
import jax.numpy as jnp
from jax.experimental import pallas as pl
from jax.experimental.pallas import tpu as pltpu


def attention_kernel(x_ref, vec_ref, wqkv_ref, bqkv_ref, wout_ref, o_ref, *,
                     heads, eps):
    Bt, N, E = x_ref.shape
    three_m = wqkv_ref.shape[-1]
    M = three_m // 3
    d = M // heads
    R = Bt * N
    mmdt = wqkv_ref.dtype
    # f32 operands -> force accurate multi-pass MXU; bf16 operands -> 1 pass.
    prec = (jax.lax.Precision.HIGHEST if mmdt == jnp.float32
            else jax.lax.Precision.DEFAULT)

    # Fuse the whole (Bt, N) row slab for LayerNorm + projections.
    x = x_ref[...].astype(jnp.float32).reshape(R, E)

    # ---- LayerNorm over last dim (biased variance, eps=1e-5, f32) ----
    mean = jnp.mean(x, axis=-1, keepdims=True)
    var = jnp.mean((x - mean) ** 2, axis=-1, keepdims=True)
    xn = (x - mean) * jax.lax.rsqrt(var + eps)
    xn = xn * vec_ref[0] + vec_ref[1]          # gamma, beta

    # ---- Single fused QKV projection: (R, E) @ (E, 3M) -----------------
    # Softmax scale is pre-folded into the q columns of wqkv/bqkv host-side.
    qkv = jnp.dot(xn.astype(mmdt), wqkv_ref[...],
                  preferred_element_type=jnp.float32, precision=prec)
    qkv = qkv + bqkv_ref[...]                  # (R, 3M), f32
    qkv_mm = qkv.astype(mmdt)                  # single cast for all heads

    # ---- Per-head NxN attention, batched over Bt --------------------------
    head_outs = []
    for h in range(heads):
        q = qkv_mm[:, h * d:(h + 1) * d].reshape(Bt, N, d)
        k = qkv_mm[:, M + h * d:M + (h + 1) * d].reshape(Bt, N, d)
        v = qkv_mm[:, 2 * M + h * d:2 * M + (h + 1) * d].reshape(Bt, N, d)

        sim = jnp.einsum('bnd,bmd->bnm', q, k,
                         preferred_element_type=jnp.float32,
                         precision=prec)                     # (Bt, N, N)
        sim = sim - jnp.max(sim, axis=-1, keepdims=True)
        p = jnp.exp(sim)
        inv = 1.0 / jnp.sum(p, axis=-1, keepdims=True)       # exact, tiny
        attn = (p * inv).astype(mmdt)
        oh = jnp.einsum('bnm,bmd->bnd', attn, v,
                        preferred_element_type=jnp.float32,
                        precision=prec)                      # (Bt, N, d)
        head_outs.append(oh.reshape(R, d))

    # ---- Head merge + output projection as one (R, M) @ (M, E) dot --------
    merged = head_outs[0] if heads == 1 else jnp.concatenate(head_outs, axis=-1)
    out = jnp.dot(merged.astype(mmdt), wout_ref[...],
                  preferred_element_type=jnp.float32, precision=prec)
    out = out + vec_ref[2]                     # to_out bias
    o_ref[...] = out.reshape(Bt, N, E).astype(o_ref.dtype)


def prepare_params(gamma, beta, wqkv_t, bqkv, wout_t, bout, *, emb_dim, heads,
                   matmul_dtype=jnp.float32):
    """One-time host-side re-layout, scale folding and weight pre-cast.

    Inputs (PyTorch-equivalent layouts):
      gamma, beta: (1, E)      LayerNorm weight/bias
      wqkv_t:      (E, 3M)     to_qkv.weight.T
      bqkv:        (1, 3M)     to_qkv.bias
      wout_t:      (M, E)      to_out.weight.T
      bout:        (1, E)      to_out.bias
    Returns (vec, wqkv, bqkv, wout) kernel-layout params; `matmul_dtype`
    (e.g. jnp.bfloat16 on v5e/v6e/v7x) only affects the two matmul weights.
    """
    E = emb_dim
    M = E // heads
    scale = float(E) ** (-0.5)
    # Fold the softmax scale into the q columns (first M of 3M).
    col_scale = jnp.concatenate([jnp.full((M,), scale, jnp.float32),
                                 jnp.ones((2 * M,), jnp.float32)])
    wqkv_f = (wqkv_t.astype(jnp.float32) * col_scale[None, :]).astype(matmul_dtype)
    bqkv_f = bqkv.reshape(1, 3 * M).astype(jnp.float32) * col_scale[None, :]
    # gamma / beta / output bias packed into one resident f32 slab.
    vec = jnp.concatenate([gamma.reshape(1, E), beta.reshape(1, E),
                           bout.reshape(1, E)], axis=0).astype(jnp.float32)
    wout_f = wout_t.astype(matmul_dtype)       # (M, E), original layout
    return vec, wqkv_f, bqkv_f, wout_f


def attention_forward(x, kparams, heads, *, block_batch=None):
    B, N, E = x.shape
    vec, wqkv, bqkv, wout = kparams

    if block_batch is None:
        # One big fused row slab per grid step (best for single-TC v5e/v6e);
        # cap at ~1024 fused rows.  VMEM (even v7x's 64 MiB) is not a concern
        # at these block sizes.
        # TODO(synk): on v7x (2 TensorCores) prefer exactly 2 parallel steps
        # when each still holds >= ~256 fused rows.
        block_batch = max(1, min(B, -(-1024 // N)))
    Bt = max(1, min(block_batch, B))

    grid_b = pl.cdiv(B, Bt)
    Bp = grid_b * Bt
    xp = x
    if Bp != B:   # pad batch to a multiple of Bt (padded rows are discarded)
        xp = jnp.concatenate([x, jnp.zeros((Bp - B, N, E), x.dtype)], axis=0)

    kernel = functools.partial(attention_kernel, heads=heads, eps=1e-5)

    def resident(arr):           # full array resident in VMEM every step
        return pl.BlockSpec(arr.shape, lambda b: (0, 0))

    out = pl.pallas_call(
        kernel,
        out_shape=jax.ShapeDtypeStruct((Bp, N, E), x.dtype),
        grid=(grid_b,),
        in_specs=[
            pl.BlockSpec((Bt, N, E), lambda b: (b, 0, 0)),   # x: Bt batches/step
            resident(vec),                                   # (3, E) gamma/beta/bout
            resident(wqkv),                                  # (E, 3M)
            resident(bqkv),                                  # (1, 3M)
            resident(wout),                                  # (M, E)
        ],
        out_specs=pl.BlockSpec((Bt, N, E), lambda b: (b, 0, 0)),
        compiler_params=pltpu.CompilerParams(
            dimension_semantics=("parallel",)),
    )(xp, vec, wqkv, bqkv, wout)
    return out[:B] if Bp != B else out


def attention_reference(x, raw_params, heads):
    """Pure-JAX reference mirroring the PyTorch forward (raw param layouts)."""
    gamma, beta, wqkv_t, bqkv, wout_t, bout = raw_params
    B, N, E = x.shape
    M = E // heads
    d = M // heads
    hp = jax.lax.Precision.HIGHEST
    mean = jnp.mean(x, axis=-1, keepdims=True)
    var = jnp.mean((x - mean) ** 2, axis=-1, keepdims=True)
    xn = (x - mean) / jnp.sqrt(var + 1e-5) * gamma[0] + beta[0]
    qkv = jnp.einsum('bne,ef->bnf', xn, wqkv_t, precision=hp) + bqkv[0]
    q, k, v = qkv[..., :M], qkv[..., M:2 * M], qkv[..., 2 * M:]

    def split_heads(t):  # b n (h d) -> b h n d
        return t.reshape(B, N, heads, d).transpose(0, 2, 1, 3)

    q, k, v = map(split_heads, (q, k, v))
    q = q * (float(E) ** -0.5)
    sim = jnp.einsum('bhid,bhjd->bhij', q, k, precision=hp)
    attn = jax.nn.softmax(sim, axis=-1)
    out = jnp.einsum('bhij,bhjd->bhid', attn, v, precision=hp)
    out = out.transpose(0, 2, 1, 3).reshape(B, N, M)
    return jnp.einsum('bnm,me->bne', out, wout_t, precision=hp) + bout[0]


if __name__ == "__main__":
    N, E, heads = 8, 32, 2
    M = E // heads          # 16
    key = jax.random.PRNGKey(0)
    kx, kg, kb, kwq, kbq, kwo, kbo = jax.random.split(key, 7)

    gamma = 1.0 + 0.1 * jax.random.normal(kg, (1, E), dtype=jnp.float32)
    beta = 0.1 * jax.random.normal(kb, (1, E), dtype=jnp.float32)
    # Linear weights stored pre-transposed (in_features, out_features).
    wqkv_t = jax.random.normal(kwq, (E, 3 * M), dtype=jnp.float32) * (E ** -0.5)
    bqkv = 0.1 * jax.random.normal(kbq, (1, 3 * M), dtype=jnp.float32)
    wout_t = jax.random.normal(kwo, (M, E), dtype=jnp.float32) * (M ** -0.5)
    bout = 0.1 * jax.random.normal(kbo, (1, E), dtype=jnp.float32)

    raw_params = (gamma, beta, wqkv_t, bqkv, wout_t, bout)
    kp_f32 = prepare_params(*raw_params, emb_dim=E, heads=heads,
                            matmul_dtype=jnp.float32)
    kp_bf16 = prepare_params(*raw_params, emb_dim=E, heads=heads,
                             matmul_dtype=jnp.bfloat16)

    # Case 1: f32 MXU operands (exact-parity path), B=8 -> single grid step.
    B = 8
    x = jax.random.normal(kx, (B, N, E), dtype=jnp.float32)
    ref = attention_reference(x, raw_params, heads)
    out = jax.block_until_ready(attention_forward(x, kp_f32, heads))
    assert out.shape == (B, N, E)
    assert jnp.allclose(out, ref, atol=2e-3, rtol=2e-3), \
        "mismatch vs reference (B=8, f32)"

    # Case 2: bf16 MXU operands (recommended on v5e/v6e/v7x), f32 accumulate.
    # bf16 operand quantization gives ~1e-2-scale deviation vs the f32 ref.
    out_bf = jax.block_until_ready(attention_forward(x, kp_bf16, heads))
    assert jnp.allclose(out_bf, ref, atol=6e-2, rtol=6e-2), \
        "mismatch vs reference (B=8, bf16 operands)"

    # Case 3: exercises batch padding + multi-step grid (B=5, Bt=2, grid=(3,)).
    B2 = 5
    x2 = jax.random.normal(jax.random.PRNGKey(1), (B2, N, E), dtype=jnp.float32)
    out2 = jax.block_until_ready(
        attention_forward(x2, kp_f32, heads, block_batch=2))
    ref2 = attention_reference(x2, raw_params, heads)
    assert out2.shape == (B2, N, E)
    assert jnp.allclose(out2, ref2, atol=2e-3, rtol=2e-3), \
        "mismatch vs reference (B=5, padded grid)"

    print("KERNEL_OK")
</pallas_src>

<mosaic_0001>
module attributes {stable_mosaic.version = 11 : i64} {
  func.func @attention_kernel(%arg0: i32, %arg1: memref<8x8x32xf32, #tpu.memory_space<vmem>>, %arg2: memref<3x32xf32, #tpu.memory_space<vmem>>, %arg3: memref<32x48xf32, #tpu.memory_space<vmem>>, %arg4: memref<1x48xf32, #tpu.memory_space<vmem>>, %arg5: memref<16x32xf32, #tpu.memory_space<vmem>>, %arg6: memref<8x8x32xf32, #tpu.memory_space<vmem>>) attributes {dimension_semantics = [#tpu.dimension_semantics<parallel>], iteration_bounds = array<i64: 1>, scalar_prefetch = 0 : i64, scratch_operands = 0 : i64, tpu.core_type = #tpu.core_type<tc>, window_params = [{transform_indices = @transform_0, window_bounds = array<i64: 8, 8, 32>}, {pipeline_mode = #tpu.pipeline_mode<synchronous>, transform_indices = @transform_1, window_bounds = array<i64: 3, 32>}, {pipeline_mode = #tpu.pipeline_mode<synchronous>, transform_indices = @transform_2, window_bounds = array<i64: 32, 48>}, {pipeline_mode = #tpu.pipeline_mode<synchronous>, transform_indices = @transform_3, window_bounds = array<i64: 1, 48>}, {pipeline_mode = #tpu.pipeline_mode<synchronous>, transform_indices = @transform_4, window_bounds = array<i64: 16, 32>}, {transform_indices = @transform_5, window_bounds = array<i64: 8, 8, 32>}]} {
    %c0 = arith.constant 0 : index
    %c0_0 = arith.constant 0 : index
    %c0_1 = arith.constant 0 : index
    %0 = vector.load %arg1[%c0, %c0_0, %c0_1] : memref<8x8x32xf32, #tpu.memory_space<vmem>>, vector<8x8x32xf32>
    %1 = vector.shape_cast %0 : vector<8x8x32xf32> to vector<64x32xf32>
    %cst = arith.constant dense<0.000000e+00> : vector<64xf32>
    %2 = vector.multi_reduction <add>, %1, %cst [1] : vector<64x32xf32> to vector<64xf32>
    %3 = vector.shape_cast %2 : vector<64xf32> to vector<64x1xf32>
    %cst_2 = arith.constant 3.200000e+01 : f32
    %4 = vector.broadcast %cst_2 : f32 to vector<64x1xf32>
    %5 = arith.divf %3, %4 : vector<64x1xf32>
    %6 = vector.broadcast %5 : vector<64x1xf32> to vector<64x32xf32>
    %7 = arith.subf %1, %6 : vector<64x32xf32>
    %8 = arith.mulf %7, %7 : vector<64x32xf32>
    %cst_3 = arith.constant dense<0.000000e+00> : vector<64xf32>
    %9 = vector.multi_reduction <add>, %8, %cst_3 [1] : vector<64x32xf32> to vector<64xf32>
    %10 = vector.shape_cast %9 : vector<64xf32> to vector<64x1xf32>
    %cst_4 = arith.constant 3.200000e+01 : f32
    %11 = vector.broadcast %cst_4 : f32 to vector<64x1xf32>
    %12 = arith.divf %10, %11 : vector<64x1xf32>
    %13 = vector.broadcast %5 : vector<64x1xf32> to vector<64x32xf32>
    %14 = arith.subf %1, %13 : vector<64x32xf32>
    %cst_5 = arith.constant 9.99999974E-6 : f32
    %15 = vector.broadcast %cst_5 : f32 to vector<64x1xf32>
    %16 = arith.addf %12, %15 : vector<64x1xf32>
    %17 = math.rsqrt %16 : vector<64x1xf32>
    %18 = vector.broadcast %17 : vector<64x1xf32> to vector<64x32xf32>
    %19 = arith.mulf %14, %18 : vector<64x32xf32>
    %c0_6 = arith.constant 0 : index
    %c0_7 = arith.constant 0 : index
    %20 = vector.load %arg2[%c0_6, %c0_7] : memref<3x32xf32, #tpu.memory_space<vmem>>, vector<1x32xf32>
    %21 = vector.shape_cast %20 : vector<1x32xf32> to vector<32xf32>
    %22 = vector.shape_cast %21 : vector<32xf32> to vector<1x32xf32>
    %23 = vector.broadcast %22 : vector<1x32xf32> to vector<64x32xf32>
    %24 = arith.mulf %19, %23 : vector<64x32xf32>
    %c1 = arith.constant 1 : index
    %c0_8 = arith.constant 0 : index
    %25 = vector.load %arg2[%c1, %c0_8] : memref<3x32xf32, #tpu.memory_space<vmem>>, vector<1x32xf32>
    %26 = vector.shape_cast %25 : vector<1x32xf32> to vector<32xf32>
    %27 = vector.shape_cast %26 : vector<32xf32> to vector<1x32xf32>
    %28 = vector.broadcast %27 : vector<1x32xf32> to vector<64x32xf32>
    %29 = arith.addf %24, %28 : vector<64x32xf32>
    %c0_9 = arith.constant 0 : index
    %c0_10 = arith.constant 0 : index
    %30 = vector.load %arg3[%c0_9, %c0_10] : memref<32x48xf32, #tpu.memory_space<vmem>>, vector<32x48xf32>
    %cst_11 = arith.constant dense<0.000000e+00> : vector<64x48xf32>
    %31 = tpu.matmul %29, %30, %cst_11 {dimension_numbers = #tpu.dot_dimension_numbers<[1], [0], [0], [1], [0, 0, 1, 1], [], []>, precision = #tpu.contract_precision<fp32>} : vector<64x32xf32>, vector<32x48xf32>, vector<64x48xf32> -> vector<64x48xf32>
    %c0_12 = arith.constant 0 : index
    %c0_13 = arith.constant 0 : index
    %32 = vector.load %arg4[%c0_12, %c0_13] : memref<1x48xf32, #tpu.memory_space<vmem>>, vector<1x48xf32>
    %33 = vector.broadcast %32 : vector<1x48xf32> to vector<64x48xf32>
    %34 = arith.addf %31, %33 : vector<64x48xf32>
    %35 = vector.extract_strided_slice %34 {offsets = [0, 0], sizes = [64, 8], strides = [1, 1]} : vector<64x48xf32> to vector<64x8xf32>
    %36 = vector.shape_cast %35 : vector<64x8xf32> to vector<8x8x8xf32>
    %37 = vector.extract_strided_slice %34 {offsets = [0, 16], sizes = [64, 8], strides = [1, 1]} : vector<64x48xf32> to vector<64x8xf32>
    %38 = vector.shape_cast %37 : vector<64x8xf32> to vector<8x8x8xf32>
    %39 = vector.extract_strided_slice %34 {offsets = [0, 32], sizes = [64, 8], strides = [1, 1]} : vector<64x48xf32> to vector<64x8xf32>
    %40 = vector.shape_cast %39 : vector<64x8xf32> to vector<8x8x8xf32>
    "tpu.trace_start"() <{level = 10 : i32, message = "bnd,bmd->bnm"}> : () -> ()
    %cst_14 = arith.constant dense<0.000000e+00> : vector<8x8x8xf32>
    %41 = tpu.matmul %36, %38, %cst_14 {dimension_numbers = #tpu.dot_dimension_numbers<[2], [2], [1], [1], [0, 0, 0, 1, 1, 1], [0], [0]>, precision = #tpu.contract_precision<fp32>} : vector<8x8x8xf32>, vector<8x8x8xf32>, vector<8x8x8xf32> -> vector<8x8x8xf32>
    "tpu.trace_stop"() : () -> ()
    %cst_15 = arith.constant dense<0xFF800000> : vector<8x8xf32>
    %42 = vector.multi_reduction <maximumf>, %41, %cst_15 [2] : vector<8x8x8xf32> to vector<8x8xf32>
    %43 = vector.shape_cast %42 : vector<8x8xf32> to vector<8x8x1xf32>
    %44 = vector.broadcast %43 : vector<8x8x1xf32> to vector<8x8x8xf32>
    %45 = arith.subf %41, %44 : vector<8x8x8xf32>
    %46 = math.exp %45 : vector<8x8x8xf32>
    %cst_16 = arith.constant dense<0.000000e+00> : vector<8x8xf32>
    %47 = vector.multi_reduction <add>, %46, %cst_16 [2] : vector<8x8x8xf32> to vector<8x8xf32>
    %48 = vector.shape_cast %47 : vector<8x8xf32> to vector<8x8x1xf32>
    %cst_17 = arith.constant 1.000000e+00 : f32
    %49 = vector.broadcast %cst_17 : f32 to vector<8x8x1xf32>
    %50 = arith.divf %49, %48 : vector<8x8x1xf32>
    %51 = vector.broadcast %50 : vector<8x8x1xf32> to vector<8x8x8xf32>
    %52 = arith.mulf %46, %51 : vector<8x8x8xf32>
    "tpu.trace_start"() <{level = 10 : i32, message = "bnm,bmd->bnd"}> : () -> ()
    %cst_18 = arith.constant dense<0.000000e+00> : vector<8x8x8xf32>
    %53 = tpu.matmul %52, %40, %cst_18 {dimension_numbers = #tpu.dot_dimension_numbers<[2], [1], [1], [2], [0, 0, 0, 1, 1, 2], [0], [0]>, precision = #tpu.contract_precision<fp32>} : vector<8x8x8xf32>, vector<8x8x8xf32>, vector<8x8x8xf32> -> vector<8x8x8xf32>
    "tpu.trace_stop"() : () -> ()
    %54 = vector.shape_cast %53 : vector<8x8x8xf32> to vector<64x8xf32>
    %55 = vector.extract_strided_slice %34 {offsets = [0, 8], sizes = [64, 8], strides = [1, 1]} : vector<64x48xf32> to vector<64x8xf32>
    %56 = vector.shape_cast %55 : vector<64x8xf32> to vector<8x8x8xf32>
    %57 = vector.extract_strided_slice %34 {offsets = [0, 24], sizes = [64, 8], strides = [1, 1]} : vector<64x48xf32> to vector<64x8xf32>
    %58 = vector.shape_cast %57 : vector<64x8xf32> to vector<8x8x8xf32>
    %59 = vector.extract_strided_slice %34 {offsets = [0, 40], sizes = [64, 8], strides = [1, 1]} : vector<64x48xf32> to vector<64x8xf32>
    %60 = vector.shape_cast %59 : vector<64x8xf32> to vector<8x8x8xf32>
    "tpu.trace_start"() <{level = 10 : i32, message = "bnd,bmd->bnm"}> : () -> ()
    %cst_19 = arith.constant dense<0.000000e+00> : vector<8x8x8xf32>
    %61 = tpu.matmul %56, %58, %cst_19 {dimension_numbers = #tpu.dot_dimension_numbers<[2], [2], [1], [1], [0, 0, 0, 1, 1, 1], [0], [0]>, precision = #tpu.contract_precision<fp32>} : vector<8x8x8xf32>, vector<8x8x8xf32>, vector<8x8x8xf32> -> vector<8x8x8xf32>
    "tpu.trace_stop"() : () -> ()
    %cst_20 = arith.constant dense<0xFF800000> : vector<8x8xf32>
    %62 = vector.multi_reduction <maximumf>, %61, %cst_20 [2] : vector<8x8x8xf32> to vector<8x8xf32>
    %63 = vector.shape_cast %62 : vector<8x8xf32> to vector<8x8x1xf32>
    %64 = vector.broadcast %63 : vector<8x8x1xf32> to vector<8x8x8xf32>
    %65 = arith.subf %61, %64 : vector<8x8x8xf32>
    %66 = math.exp %65 : vector<8x8x8xf32>
    %cst_21 = arith.constant dense<0.000000e+00> : vector<8x8xf32>
    %67 = vector.multi_reduction <add>, %66, %cst_21 [2] : vector<8x8x8xf32> to vector<8x8xf32>
    %68 = vector.shape_cast %67 : vector<8x8xf32> to vector<8x8x1xf32>
    %cst_22 = arith.constant 1.000000e+00 : f32
    %69 = vector.broadcast %cst_22 : f32 to vector<8x8x1xf32>
    %70 = arith.divf %69, %68 : vector<8x8x1xf32>
    %71 = vector.broadcast %70 : vector<8x8x1xf32> to vector<8x8x8xf32>
    %72 = arith.mulf %66, %71 : vector<8x8x8xf32>
    "tpu.trace_start"() <{level = 10 : i32, message = "bnm,bmd->bnd"}> : () -> ()
    %cst_23 = arith.constant dense<0.000000e+00> : vector<8x8x8xf32>
    %73 = tpu.matmul %72, %60, %cst_23 {dimension_numbers = #tpu.dot_dimension_numbers<[2], [1], [1], [2], [0, 0, 0, 1, 1, 2], [0], [0]>, precision = #tpu.contract_precision<fp32>} : vector<8x8x8xf32>, vector<8x8x8xf32>, vector<8x8x8xf32> -> vector<8x8x8xf32>
    "tpu.trace_stop"() : () -> ()
    %74 = vector.shape_cast %73 : vector<8x8x8xf32> to vector<64x8xf32>
    %75 = tpu.concatenate %54, %74 in 1 : vector<64x8xf32>, vector<64x8xf32> -> vector<64x16xf32>
    %c0_24 = arith.constant 0 : index
    %c0_25 = arith.constant 0 : index
    %76 = vector.load %arg5[%c0_24, %c0_25] : memref<16x32xf32, #tpu.memory_space<vmem>>, vector<16x32xf32>
    %cst_26 = arith.constant dense<0.000000e+00> : vector<64x32xf32>
    %77 = tpu.matmul %75, %76, %cst_26 {dimension_numbers = #tpu.dot_dimension_numbers<[1], [0], [0], [1], [0, 0, 1, 1], [], []>, precision = #tpu.contract_precision<fp32>} : vector<64x16xf32>, vector<16x32xf32>, vector<64x32xf32> -> vector<64x32xf32>
    %c2 = arith.constant 2 : index
    %c0_27 = arith.constant 0 : index
    %78 = vector.load %arg2[%c2, %c0_27] : memref<3x32xf32, #tpu.memory_space<vmem>>, vector<1x32xf32>
    %79 = vector.shape_cast %78 : vector<1x32xf32> to vector<32xf32>
    %80 = vector.shape_cast %79 : vector<32xf32> to vector<1x32xf32>
    %81 = vector.broadcast %80 : vector<1x32xf32> to vector<64x32xf32>
    %82 = arith.addf %77, %81 : vector<64x32xf32>
    %83 = vector.shape_cast %82 : vector<64x32xf32> to vector<8x8x32xf32>
    %c0_28 = arith.constant 0 : index
    %c0_29 = arith.constant 0 : index
    %c0_30 = arith.constant 0 : index
    %84 = vector.load %arg6[%c0_28, %c0_29, %c0_30] : memref<8x8x32xf32, #tpu.memory_space<vmem>>, vector<8x8x32xf32>
    tpu.vector_store %arg6[%c0_28, %c0_29, %c0_30], %83 {strides = array<i32>} : memref<8x8x32xf32, #tpu.memory_space<vmem>>, vector<8x8x32xf32>,
    return
  }
  func.func @transform_0(%arg0: i32) -> (i32, i32, i32) {
    %c0_i32 = arith.constant 0 : i32
    %c0_i32_0 = arith.constant 0 : i32
    %c0_i32_1 = arith.constant 0 : i32
    return %arg0, %c0_i32, %c0_i32_0 : i32, i32, i32
  }
  func.func @transform_1(%arg0: i32) -> (i32, i32) {
    %c0_i32 = arith.constant 0 : i32
    %c0_i32_0 = arith.constant 0 : i32
    %c0_i32_1 = arith.constant 0 : i32
    return %c0_i32, %c0_i32_0 : i32, i32
  }
  func.func @transform_2(%arg0: i32) -> (i32, i32) {
    %c0_i32 = arith.constant 0 : i32
    %c0_i32_0 = arith.constant 0 : i32
    %c0_i32_1 = arith.constant 0 : i32
    return %c0_i32, %c0_i32_0 : i32, i32
  }
  func.func @transform_3(%arg0: i32) -> (i32, i32) {
    %c0_i32 = arith.constant 0 : i32
    %c0_i32_0 = arith.constant 0 : i32
    %c0_i32_1 = arith.constant 0 : i32
    return %c0_i32, %c0_i32_0 : i32, i32
  }
  func.func @transform_4(%arg0: i32) -> (i32, i32) {
    %c0_i32 = arith.constant 0 : i32
    %c0_i32_0 = arith.constant 0 : i32
    %c0_i32_1 = arith.constant 0 : i32
    return %c0_i32, %c0_i32_0 : i32, i32
  }
  func.func @transform_5(%arg0: i32) -> (i32, i32, i32) {
    %c0_i32 = arith.constant 0 : i32
    %c0_i32_0 = arith.constant 0 : i32
    %c0_i32_1 = arith.constant 0 : i32
    return %arg0, %c0_i32, %c0_i32_0 : i32, i32, i32
  }
}

</mosaic_0001>

<bundles_post_ra>
// kernel: tpu_custom_call.1
= control target key start
LH: loop header
LB: loop body
LE: loop exit
PB: predicated region body
PF: predicated region fallthrough
CT: control target
= control target key end

     0   :  { %10 = vsyncpa [#allocation3], 0  ;;  %s20598_s0 = inlined_call_operand.hbm [shape: f32[8,8,32], index: 0, kind: input, shape index: {}]   ;;  %s20599_s1 = inlined_call_operand.hbm [shape: f32[3,32], index: 1, kind: input, shape index: {}]   ;;  %s20600_s2 = inlined_call_operand.hbm [shape: f32[32,48], index: 2, kind: input, shape index: {}]   ;;  %s20601_s3 = inlined_call_operand.vmem [shape: f32[1,48], index: 3, kind: input, shape index: {}]   ;;  %s20602_s4 = inlined_call_operand.hbm [shape: f32[16,32], index: 4, kind: input, shape index: {}]   ;;  %s20603_s5 = inlined_call_operand.hbm [shape: f32[8,8,32], index: 5, kind: output, shape index: {}]  }
   0x1   :  { %11 = vsyncpa [#allocation6], 0 }
   0x2   :  { %12 = vsyncpa [#allocation9], 0 }
   0x3   :  { %13 = vsyncpa [#allocation4], 0  ;;  %s18971_s18 = smov [#allocation5]   ;;  %s18972_s20 = smov [#allocation2]  }
   0x4   :  { %s32_s19 = sshll.u32 %s18971_s18, 4  ;;  %s19_s21 = sshll.u32 %s18972_s20, 4  ;;  %s33_s19 = int_to_ptr.vmem [resolvable:$true] %s32_s19  ;;  %s19015_s21 = int_to_ptr.vmem [resolvable:$true] %s19_s21 }
   0x5   :  { %s18853_s24 = scalar_lea.hbm %s20599_s1, 64 }
   0x6   :  { %p18854_p0 = scmp.ne.s32.totalorder %s20599_s1, %s18853_s24  ;;  %p18857_p1 = scmp.lt.u32.totalorder %s18853_s24, %s20599_s1 }
   0x8   :  { %p18859_p2 = pnand %p18857_p1, %p18854_p0 }
   0xa   :  { %18862 = shalt.err (!%p18859_p2)
}
   0xb   :  { %s18863_s29 = scalar_lea.vmem %s33_s19, 64  ;;  %p18868_p4 = scmp.lt.s32.totalorder %s33_s19, %s33_s19 }
   0xc   :  { %p18864_p3 = scmp.ne.s32.totalorder %s33_s19, %s18863_s29  ;;  %p18869_p5 = scmp.lt.s32.totalorder %s18863_s29, %s18863_s29 }
   0xe   :  { %p18870_p6 = por %p18869_p5, %p18868_p4 }
  0x10   :  { %p18871_p7 = pnand %p18870_p6, %p18864_p3 }
  0x12   :  { %18874 = shalt.err (!%p18871_p7)
}
  0x13   :  { %35 = dma.hbm_to_vmem [thread:$0]  %s20599_s1, 64, %s33_s19, [#allocation6]  }
  0x14   :  { %s18875_s9 = scalar_lea.hbm %s20598_s0, 1024 }
  0x15   :  { %p18876_p8 = scmp.ne.s32.totalorder %s20598_s0, %s18875_s9  ;;  %p18879_p9 = scmp.lt.u32.totalorder %s18875_s9, %s20598_s0 }
  0x17   :  { %p18881_p10 = pnand %p18879_p9, %p18876_p8 }
  0x19   :  { %18884 = shalt.err (!%p18881_p10)
}
  0x1a   :  { %s18885_s14 = scalar_lea.vmem %s19015_s21, 1024  ;;  %p18890_p12 = scmp.lt.s32.totalorder %s19015_s21, %s19015_s21 }
  0x1b   :  { %p18886_p11 = scmp.ne.s32.totalorder %s19015_s21, %s18885_s14  ;;  %p18891_p13 = scmp.lt.s32.totalorder %s18885_s14, %s18885_s14 }
  0x1d   :  { %p18892_p0 = por %p18891_p13, %p18890_p12 }
  0x1f   :  { %p18893_p1 = pnand %p18892_p0, %p18886_p11 }
  0x21   :  { %18896 = shalt.err (!%p18893_p1)
}
  0x22   :  { %s18973_s1 = smov 128   ;;  %s18974_s15 = smov 8  }
  0x23   :  { %25 = dma.hbm_to_vmem [thread:$0]  %s20598_s0, 1024, %s19015_s21, [#allocation3], %s18973_s1, %s18973_s1, %s18974_s15  }
  0x24   :  { %s18975_s18 = smov [#allocation7]   ;;  %s18976_s20 = smov [#allocation8]  }
  0x25   :  { %s41_s19 = sshll.u32 %s18975_s18, 4  ;;  %s55_s22 = sshll.u32 %s18976_s20, 4  ;;  %s42_s19 = int_to_ptr.vmem [resolvable:$true] %s41_s19  ;;  %s19049_s22 = int_to_ptr.vmem [resolvable:$true] %s55_s22 }
  0x26   :  { %s18897_s25 = scalar_lea.hbm %s20600_s2, 512 }
  0x27   :  { %p18898_p2 = scmp.ne.s32.totalorder %s20600_s2, %s18897_s25  ;;  %p18901_p3 = scmp.lt.u32.totalorder %s18897_s25, %s20600_s2 }
  0x29   :  { %p18903_p4 = pnand %p18901_p3, %p18898_p2 }
  0x2b   :  { %18906 = shalt.err (!%p18903_p4)
}
  0x2c   :  { %s18907_s0 = scalar_lea.vmem %s42_s19, 512  ;;  %p18912_p6 = scmp.lt.s32.totalorder %s42_s19, %s42_s19 }
  0x2d   :  { %p18908_p5 = scmp.ne.s32.totalorder %s42_s19, %s18907_s0  ;;  %p18913_p7 = scmp.lt.s32.totalorder %s18907_s0, %s18907_s0 }
  0x2f   :  { %p18914_p8 = por %p18913_p7, %p18912_p6 }
  0x31   :  { %p18915_p9 = pnand %p18914_p8, %p18908_p5 }
  0x33   :  { %18918 = shalt.err (!%p18915_p9)
}
  0x34   :  { %47 = dma.hbm_to_vmem [thread:$0]  %s20600_s2, 512, %s42_s19, [#allocation6], %s18973_s1, %s18973_s1, %s18974_s15  }
  0x35   :  { %s18919_s8 = scalar_lea.hbm %s20602_s4, 256 }
  0x36   :  { %p18920_p10 = scmp.ne.s32.totalorder %s20602_s4, %s18919_s8  ;;  %p18923_p11 = scmp.lt.u32.totalorder %s18919_s8, %s20602_s4 }
  0x38   :  { %p18925_p12 = pnand %p18923_p11, %p18920_p10 }
  0x3a   :  { %18928 = shalt.err (!%p18925_p12)
}
  0x3b   :  { %s18929_s13 = scalar_lea.vmem %s19049_s22, 256  ;;  %p18934_p0 = scmp.lt.s32.totalorder %s19049_s22, %s19049_s22 }
  0x3c   :  { %p18930_p13 = scmp.ne.s32.totalorder %s19049_s22, %s18929_s13  ;;  %p18935_p1 = scmp.lt.s32.totalorder %s18929_s13, %s18929_s13 }
  0x3e   :  { %p18936_p2 = por %p18935_p1, %p18934_p0 }
  0x40   :  { %p18937_p3 = pnand %p18936_p2, %p18930_p13 }
  0x42   :  { %18940 = shalt.err (!%p18937_p3)
}
  0x43   :  { %61 = dma.hbm_to_vmem [thread:$0]  %s20602_s4, 256, %s19049_s22, [#allocation9], %s18973_s1, %s18973_s1, %s18974_s15  }
  0x44   :  { %18963 = dma.done.wait [#allocation3], 1024  }
  0x45   :  { %18964 = vsyncadd [#allocation3], 4294966272 }
  0x46   :  { %18965 = dma.done.wait [#allocation6], 576  }
  0x47   :  { %18966 = vsyncadd [#allocation6], 4294966720 }
  0x48   :  { %18967 = dma.done.wait [#allocation9], 256  }
  0x49   :  { %18968 = vsyncadd [#allocation9], 4294967040  ;;  %vm82_vm0 = vcmask 261120   ;;  %v74_v0 = vld [vmem:[#allocation2] sm:$0xff]  ;;  %v76_v1 = vld [vmem:[#allocation2 + $0x10] sm:$0xff]  ;;  %vm18978_vm1 = vmmov 0  }
  0x4a   :  { %v75_v2 = vld [vmem:[#allocation2 + $0x8] sm:$0xff]  ;;  %v83_v3 = vsel %vm82_vm0, %v74_v0, 0.0  ;;  %v89_v4 = vsel %vm82_vm0, %v76_v1, 0.0  ;;  %v77_v5 = vld [vmem:[#allocation2 + $0x18] sm:$0xff]  ;;  %v78_v8 = vld [vmem:[#allocation2 + $0x20] sm:$0xff]  ;;  %s18979_s17 = smov 112  }
  0x4b   :  { %84 = vadd.xlane.f32.xlu0 %v83_v3  ;;  %90 = vadd.xlane.f32.xlu1 %v89_v4  ;;  %v86_v6 = vsel %vm82_vm0, %v75_v2, 0.0  ;;  %v92_v7 = vsel %vm82_vm0, %v77_v5, 0.0  ;;  %v79_v9 = vld [vmem:[#allocation2 + $0x28] sm:$0xff]  ;;  %v95_v10 = vsel %vm82_vm0, %v78_v8, 0.0  ;;  %v80_v12 = vld [vmem:[#allocation2 + $0x30] sm:$0xff]  ;;  %v81_v13 = vld [vmem:[#allocation2 + $0x38] sm:$0xff] }
  0x4c   :  { %v98_v11 = vsel %vm82_vm0, %v79_v9, 0.0  ;;  %v101_v14 = vsel %vm82_vm0, %v80_v12, 0.0  ;;  %v104_v15 = vsel %vm82_vm0, %v81_v13, 0.0  ;;  %v214_v56 = vld [vmem:[#allocation7] sm:$0xff]  ;;  %v215_v57 = vld [vmem:[#allocation7 + $0x8] sm:$0xff]  ;;  %v216_v61 = vld [vmem:[#allocation7 + $0x10] sm:$0xff] }
  0x4d   :  { %v250_v58 = vand.u32 4294901760, %v214_v56  ;;  %v253_v59 = vand.u32 4294901760, %v215_v57  ;;  %v217_v62 = vld [vmem:[#allocation7 + $0x18] sm:$0xff]  ;;  %v256_v63 = vand.u32 4294901760, %v216_v61  ;;  %vm1038_vm2 = vcmask 64512   ;;  %s18981_s18 = smov 104  }
  0x4e   :  { %s18982_s19 = smov 120   ;;  %s18983_s20 = smov 88   ;;  %vm15763_vm3 = vcmask 130048  }
  0x4f   :  { %87 = vadd.xlane.f32.xlu0 %v86_v6  ;;  %93 = vadd.xlane.f32.xlu1 %v92_v7  ;;  %v19134_v60 = vpack.c.bf16 %v253_v59, %v250_v58  ;;  %v407_v3 = vsub.f32 %v215_v57, %v253_v59  ;;  %s18984_s22 = smov [#allocation10]  }
  0x50   :  { %s16561_s23 = sshll.u32 %s18984_s22, 4  ;;  %s16562_s23 = int_to_ptr.vmem [resolvable:$true] %s16561_s23 }
  0x51   :  { %18272 = vmatprep.subr.bf16.mxu0 %v19134_v60  ;;  %s18941_s24 = scalar_lea.vmem %s16562_s23, 1024  ;;  %p18946_p5 = scmp.lt.s32.totalorder %s16562_s23, %s16562_s23 }
  0x52   :  { %18274 = vmatpush3.bf16.msra.mxu0 %v19134_v60  ;;  %p18942_p4 = scmp.ne.s32.totalorder %s16562_s23, %s18941_s24  ;;  %p18947_p6 = scmp.lt.s32.totalorder %s18941_s24, %s18941_s24 }
  0x53   :  { %96 = vadd.xlane.f32.xlu0 %v95_v10  ;;  %99 = vadd.xlane.f32.xlu1 %v98_v11  ;;  %v414_v10 = vsub.f32 %v216_v61, %v256_v63 }
  0x54   :  { %p18948_p7 = por %p18947_p6, %p18946_p5 }
  0x56   :  { %p18949_p8 = pnand %p18948_p7, %p18942_p4 }
  0x57   :  { %102 = vadd.xlane.f32.xlu0 %v101_v14  ;;  %105 = vadd.xlane.f32.xlu1 %v104_v15 }
  0xd8   :  { %v85_v16 = vpop.xlane.xlu0 %84  ;;  %v91_v17 = vpop.xlane.xlu1 %90 }
  0xd9   :  { %v108_v18 = vmul.f32 0.03125, %v85_v16  ;;  %v110_v19 = vmul.f32 0.03125, %v91_v17 }
  0xdb   :  { %v19094_v20 = vsub.f32 %v74_v0, %v108_v18  ;;  %v19096_v21 = vsub.f32 %v76_v1, %v110_v19  ;;  %v259_v0 = vand.u32 4294901760, %v217_v62 }
  0xdc   :  { %v88_v22 = vpop.xlane.xlu0 %87  ;;  %v94_v23 = vpop.xlane.xlu1 %93 }
  0xdd   :  { %v109_v24 = vmul.f32 0.03125, %v88_v22  ;;  %v111_v25 = vmul.f32 0.03125, %v94_v23  ;;  %v124_v26 = vmul.f32 %v19094_v20, %v19094_v20  ;;  %v126_v27 = vmul.f32 %v19096_v21, %v19096_v21 }
  0xde   :  { %v19138_v1 = vpack.c.bf16 %v259_v0, %v256_v63  ;;  %v421_v11 = vsub.f32 %v217_v62, %v259_v0 }
  0xdf   :  { %v19102_v28 = vsub.f32 %v75_v2, %v109_v24  ;;  %v19104_v29 = vsub.f32 %v77_v5, %v111_v25  ;;  %v132_v30 = vsel %vm82_vm0, %v124_v26, 0.0  ;;  %v138_v33 = vsel %vm82_vm0, %v126_v27, 0.0 }
  0xe0   :  { %133 = vadd.xlane.f32.xlu0 %v132_v30  ;;  %v97_v31 = vpop.xlane.xlu0 %96  ;;  %v100_v32 = vpop.xlane.xlu1 %99  ;;  %18276 = vmatprep.subr.bf16.mxu0 %v19138_v1  ;;  %v400_v2 = vsub.f32 %v214_v56, %v250_v58  ;;  %v408_v5 = vand.u32 4294901760, %v407_v3  ;;  %v422_v14 = vand.u32 4294901760, %v421_v11  ;;  %v19149_v23 = vpack.c.bf16 %v421_v11, %v414_v10  ;;  %v16576_v58 = vld [vmem:[#allocation5 + $0x1] ss:$0 sm:$0xff] }
  0xe1   :  { %v112_v34 = vmul.f32 0.03125, %v97_v31  ;;  %v113_v35 = vmul.f32 0.03125, %v100_v32  ;;  %v125_v36 = vmul.f32 %v19102_v28, %v19102_v28  ;;  %v127_v37 = vmul.f32 %v19104_v29, %v19104_v29  ;;  %18278 = vmatpush3.bf16.msra.mxu0 %v19138_v1 }
  0xe2   :  { %v401_v4 = vand.u32 4294901760, %v400_v2  ;;  %v409_v7 = vsub.f32 %v407_v3, %v408_v5  ;;  %v423_v16 = vsub.f32 %v421_v11, %v422_v14  ;;  %v19147_v22 = vpack.c.bf16 %v407_v3, %v400_v2 }
  0xe3   :  { %v19112_v38 = vsub.f32 %v78_v8, %v112_v34  ;;  %v19114_v39 = vsub.f32 %v79_v9, %v113_v35  ;;  %v135_v40 = vsel %vm82_vm0, %v125_v36, 0.0  ;;  %v141_v43 = vsel %vm82_vm0, %v127_v37, 0.0 }
  0xe4   :  { %139 = vadd.xlane.f32.xlu0 %v138_v33  ;;  %136 = vadd.xlane.f32.xlu1 %v135_v40  ;;  %v103_v41 = vpop.xlane.xlu0 %102  ;;  %v106_v42 = vpop.xlane.xlu1 %105  ;;  %v402_v6 = vsub.f32 %v400_v2, %v401_v4  ;;  %v410_v9 = vand.u32 4294901760, %v409_v7  ;;  %v424_v18 = vand.u32 4294901760, %v423_v16  ;;  %v19151_v24 = vpack.c.bf16 %v408_v5, %v401_v4 }
  0xe5   :  { %v114_v44 = vmul.f32 0.03125, %v103_v41  ;;  %v115_v45 = vmul.f32 0.03125, %v106_v42  ;;  %v128_v46 = vmul.f32 %v19112_v38, %v19112_v38  ;;  %v129_v47 = vmul.f32 %v19114_v39, %v19114_v39 }
  0xe6   :  { %v403_v8 = vand.u32 4294901760, %v402_v6 }
  0xe7   :  { %v19122_v48 = vsub.f32 %v80_v12, %v114_v44  ;;  %v19124_v49 = vsub.f32 %v81_v13, %v115_v45  ;;  %v144_v50 = vsel %vm82_vm0, %v128_v46, 0.0  ;;  %v147_v51 = vsel %vm82_vm0, %v129_v47, 0.0 }
  0xe8   :  { %142 = vadd.xlane.f32.xlu1 %v141_v43  ;;  %145 = vadd.xlane.f32.xlu0 %v144_v50  ;;  %v19142_v12 = vpack.c.bf16 %v410_v9, %v403_v8  ;;  %v415_v13 = vand.u32 4294901760, %v414_v10 }
  0xe9   :  { %v130_v52 = vmul.f32 %v19122_v48, %v19122_v48  ;;  %v131_v53 = vmul.f32 %v19124_v49, %v19124_v49 }
  0xea   :  { %18280 = vmatprep.subr.bf16.mxu0 %v19142_v12  ;;  %v416_v15 = vsub.f32 %v414_v10, %v415_v13  ;;  %v19153_v25 = vpack.c.bf16 %v422_v14, %v415_v13 }
  0xeb   :  { %v150_v54 = vsel %vm82_vm0, %v130_v52, 0.0  ;;  %v153_v55 = vsel %vm82_vm0, %v131_v53, 0.0 }
  0xec   :  { %148 = vadd.xlane.f32.xlu1 %v147_v51  ;;  %151 = vadd.xlane.f32.xlu0 %v150_v54  ;;  %v417_v17 = vand.u32 4294901760, %v416_v15  ;;  %v16575_v54 = vld [vmem:[#allocation5] ss:$0 sm:$0xff] }
  0xee   :  { %v19145_v19 = vpack.c.bf16 %v424_v18, %v417_v17 }
  0xf0   :  { %154 = vadd.xlane.f32.xlu1 %v153_v55 }
 0x16d   :  { %v134_v26 = vpop.xlane.xlu0 %133 }
 0x16e   :  { %v156_v27 = vmul.f32 0.03125, %v134_v26 }
 0x170   :  { %v164_v30 = vadd.f32 1e-05, %v156_v27 }
 0x171   :  { %v137_v31 = vpop.xlane.xlu1 %136  ;;  %v140_v32 = vpop.xlane.xlu0 %139 }
 0x172   :  { %18773 = vrsqrt.f32 %v164_v30  ;;  %v157_v33 = vmul.f32 0.03125, %v137_v31  ;;  %v158_v34 = vmul.f32 0.03125, %v140_v32 }
 0x174   :  { %v165_v35 = vadd.f32 1e-05, %v157_v33  ;;  %v166_v36 = vadd.f32 1e-05, %v158_v34 }
 0x175   :  { %v143_v37 = vpop.xlane.xlu1 %142  ;;  %v146_v40 = vpop.xlane.xlu0 %145 }
 0x176   :  { %18775 = vrsqrt.f32 %v165_v35  ;;  %v159_v41 = vmul.f32 0.03125, %v143_v37  ;;  %v160_v42 = vmul.f32 0.03125, %v146_v40 }
 0x177   :  { %18777 = vrsqrt.f32 %v166_v36 }
 0x178   :  { %v167_v43 = vadd.f32 1e-05, %v159_v41  ;;  %v168_v44 = vadd.f32 1e-05, %v160_v42 }
 0x179   :  { %v149_v45 = vpop.xlane.xlu1 %148  ;;  %v152_v46 = vpop.xlane.xlu0 %151 }
 0x17a   :  { %18779 = vrsqrt.f32 %v167_v43  ;;  %v161_v47 = vmul.f32 0.03125, %v149_v45  ;;  %v162_v50 = vmul.f32 0.03125, %v152_v46 }
 0x17b   :  { %18781 = vrsqrt.f32 %v168_v44 }
 0x17c   :  { %v18774_v51 = vpop.eup %18773  ;;  %v169_v52 = vadd.f32 1e-05, %v161_v47  ;;  %v170_v53 = vadd.f32 1e-05, %v162_v50 }
 0x17d   :  { %v155_v55 = vpop.xlane.xlu1 %154  ;;  %v180_v56 = vmul.f32 %v18774_v51, %v19094_v20 }
 0x17e   :  { %18783 = vrsqrt.f32 %v169_v52  ;;  %v163_v57 = vmul.f32 0.03125, %v155_v55 }
 0x17f   :  { %18785 = vrsqrt.f32 %v170_v53  ;;  %v193_v59 = vmul.f32 %v16575_v54, %v180_v56 }
 0x180   :  { %v18776_v61 = vpop.eup %18775  ;;  %v171_v62 = vadd.f32 1e-05, %v163_v57 }
 0x181   :  { %v18778_v63 = vpop.eup %18777  ;;  %v181_v0 = vmul.f32 %v18776_v61, %v19102_v28  ;;  %v206_v2 = vadd.f32 %v16576_v58, %v193_v59 }
 0x182   :  { %v182_v3 = vmul.f32 %v18778_v63, %v19096_v21  ;;  %18787 = vrsqrt.f32 %v171_v62 }
 0x183   :  { %v226_v4 = vsel %vm82_vm0, %v206_v2, 0  ;;  %v194_v5 = vmul.f32 %v16575_v54, %v181_v0 }
 0x184   :  { %v18780_v6 = vpop.eup %18779  ;;  %v19159_v7 = vand.u32 4294901760, %v226_v4  ;;  %v195_v20 = vmul.f32 %v16575_v54, %v182_v3 }
 0x185   :  { %v18782_v8 = vpop.eup %18781  ;;  %v183_v9 = vmul.f32 %v18780_v6, %v19104_v29  ;;  %v207_v10 = vadd.f32 %v16576_v58, %v194_v5 }
 0x186   :  { %v184_v11 = vmul.f32 %v18782_v8, %v19112_v38  ;;  %v19164_v13 = vsub.f32 %v226_v4, %v19159_v7  ;;  %v208_v28 = vadd.f32 %v16576_v58, %v195_v20 }
 0x187   :  { %v229_v21 = vsel %vm82_vm0, %v207_v10, 0  ;;  %v196_v14 = vmul.f32 %v16575_v54, %v183_v9 }
 0x188   :  { %v18784_v15 = vpop.eup %18783  ;;  %v320_v16 = vand.u32 4294901760, %v19164_v13  ;;  %v19168_v17 = vand.u32 4294901760, %v229_v21  ;;  %v232_v18 = vsel %vm82_vm0, %v208_v28, 0  ;;  %v197_v26 = vmul.f32 %v16575_v54, %v184_v11 }
 0x189   :  { %v18786_v27 = vpop.eup %18785  ;;  %v185_v29 = vmul.f32 %v18784_v15, %v19114_v39  ;;  %v19172_v30 = vand.u32 4294901760, %v232_v18  ;;  %v209_v38 = vadd.f32 %v16576_v58, %v196_v14 }
 0x18a   :  { %v186_v31 = vmul.f32 %v18786_v27, %v19122_v48  ;;  %v321_v32 = vsub.f32 %v19164_v13, %v320_v16  ;;  %v19179_v33 = vsub.f32 %v229_v21, %v19168_v17  ;;  %v210_v34 = vadd.f32 %v16576_v58, %v197_v26 }
 0x18b   :  { %v19182_v35 = vsub.f32 %v232_v18, %v19172_v30  ;;  %v235_v36 = vsel %vm82_vm0, %v209_v38, 0  ;;  %v198_v37 = vmul.f32 %v16575_v54, %v185_v29 }
 0x18c   :  { %v18788_v39 = vpop.eup %18787  ;;  %v322_v40 = vand.u32 4294901760, %v321_v32  ;;  %v330_v41 = vand.u32 4294901760, %v19179_v33  ;;  %v19186_v42 = vand.u32 4294901760, %v235_v36  ;;  %v238_v48 = vsel %vm82_vm0, %v210_v34, 0 }
 0x18d   :  { %v187_v43 = vmul.f32 %v18788_v39, %v19124_v49  ;;  %v340_v44 = vand.u32 4294901760, %v19182_v35  ;;  %v19191_v45 = vand.u32 4294901760, %v238_v48  ;;  %v211_v46 = vadd.f32 %v16576_v58, %v198_v37 }
 0x18e   :  { %17103 = vmatprep.mubr.f32.mxu0 %v322_v40  ;;  %v331_v47 = vsub.f32 %v19179_v33, %v330_v41  ;;  %v19197_v50 = vsub.f32 %v235_v36, %v19186_v42  ;;  %v199_v51 = vmul.f32 %v16575_v54, %v186_v31 }
 0x18f   :  { %v341_v52 = vsub.f32 %v19182_v35, %v340_v44  ;;  %v19203_v49 = vsub.f32 %v238_v48, %v19191_v45  ;;  %v241_v53 = vsel %vm82_vm0, %v211_v46, 0  ;;  %v200_v55 = vmul.f32 %v16575_v54, %v187_v43 }
 0x190   :  { %v332_v56 = vand.u32 4294901760, %v331_v47  ;;  %v350_v57 = vand.u32 4294901760, %v19197_v50  ;;  %v19207_v59 = vand.u32 4294901760, %v241_v53  ;;  %v212_v61 = vadd.f32 %v16576_v58, %v199_v51 }
 0x191   :  { %v342_v62 = vand.u32 4294901760, %v341_v52  ;;  %v360_v63 = vand.u32 4294901760, %v19203_v49  ;;  %v213_v0 = vadd.f32 %v16576_v58, %v200_v55 }
 0x192   :  { %17104 = vmatmul.mubr.f32.vlgmr.msra.gmra.mrb[0].mxu0 %v332_v56  ;;  %v351_v2 = vsub.f32 %v19197_v50, %v350_v57  ;;  %v369_v3 = vsub.f32 %v241_v53, %v19207_v59  ;;  %v244_v4 = vsel %vm82_vm0, %v212_v61, 0 }
 0x193   :  { %17106 = vmatprep.mubr.f32.mxu0 %v342_v62  ;;  %v361_v54 = vsub.f32 %v19203_v49, %v360_v63  ;;  %18282 = vmatpush3.bf16.msra.mxu0 %v19142_v12  ;;  %v19217_v5 = vand.u32 4294901760, %v244_v4  ;;  %v247_v6 = vsel %vm82_vm0, %v213_v0, 0 }
 0x194   :  { %v352_v20 = vand.u32 4294901760, %v351_v2  ;;  %v370_v58 = vand.u32 4294901760, %v369_v3  ;;  %v19220_v8 = vand.u32 4294901760, %v247_v6  ;;  %18284 = vmatprep.subr.bf16.mxu0 %v19145_v19 }
 0x195   :  { %v362_v9 = vand.u32 4294901760, %v361_v54  ;;  %v379_v10 = vsub.f32 %v244_v4, %v19217_v5 }
 0x196   :  { %17107 = vmatmul.mubr.f32.gmra.mrb[2].mxu0 %v352_v20  ;;  %v371_v11 = vsub.f32 %v369_v3, %v370_v58  ;;  %v389_v28 = vsub.f32 %v247_v6, %v19220_v8 }
 0x197   :  { %17109 = vmatprep.mubr.f32.mxu0 %v362_v9  ;;  %v380_v21 = vand.u32 4294901760, %v379_v10  ;;  %18286 = vmatpush3.bf16.msra.mxu0 %v19145_v19 }
 0x198   :  { %v372_v12 = vand.u32 4294901760, %v371_v11  ;;  %v390_v14 = vand.u32 4294901760, %v389_v28  ;;  %18288 = vmatprep.subr.bf16.mxu0 %v19147_v22 }
 0x199   :  { %v381_v15 = vsub.f32 %v379_v10, %v380_v21 }
 0x19a   :  { %17110 = vmatmul.mubr.f32.gmra.mrb[4].mxu0 %v372_v12  ;;  %v391_v18 = vsub.f32 %v389_v28, %v390_v14 }
 0x19b   :  { %v382_v26 = vand.u32 4294901760, %v381_v15 }
 0x19c   :  { %v392_v27 = vand.u32 4294901760, %v391_v18 }
 0x19d   :  { %17112 = vmatprep.mubr.f32.mxu0 %v382_v26 }
 0x19e   :  { %17113 = vmatmul.mubr.f32.gmra.mrb[6].mxu0 %v392_v27 }
 0x19f   :  { %17123 = vmatprep.mubr.f32.mxu0 %v19159_v7 }
 0x1a2   :  { %17124 = vmatmul.mubr.f32.vlgmr.msra.gmra.mrb[0].mxu0 %v19168_v17 }
 0x1a3   :  { %17126 = vmatprep.mubr.f32.mxu0 %v19172_v30  ;;  %18290 = vmatpush3.bf16.msra.mxu0 %v19147_v22 }
 0x1a4   :  { %18292 = vmatprep.subr.bf16.mxu0 %v19149_v23 }
 0x1a6   :  { %17127 = vmatmul.mubr.f32.gmra.mrb[2].mxu0 %v19186_v42 }
 0x1a7   :  { %17129 = vmatprep.mubr.f32.mxu0 %v19191_v45  ;;  %18294 = vmatpush3.bf16.msra.mxu0 %v19149_v23 }
 0x1a8   :  { %18296 = vmatprep.subr.bf16.mxu0 %v19134_v60 }
 0x1aa   :  { %17130 = vmatmul.mubr.f32.gmra.mrb[4].mxu0 %v19207_v59 }
 0x1ab   :  { %17132 = vmatprep.mubr.f32.mxu0 %v19217_v5 }
 0x1ae   :  { %17133 = vmatmul.mubr.f32.gmra.mrb[6].mxu0 %v19220_v8 }
 0x1af   :  { %17143 = vmatprep.mubr.f32.mxu0 %v19164_v13 }
 0x1b2   :  { %17144 = vmatmul.mubr.f32.vlgmr.msra.gmra.mrb[0].mxu0 %v19179_v33 }
 0x1b3   :  { %17146 = vmatprep.mubr.f32.mxu0 %v19182_v35  ;;  %18298 = vmatpush3.bf16.msra.mxu0 %v19134_v60 }
 0x1b4   :  { %18300 = vmatprep.subr.bf16.mxu0 %v19138_v1 }
 0x1b6   :  { %17147 = vmatmul.mubr.f32.gmra.mrb[2].mxu0 %v19197_v50 }
 0x1b7   :  { %17149 = vmatprep.mubr.f32.mxu0 %v19203_v49  ;;  %18302 = vmatpush3.bf16.msra.mxu0 %v19138_v1 }
 0x1b8   :  { %18304 = vmatprep.subr.bf16.mxu0 %v19151_v24 }
 0x1ba   :  { %17150 = vmatmul.mubr.f32.gmra.mrb[4].mxu0 %v369_v3 }
 0x1bb   :  { %17152 = vmatprep.mubr.f32.mxu0 %v379_v10 }
 0x1be   :  { %17153 = vmatmul.mubr.f32.gmra.mrb[6].mxu0 %v389_v28 }
 0x1bf   :  { %17163 = vmatprep.mubr.f32.mxu0 %v320_v16 }
 0x1c2   :  { %17164 = vmatmul.mubr.f32.vlgmr.msra.gmra.mrb[0].mxu0 %v330_v41 }
 0x1c3   :  { %17166 = vmatprep.mubr.f32.mxu0 %v340_v44  ;;  %18306 = vmatpush3.bf16.msra.mxu0 %v19151_v24 }
 0x1c4   :  { %18308 = vmatprep.subr.bf16.mxu0 %v19153_v25 }
 0x1c6   :  { %17167 = vmatmul.mubr.f32.gmra.mrb[2].mxu0 %v350_v57 }
 0x1c7   :  { %17169 = vmatprep.mubr.f32.mxu0 %v360_v63  ;;  %18310 = vmatpush3.bf16.msra.mxu0 %v19153_v25 }
 0x1c8   :  { %18312 = vmatprep.subr.bf16.mxu0 %v19134_v60 }
 0x1ca   :  { %17170 = vmatmul.mubr.f32.gmra.mrb[4].mxu0 %v370_v58 }
 0x1cb   :  { %17172 = vmatprep.mubr.f32.mxu0 %v380_v21 }
 0x1ce   :  { %17173 = vmatmul.mubr.f32.gmra.mrb[6].mxu0 %v390_v14 }
 0x1cf   :  { %17183 = vmatprep.mubr.f32.mxu0 %v19159_v7 }
 0x1d2   :  { %17184 = vmatmul.mubr.f32.vlgmr.msra.gmra.mrb[0].mxu0 %v19168_v17 }
 0x1d3   :  { %17186 = vmatprep.mubr.f32.mxu0 %v19172_v30  ;;  %18314 = vmatpush3.bf16.msra.mxu0 %v19134_v60  ;;  %v18977_v60 = vmov 0.0  }
 0x1d4   :  { %18316 = vmatprep.subr.bf16.mxu0 %v19138_v1  ;;  %17215 = vmatprep.subr.mxu1 %v18977_v60 }
 0x1d5   :  { %17217 = vmatprep.mubr.msk.f32.mxu1 %vm18978_vm1, %v18977_v60 }
 0x1d6   :  { %17187 = vmatmul.mubr.f32.gmra.mrb[2].mxu0 %v19186_v42 }
 0x1d7   :  { %17189 = vmatprep.mubr.f32.mxu0 %v19191_v45  ;;  %18318 = vmatpush3.bf16.msra.mxu0 %v19138_v1  ;;  %v16577_v1 = vld [vmem:[%s20601_s3] ss:$0 sm:$0xff]  ;;  %s18980_s3 = smov 96  }
 0x1d8   :  { %17365 = vmatprep.subr.mxu0 %v18977_v60 }
 0x1da   :  { %17190 = vmatmul.mubr.f32.gmra.mrb[4].mxu0 %v19207_v59 }
 0x1db   :  { %17192 = vmatprep.mubr.f32.mxu0 %v19217_v5 }
 0x1de   :  { %17193 = vmatmul.mubr.f32.gmra.mrb[6].mxu0 %v19220_v8 }
 0x1df   :  { %17203 = vmatprep.mubr.f32.mxu0 %v19159_v7 }
 0x1e2   :  { %17204 = vmatmul.mubr.f32.vlgmr.msra.gmra.mrb[0].mxu0 %v19168_v17 }
 0x1e3   :  { %17206 = vmatprep.mubr.f32.mxu0 %v19172_v30 }
 0x1e6   :  { %17207 = vmatmul.mubr.f32.gmra.mrb[2].mxu0 %v19186_v42 }
 0x1e7   :  { %17209 = vmatprep.mubr.f32.mxu0 %v19191_v45 }
 0x1ea   :  { %17210 = vmatmul.mubr.f32.gmra.mrb[4].mxu0 %v19207_v59 }
 0x1eb   :  { %17212 = vmatprep.mubr.f32.mxu0 %v19217_v5 }
 0x1ee   :  { %17213 = vmatmul.mubr.f32.gmra.mrb[6].mxu0 %v19220_v8 }
 0x1ef   :  { %17367 = vmatprep.mubr.msk.f32.mxu0 %vm18978_vm1, %v18977_v60 }
 0x2b5   :  { %v17205_v19 = vpop.f32.mrb[0].mxu0 }
 0x2b6   :  { %v19288_v22 = vadd.f32 %v17205_v19, %v16577_v1  ;;  %v989_v23 = vpop.f32.mrb[1].mxu0 }
 0x2b7   :  { %v19290_v24 = vadd.f32 %v16577_v1, %v989_v23 }
 0x2b8   :  { %1490 = vrot.lane.b32.xlu1 %v19288_v22, %s18979_s17  ;;  %v1492_v54 = vsel %vm1038_vm2, %v19288_v22, 0 }
 0x2b9   :  { %v17208_v25 = vpop.f32.mrb[2].mxu0  ;;  %1036 = vrot.lane.b32.xlu0 %v19290_v24, %s18979_s17  ;;  %v1039_v35 = vsel %vm1038_vm2, %v19290_v24, 0  ;;  %v19357_v6 = vand.u32 4294901760, %v1492_v54 }
 0x2ba   :  { %v1001_v7 = vpop.f32.mrb[3].mxu0  ;;  %v19297_v29 = vadd.f32 %v17208_v25, %v16577_v1  ;;  %v19314_v36 = vand.u32 4294901760, %v1039_v35 }
 0x2bb   :  { %v19294_v13 = vadd.f32 %v16577_v1, %v1001_v7  ;;  %v19366_v58 = vsub.f32 %v1492_v54, %v19357_v6 }
 0x2bc   :  { %v1110_v37 = vsub.f32 %v1039_v35, %v19314_v36 }
 0x2bd   :  { %v17211_v16 = vpop.f32.mrb[4].mxu0  ;;  %1943 = vrot.lane.b32.xlu1 %v19294_v13, %s18979_s17  ;;  %v1564_v10 = vand.u32 4294901760, %v19366_v58 }
 0x2be   :  { %v1013_v17 = vpop.f32.mrb[5].mxu0  ;;  %v19303_v32 = vadd.f32 %v17211_v16, %v16577_v1  ;;  %v1111_v39 = vand.u32 4294901760, %v1110_v37 }
 0x2bf   :  { %v19299_v30 = vadd.f32 %v16577_v1, %v1013_v17  ;;  %v1565_v12 = vsub.f32 %v19366_v58, %v1564_v10 }
 0x2c0   :  { %v3304_v40 = vsel %vm1038_vm2, %v19303_v32, 0  ;;  %v1112_v43 = vsub.f32 %v1110_v37, %v1111_v39 }
 0x2c1   :  { %v17214_v38 = vpop.f32.mrb[6].mxu0  ;;  %2396 = vrot.lane.b32.xlu1 %v19297_v29, %s18979_s17  ;;  %2849 = vrot.lane.b32.xlu0 %v19299_v30, %s18979_s17  ;;  %v19320_v44 = vand.u32 4294901760, %v3304_v40  ;;  %v1566_v26 = vand.u32 4294901760, %v1565_v12 }
 0x2c2   :  { %v1025_v31 = vpop.f32.mrb[7].mxu0  ;;  %v19309_v34 = vadd.f32 %v17214_v38, %v16577_v1  ;;  %v1113_v50 = vand.u32 4294901760, %v1112_v43 }
 0x2c3   :  { %v19305_v33 = vadd.f32 %v16577_v1, %v1025_v31  ;;  %v3375_v51 = vsub.f32 %v3304_v40, %v19320_v44  ;;  %v1945_v31 = vsel %vm1038_vm2, %v19294_v13, 0 }
 0x2c4   :  { %v4210_v28 = vsel %vm1038_vm2, %v19309_v34, 0 }
 0x2c5   :  { %3302 = vrot.lane.b32.xlu1 %v19303_v32, %s18979_s17  ;;  %3755 = vrot.lane.b32.xlu0 %v19305_v33, %s18979_s17  ;;  %v3376_v55 = vand.u32 4294901760, %v3375_v51  ;;  %v19384_v14 = vand.u32 4294901760, %v4210_v28 }
 0x2c7   :  { %v3377_v61 = vsub.f32 %v3375_v51, %v3376_v55  ;;  %v4281_v27 = vsub.f32 %v4210_v28, %v19384_v14 }
 0x2c9   :  { %4208 = vrot.lane.b32.xlu1 %v19309_v34, %s18979_s17  ;;  %v3378_v0 = vand.u32 4294901760, %v3377_v61  ;;  %v4282_v23 = vand.u32 4294901760, %v4281_v27 }
 0x2cb   :  { %v4283_v7 = vsub.f32 %v4281_v27, %v4282_v23 }
 0x2cd   :  { %v4284_v17 = vand.u32 4294901760, %v4283_v7 }
 0x32a   :  { %v1491_v41 = vpop.permute.xlu1 %1490 }
 0x32b   :  { %v1037_v42 = vpop.permute.xlu0 %1036  ;;  %v1494_v5 = vsel %vm1038_vm2, %v1491_v41, 0 }
 0x32c   :  { %v1041_v48 = vsel %vm1038_vm2, %v1037_v42, 0  ;;  %v19359_v20 = vand.u32 4294901760, %v1494_v5 }
 0x32d   :  { %v1044_v45 = vand.u32 4294901760, %v1041_v48 }
 0x32e   :  { %v19369_v8 = vsub.f32 %v1494_v5, %v19359_v20 }
 0x32f   :  { %v1121_v46 = vsub.f32 %v1041_v48, %v1044_v45  ;;  %v19322_v47 = vpop.permute.xlu1 %1943  ;;  %17216 = vmatpush3.xpose.msra.mxu1 %v1044_v45 }
 0x330   :  { %17220 = vmatprep.subr.mxu1 %v18977_v60  ;;  %v1575_v11 = vand.u32 4294901760, %v19369_v8  ;;  %v1947_v35 = vsel %vm1038_vm2, %v19322_v47, 0 }
 0x331   :  { %v1122_v52 = vand.u32 4294901760, %v1121_v46 }
 0x332   :  { %17218 = vmatmul.mubr.f32.vlgmr.msra.gmra.mrb[0].mxu1 %v1113_v50  ;;  %v1576_v15 = vsub.f32 %v19369_v8, %v1575_v11 }
 0x333   :  { %v1123_v49 = vsub.f32 %v1121_v46, %v1122_v52  ;;  %v19326_v53 = vpop.permute.xlu1 %2396  ;;  %17222 = vmatprep.mubr.msk.f32.mxu1 %vm18978_vm1, %v18977_v60 }
 0x334   :  { %v1577_v1 = vand.u32 4294901760, %v1576_v15  ;;  %v2400_v47 = vsel %vm1038_vm2, %v19326_v53, 0 }
 0x335   :  { %v1124_v56 = vand.u32 4294901760, %v1123_v49 }
 0x337   :  { %v3303_v57 = vpop.permute.xlu1 %3302  ;;  %17221 = vmatpush3.xpose.msra.mxu1 %v1124_v56 }
 0x338   :  { %v3306_v59 = vsel %vm1038_vm2, %v3303_v57, 0  ;;  %17225 = vmatprep.subr.mxu1 %v18977_v60 }
 0x339   :  { %v19332_v62 = vand.u32 4294901760, %v3306_v59 }
 0x33a   :  { %17223 = vmatmul.mubr.f32.vlgmr.msra.gmra.mrb[0].mxu1 %v19314_v36 }
 0x33b   :  { %v3386_v63 = vsub.f32 %v3306_v59, %v19332_v62  ;;  %17366 = vmatpush3.xpose.msra.mxu0 %v19332_v62  ;;  %17226 = vmatpush3.xpose.msra.mxu1 %v1121_v46  ;;  %v4209_v9 = vpop.permute.xlu1 %4208  ;;  %v2398_v46 = vsel %vm1038_vm2, %v19297_v29, 0 }
 0x33c   :  { %17227 = vmatprep.mubr.msk.f32.mxu1 %vm18978_vm1, %v18977_v60  ;;  %17230 = vmatprep.subr.mxu1 %v18977_v60  ;;  %v4212_v21 = vsel %vm1038_vm2, %v4209_v9, 0  ;;  %v2468_v50 = vand.u32 4294901760, %v2398_v46 }
 0x33d   :  { %v3387_v2 = vand.u32 4294901760, %v3386_v63  ;;  %17370 = vmatprep.subr.mxu0 %v18977_v60  ;;  %v19387_v18 = vand.u32 4294901760, %v4212_v21 }
 0x33e   :  { %17368 = vmatmul.mubr.f32.vlgmr.msra.gmra.mrb[8].mxu0 %v3378_v0 }
 0x33f   :  { %v3388_v3 = vsub.f32 %v3386_v63, %v3387_v2  ;;  %17372 = vmatprep.mubr.msk.f32.mxu0 %vm18978_vm1, %v18977_v60  ;;  %v4292_v19 = vsub.f32 %v4212_v21, %v19387_v18 }
 0x341   :  { %v3389_v4 = vand.u32 4294901760, %v3388_v3  ;;  %v4293_v25 = vand.u32 4294901760, %v4292_v19 }
 0x342   :  { %17228 = vmatmul.mubr.f32.vlgmr.msra.gmra.mrb[0].mxu1 %v1110_v37  ;;  %v1950_v37 = vand.u32 4294901760, %v1947_v35 }
 0x343   :  { %17231 = vmatpush3.xpose.msra.mxu1 %v1044_v45  ;;  %17371 = vmatpush3.xpose.msra.mxu0 %v3389_v4  ;;  %v4294_v16 = vsub.f32 %v4292_v19, %v4293_v25 }
 0x344   :  { %17375 = vmatprep.subr.mxu0 %v18977_v60  ;;  %17232 = vmatprep.mubr.msk.f32.mxu1 %vm18978_vm1, %v18977_v60  ;;  %v2027_v40 = vsub.f32 %v1947_v35, %v1950_v37 }
 0x345   :  { %17235 = vmatprep.subr.mxu1 %v18977_v60  ;;  %v4295_v38 = vand.u32 4294901760, %v4294_v16 }
 0x346   :  { %17373 = vmatmul.mubr.f32.vlgmr.msra.gmra.mrb[8].mxu0 %v19320_v44  ;;  %v2028_v42 = vand.u32 4294901760, %v2027_v40 }
 0x347   :  { %17376 = vmatpush3.xpose.msra.mxu0 %v3386_v63  ;;  %17377 = vmatprep.mubr.msk.f32.mxu0 %vm18978_vm1, %v18977_v60  ;;  %v2851_v63 = vsel %vm1038_vm2, %v19299_v30, 0 }
 0x348   :  { %17380 = vmatprep.subr.mxu0 %v18977_v60  ;;  %v2029_v43 = vsub.f32 %v2027_v40, %v2028_v42 }
 0x34a   :  { %17233 = vmatmul.mubr.f32.vlgmr.msra.gmra.mrb[0].mxu1 %v1111_v39 }
 0x34b   :  { %17236 = vmatpush3.xpose.msra.mxu1 %v1122_v52  ;;  %17237 = vmatprep.mubr.msk.f32.mxu1 %vm18978_vm1, %v18977_v60  ;;  %v2469_v52 = vsub.f32 %v2398_v46, %v2468_v50 }
 0x34c   :  { %17240 = vmatprep.subr.mxu1 %v18977_v60 }
 0x34e   :  { %17378 = vmatmul.mubr.f32.vlgmr.msra.gmra.mrb[8].mxu0 %v3375_v51  ;;  %v2403_v51 = vand.u32 4294901760, %v2400_v47 }
 0x34f   :  { %17381 = vmatpush3.xpose.msra.mxu0 %v19332_v62  ;;  %17382 = vmatprep.mubr.msk.f32.mxu0 %vm18978_vm1, %v18977_v60 }
 0x350   :  { %17385 = vmatprep.subr.mxu0 %v18977_v60  ;;  %v2480_v49 = vsub.f32 %v2400_v47, %v2403_v51 }
 0x352   :  { %17238 = vmatmul.mubr.f32.vlgmr.msra.gmra.mrb[0].mxu1 %v19314_v36  ;;  %v2481_v53 = vand.u32 4294901760, %v2480_v49 }
 0x353   :  { %17241 = vmatpush3.xpose.msra.mxu1 %v1044_v45  ;;  %17242 = vmatprep.mubr.msk.f32.mxu1 %vm18978_vm1, %v18977_v60  ;;  %v2030_v45 = vand.u32 4294901760, %v2029_v43 }
 0x354   :  { %17245 = vmatprep.subr.mxu1 %v18977_v60  ;;  %v2482_v57 = vsub.f32 %v2480_v49, %v2481_v53 }
 0x356   :  { %17383 = vmatmul.mubr.f32.vlgmr.msra.gmra.mrb[8].mxu0 %v3376_v55  ;;  %v2470_v55 = vand.u32 4294901760, %v2469_v52  ;;  %v2483_v61 = vand.u32 4294901760, %v2482_v57 }
 0x357   :  { %17386 = vmatpush3.xpose.msra.mxu0 %v3387_v2  ;;  %17387 = vmatprep.mubr.msk.f32.mxu0 %vm18978_vm1, %v18977_v60  ;;  %v2921_v2 = vand.u32 4294901760, %v2851_v63 }
 0x358   :  { %17390 = vmatprep.subr.mxu0 %v18977_v60  ;;  %v2471_v56 = vsub.f32 %v2469_v52, %v2470_v55 }
 0x359   :  { %v2922_v4 = vsub.f32 %v2851_v63, %v2921_v2 }
 0x35a   :  { %17243 = vmatmul.mubr.f32.vlgmr.msra.gmra.mrb[0].mxu1 %v19314_v36  ;;  %v2015_v36 = vand.u32 4294901760, %v1945_v31  ;;  %v2472_v59 = vand.u32 4294901760, %v2471_v56 }
 0x35b   :  { %17246 = vmatpush3.xpose.msra.mxu1 %v19359_v20  ;;  %17247 = vmatprep.mubr.msk.f32.mxu1 %vm18978_vm1, %v18977_v60  ;;  %v2923_v5 = vand.u32 4294901760, %v2922_v4 }
 0x35c   :  { %17250 = vmatprep.subr.mxu1 %v18977_v60  ;;  %v2016_v39 = vsub.f32 %v1945_v31, %v2015_v36 }
 0x35e   :  { %17248 = vmatmul.mubr.f32.vlgmr.msra.gmra.mrb[2].mxu1 %v1566_v26  ;;  %17388 = vmatmul.mubr.f32.vlgmr.msra.gmra.mrb[8].mxu0 %v19320_v44  ;;  %v2017_v41 = vand.u32 4294901760, %v2016_v39 }
 0x35f   :  { %17251 = vmatpush3.xpose.msra.mxu1 %v1577_v1  ;;  %17391 = vmatpush3.xpose.msra.mxu0 %v19332_v62  ;;  %v2850_v62 = vpop.permute.xlu0 %2849 }
 0x360   :  { %17252 = vmatprep.mubr.msk.f32.mxu1 %vm18978_vm1, %v18977_v60  ;;  %17255 = vmatprep.subr.mxu1 %v18977_v60  ;;  %v2018_v48 = vsub.f32 %v2016_v39, %v2017_v41  ;;  %v2853_v0 = vsel %vm1038_vm2, %v2850_v62, 0 }
 0x361   :  { %17392 = vmatprep.mubr.msk.f32.mxu0 %vm18978_vm1, %v18977_v60  ;;  %17425 = vmatprep.subr.mxu0 %v18977_v60  ;;  %v2856_v3 = vand.u32 4294901760, %v2853_v0 }
 0x363   :  { %v2933_v54 = vsub.f32 %v2853_v0, %v2856_v3 }
 0x366   :  { %17253 = vmatmul.mubr.f32.vlgmr.msra.gmra.mrb[2].mxu1 %v19357_v6  ;;  %17393 = vmatmul.mubr.f32.vlgmr.msra.gmra.mrb[8].mxu0 %v19320_v44  ;;  %v2019_v44 = vand.u32 4294901760, %v2018_v48 }
 0x367   :  { %17256 = vmatpush3.xpose.msra.mxu1 %v19369_v8  ;;  %17426 = vmatpush3.xpose.msra.mxu0 %v19387_v18 }
 0x368   :  { %17427 = vmatprep.mubr.msk.f32.mxu0 %vm18978_vm1, %v18977_v60  ;;  %17430 = vmatprep.subr.mxu0 %v18977_v60 }
 0x369   :  { %17257 = vmatprep.mubr.msk.f32.mxu1 %vm18978_vm1, %v18977_v60  ;;  %17260 = vmatprep.subr.mxu1 %v18977_v60 }
 0x36a   :  { %17428 = vmatmul.mubr.f32.vlgmr.msra.gmra.mrb[10].mxu0 %v4284_v17 }
 0x36b   :  { %17431 = vmatpush3.xpose.msra.mxu0 %v4295_v38  ;;  %17432 = vmatprep.mubr.msk.f32.mxu0 %vm18978_vm1, %v18977_v60 }
 0x36c   :  { %17435 = vmatprep.subr.mxu0 %v18977_v60 }
 0x36e   :  { %17258 = vmatmul.mubr.f32.vlgmr.msra.gmra.mrb[2].mxu1 %v19366_v58 }
 0x36f   :  { %17261 = vmatpush3.xpose.msra.mxu1 %v19359_v20  ;;  %17262 = vmatprep.mubr.msk.f32.mxu1 %vm18978_vm1, %v18977_v60 }
 0x370   :  { %17265 = vmatprep.subr.mxu1 %v18977_v60 }
 0x372   :  { %17433 = vmatmul.mubr.f32.vlgmr.msra.gmra.mrb[10].mxu0 %v19384_v14 }
 0x373   :  { %17436 = vmatpush3.xpose.msra.mxu0 %v4292_v19  ;;  %17437 = vmatprep.mubr.msk.f32.mxu0 %vm18978_vm1, %v18977_v60 }
 0x374   :  { %17440 = vmatprep.subr.mxu0 %v18977_v60 }
 0x376   :  { %17263 = vmatmul.mubr.f32.vlgmr.msra.gmra.mrb[2].mxu1 %v1564_v10  ;;  %v3756_v10 = vpop.permute.xlu0 %3755 }
 0x377   :  { %17266 = vmatpush3.xpose.msra.mxu1 %v1575_v11  ;;  %17267 = vmatprep.mubr.msk.f32.mxu1 %vm18978_vm1, %v18977_v60  ;;  %v3757_v11 = vsel %vm1038_vm2, %v19305_v33, 0  ;;  %v3759_v28 = vsel %vm1038_vm2, %v3756_v10, 0 }
 0x378   :  { %17270 = vmatprep.subr.mxu1 %v18977_v60  ;;  %v3827_v21 = vand.u32 4294901760, %v3757_v11  ;;  %v3762_v12 = vand.u32 4294901760, %v3759_v28 }
 0x37a   :  { %17438 = vmatmul.mubr.f32.vlgmr.msra.gmra.mrb[10].mxu0 %v4281_v27  ;;  %v3839_v15 = vsub.f32 %v3759_v28, %v3762_v12 }
 0x37b   :  { %17441 = vmatpush3.xpose.msra.mxu0 %v19387_v18  ;;  %17442 = vmatprep.mubr.msk.f32.mxu0 %vm18978_vm1, %v18977_v60 }
 0x37c   :  { %17445 = vmatprep.subr.mxu0 %v18977_v60  ;;  %v3840_v26 = vand.u32 4294901760, %v3839_v15 }
 0x37e   :  { %17268 = vmatmul.mubr.f32.vlgmr.msra.gmra.mrb[2].mxu1 %v19357_v6  ;;  %v3841_v1 = vsub.f32 %v3839_v15, %v3840_v26 }
 0x37f   :  { %17271 = vmatpush3.xpose.msra.mxu1 %v19359_v20  ;;  %17272 = vmatprep.mubr.msk.f32.mxu1 %vm18978_vm1, %v18977_v60  ;;  %v2924_v20 = vsub.f32 %v2922_v4, %v2923_v5 }
 0x380   :  { %17275 = vmatprep.subr.mxu1 %v18977_v60 }
 0x381   :  { %v2925_v8 = vand.u32 4294901760, %v2924_v20 }
 0x382   :  { %17443 = vmatmul.mubr.f32.vlgmr.msra.gmra.mrb[10].mxu0 %v4282_v23  ;;  %v3842_v23 = vand.u32 4294901760, %v3841_v1 }
 0x383   :  { %17446 = vmatpush3.xpose.msra.mxu0 %v4293_v25  ;;  %17447 = vmatprep.mubr.msk.f32.mxu0 %vm18978_vm1, %v18977_v60 }
 0x384   :  { %17450 = vmatprep.subr.mxu0 %v18977_v60 }
 0x386   :  { %17273 = vmatmul.mubr.f32.vlgmr.msra.gmra.mrb[2].mxu1 %v19357_v6  ;;  %v2934_v6 = vand.u32 4294901760, %v2933_v54 }
 0x387   :  { %17276 = vmatpush3.xpose.msra.mxu1 %v1950_v37  ;;  %17277 = vmatprep.mubr.msk.f32.mxu1 %vm18978_vm1, %v18977_v60 }
 0x388   :  { %17280 = vmatprep.subr.mxu1 %v18977_v60  ;;  %v2935_v58 = vsub.f32 %v2933_v54, %v2934_v6 }
 0x38a   :  { %17278 = vmatmul.mubr.f32.vlgmr.msra.gmra.mrb[4].mxu1 %v2019_v44  ;;  %17448 = vmatmul.mubr.f32.vlgmr.msra.gmra.mrb[10].mxu0 %v19384_v14  ;;  %v2936_v9 = vand.u32 4294901760, %v2935_v58 }
 0x38b   :  { %17281 = vmatpush3.xpose.msra.mxu1 %v2030_v45  ;;  %17451 = vmatpush3.xpose.msra.mxu0 %v19387_v18 }
 0x38c   :  { %17282 = vmatprep.mubr.msk.f32.mxu1 %vm18978_vm1, %v18977_v60  ;;  %17285 = vmatprep.subr.mxu1 %v18977_v60 }
 0x38d   :  { %17452 = vmatprep.mubr.msk.f32.mxu0 %vm18978_vm1, %v18977_v60  ;;  %17485 = vmatprep.subr.mxu0 %v18977_v60 }
 0x392   :  { %17283 = vmatmul.mubr.f32.vlgmr.msra.gmra.mrb[4].mxu1 %v2015_v36  ;;  %17453 = vmatmul.mubr.f32.vlgmr.msra.gmra.mrb[10].mxu0 %v19384_v14  ;;  %v3828_v14 = vsub.f32 %v3757_v11, %v3827_v21 }
 0x393   :  { %17286 = vmatpush3.xpose.msra.mxu1 %v2027_v40  ;;  %17287 = vmatprep.mubr.msk.f32.mxu1 %vm18978_vm1, %v18977_v60 }
 0x394   :  { %17290 = vmatprep.subr.mxu1 %v18977_v60  ;;  %17487 = vmatprep.mubr.msk.f32.mxu0 %vm18978_vm1, %v18977_v60  ;;  %v3829_v18 = vand.u32 4294901760, %v3828_v14 }
 0x396   :  { %v3830_v27 = vsub.f32 %v3828_v14, %v3829_v18 }
 0x398   :  { %v3831_v19 = vand.u32 4294901760, %v3830_v27 }
 0x39a   :  { %17288 = vmatmul.mubr.f32.vlgmr.msra.gmra.mrb[4].mxu1 %v2016_v39 }
 0x39b   :  { %17291 = vmatpush3.xpose.msra.mxu1 %v1950_v37  ;;  %17292 = vmatprep.mubr.msk.f32.mxu1 %vm18978_vm1, %v18977_v60 }
 0x39c   :  { %17295 = vmatprep.subr.mxu1 %v18977_v60 }
 0x3a2   :  { %17293 = vmatmul.mubr.f32.vlgmr.msra.gmra.mrb[4].mxu1 %v2017_v41 }
 0x3a3   :  { %17296 = vmatpush3.xpose.msra.mxu1 %v2028_v42  ;;  %17297 = vmatprep.mubr.msk.f32.mxu1 %vm18978_vm1, %v18977_v60 }
 0x3a4   :  { %17300 = vmatprep.subr.mxu1 %v18977_v60 }
 0x3aa   :  { %17298 = vmatmul.mubr.f32.vlgmr.msra.gmra.mrb[4].mxu1 %v2015_v36 }
 0x3ab   :  { %17301 = vmatpush3.xpose.msra.mxu1 %v1950_v37  ;;  %17302 = vmatprep.mubr.msk.f32.mxu1 %vm18978_vm1, %v18977_v60 }
 0x3ac   :  { %17305 = vmatprep.subr.mxu1 %v18977_v60 }
 0x3b2   :  { %17303 = vmatmul.mubr.f32.vlgmr.msra.gmra.mrb[4].mxu1 %v2015_v36 }
 0x3b3   :  { %17306 = vmatpush3.xpose.msra.mxu1 %v2403_v51  ;;  %17307 = vmatprep.mubr.msk.f32.mxu1 %vm18978_vm1, %v18977_v60 }
 0x3b4   :  { %17310 = vmatprep.subr.mxu1 %v18977_v60 }
 0x3b6   :  { %17308 = vmatmul.mubr.f32.vlgmr.msra.gmra.mrb[6].mxu1 %v2472_v59 }
 0x3b7   :  { %17311 = vmatpush3.xpose.msra.mxu1 %v2483_v61  ;;  %17312 = vmatprep.mubr.msk.f32.mxu1 %vm18978_vm1, %v18977_v60 }
 0x3b8   :  { %17315 = vmatprep.subr.mxu1 %v18977_v60 }
 0x3be   :  { %17313 = vmatmul.mubr.f32.vlgmr.msra.gmra.mrb[6].mxu1 %v2468_v50 }
 0x3bf   :  { %17316 = vmatpush3.xpose.msra.mxu1 %v2480_v49  ;;  %17317 = vmatprep.mubr.msk.f32.mxu1 %vm18978_vm1, %v18977_v60 }
 0x3c0   :  { %17320 = vmatprep.subr.mxu1 %v18977_v60 }
 0x3c6   :  { %17318 = vmatmul.mubr.f32.vlgmr.msra.gmra.mrb[6].mxu1 %v2469_v52 }
 0x3c7   :  { %17321 = vmatpush3.xpose.msra.mxu1 %v2403_v51  ;;  %17322 = vmatprep.mubr.msk.f32.mxu1 %vm18978_vm1, %v18977_v60 }
 0x3c8   :  { %17325 = vmatprep.subr.mxu1 %v18977_v60 }
 0x3ce   :  { %17323 = vmatmul.mubr.f32.vlgmr.msra.gmra.mrb[6].mxu1 %v2470_v55 }
 0x3cf   :  { %17326 = vmatpush3.xpose.msra.mxu1 %v2481_v53  ;;  %17327 = vmatprep.mubr.msk.f32.mxu1 %vm18978_vm1, %v18977_v60 }
 0x3d0   :  { %17330 = vmatprep.subr.mxu1 %v18977_v60 }
 0x3d6   :  { %17328 = vmatmul.mubr.f32.vlgmr.msra.gmra.mrb[6].mxu1 %v2468_v50 }
 0x3d7   :  { %17331 = vmatpush3.xpose.msra.mxu1 %v2403_v51  ;;  %17332 = vmatprep.mubr.msk.f32.mxu1 %vm18978_vm1, %v18977_v60 }
 0x3d8   :  { %17335 = vmatprep.subr.mxu1 %v18977_v60 }
 0x3de   :  { %17333 = vmatmul.mubr.f32.vlgmr.msra.gmra.mrb[6].mxu1 %v2468_v50 }
 0x3df   :  { %17336 = vmatpush3.xpose.msra.mxu1 %v2856_v3  ;;  %17337 = vmatprep.mubr.msk.f32.mxu1 %vm18978_vm1, %v18977_v60 }
 0x3e0   :  { %17340 = vmatprep.subr.mxu1 %v18977_v60 }
 0x3e2   :  { %17338 = vmatmul.mubr.f32.vlgmr.msra.gmra.mrb[8].mxu1 %v2925_v8 }
 0x3e3   :  { %17341 = vmatpush3.xpose.msra.mxu1 %v2936_v9  ;;  %17342 = vmatprep.mubr.msk.f32.mxu1 %vm18978_vm1, %v18977_v60 }
 0x3e4   :  { %17345 = vmatprep.subr.mxu1 %v18977_v60 }
 0x3ea   :  { %17343 = vmatmul.mubr.f32.vlgmr.msra.gmra.mrb[8].mxu1 %v2921_v2 }
 0x3eb   :  { %17346 = vmatpush3.xpose.msra.mxu1 %v2933_v54  ;;  %17347 = vmatprep.mubr.msk.f32.mxu1 %vm18978_vm1, %v18977_v60 }
 0x3ec   :  { %17350 = vmatprep.subr.mxu1 %v18977_v60 }
 0x3f2   :  { %17348 = vmatmul.mubr.f32.vlgmr.msra.gmra.mrb[8].mxu1 %v2922_v4 }
 0x3f3   :  { %17351 = vmatpush3.xpose.msra.mxu1 %v2856_v3  ;;  %17352 = vmatprep.mubr.msk.f32.mxu1 %vm18978_vm1, %v18977_v60 }
 0x3f4   :  { %17355 = vmatprep.subr.mxu1 %v18977_v60 }
 0x3fa   :  { %17353 = vmatmul.mubr.f32.vlgmr.msra.gmra.mrb[8].mxu1 %v2923_v5 }
 0x3fb   :  { %17356 = vmatpush3.xpose.msra.mxu1 %v2934_v6  ;;  %17357 = vmatprep.mubr.msk.f32.mxu1 %vm18978_vm1, %v18977_v60 }
 0x3fc   :  { %17360 = vmatprep.subr.mxu1 %v18977_v60 }
 0x402   :  { %17358 = vmatmul.mubr.f32.vlgmr.msra.gmra.mrb[8].mxu1 %v2921_v2 }
 0x403   :  { %17361 = vmatpush3.xpose.msra.mxu1 %v2856_v3  ;;  %17362 = vmatprep.mubr.msk.f32.mxu1 %vm18978_vm1, %v18977_v60 }
 0x404   :  { %17395 = vmatprep.subr.mxu1 %v18977_v60 }
 0x40a   :  { %17363 = vmatmul.mubr.f32.vlgmr.msra.gmra.mrb[8].mxu1 %v2921_v2 }
 0x40b   :  { %17396 = vmatpush3.xpose.msra.mxu1 %v3762_v12  ;;  %17397 = vmatprep.mubr.msk.f32.mxu1 %vm18978_vm1, %v18977_v60 }
 0x40c   :  { %17400 = vmatprep.subr.mxu1 %v18977_v60 }
 0x40e   :  { %17398 = vmatmul.mubr.f32.vlgmr.msra.gmra.mrb[10].mxu1 %v3831_v19 }
 0x40f   :  { %17401 = vmatpush3.xpose.msra.mxu1 %v3842_v23  ;;  %17402 = vmatprep.mubr.msk.f32.mxu1 %vm18978_vm1, %v18977_v60 }
 0x410   :  { %17405 = vmatprep.subr.mxu1 %v18977_v60 }
 0x416   :  { %17403 = vmatmul.mubr.f32.vlgmr.msra.gmra.mrb[10].mxu1 %v3827_v21 }
 0x417   :  { %17406 = vmatpush3.xpose.msra.mxu1 %v3839_v15  ;;  %17407 = vmatprep.mubr.msk.f32.mxu1 %vm18978_vm1, %v18977_v60 }
 0x418   :  { %17410 = vmatprep.subr.mxu1 %v18977_v60 }
 0x41e   :  { %17408 = vmatmul.mubr.f32.vlgmr.msra.gmra.mrb[10].mxu1 %v3828_v14 }
 0x41f   :  { %17411 = vmatpush3.xpose.msra.mxu1 %v3762_v12  ;;  %17412 = vmatprep.mubr.msk.f32.mxu1 %vm18978_vm1, %v18977_v60 }
 0x420   :  { %17415 = vmatprep.subr.mxu1 %v18977_v60 }
 0x426   :  { %17413 = vmatmul.mubr.f32.vlgmr.msra.gmra.mrb[10].mxu1 %v3829_v18 }
 0x427   :  { %17416 = vmatpush3.xpose.msra.mxu1 %v3840_v26  ;;  %17417 = vmatprep.mubr.msk.f32.mxu1 %vm18978_vm1, %v18977_v60 }
 0x428   :  { %17420 = vmatprep.subr.mxu1 %v18977_v60 }
 0x42d   :  { %v1485_v25 = vpop.f32.mrb[0].mxu1 }
 0x42e   :  { %v17244_v7 = vpop.f32.mrb[1].mxu1  ;;  %17418 = vmatmul.mubr.f32.vlgmr.msra.gmra.mrb[10].mxu1 %v3827_v21  ;;  %v4660_v16 = vsel %vm1038_vm2, %v1485_v25, -inf }
 0x42f   :  { %17421 = vmatpush3.xpose.msra.mxu1 %v3762_v12  ;;  %4661 = vmax.xlane.f32.xlu0 %v4660_v16 }
 0x430   :  { %17422 = vmatprep.mubr.msk.f32.mxu1 %vm18978_vm1, %v18977_v60  ;;  %17455 = vmatprep.subr.mxu1 %v18977_v60 }
 0x436   :  { %17423 = vmatmul.mubr.f32.vlgmr.msra.gmra.mrb[10].mxu1 %v3827_v21 }
 0x437   :  { %17457 = vmatprep.mubr.msk.f32.mxu1 %vm18978_vm1, %v18977_v60 }
 0x439   :  { %v3750_v17 = vpop.f32.mrb[8].mxu0 }
 0x43a   :  { %v17394_v38 = vpop.f32.mrb[9].mxu0  ;;  %v4675_v45 = vsel %vm1038_vm2, %v3750_v17, -inf }
 0x459   :  { %v1938_v31 = vpop.f32.mrb[2].mxu1 }
 0x45a   :  { %v17274_v35 = vpop.f32.mrb[3].mxu1  ;;  %v4663_v36 = vsel %vm1038_vm2, %v1938_v31, -inf }
 0x45b   :  { %4664 = vmax.xlane.f32.xlu1 %v4663_v36 }
 0x465   :  { %v19540_v37 = vpop.f32.mrb[10].mxu0 }
 0x466   :  { %v17454_v39 = vpop.f32.mrb[11].mxu0  ;;  %v4681_v2 = vsel %vm1038_vm2, %v19540_v37, -inf }
 0x485   :  { %v2391_v40 = vpop.f32.mrb[4].mxu1 }
 0x486   :  { %v17304_v41 = vpop.f32.mrb[5].mxu1  ;;  %v4666_v42 = vsel %vm1038_vm2, %v2391_v40, -inf }
 0x487   :  { %4667 = vmax.xlane.f32.xlu0 %v4666_v42 }
 0x4b1   :  { %v2844_v48 = vpop.f32.mrb[6].mxu1 }
 0x4b2   :  { %v17334_v43 = vpop.f32.mrb[7].mxu1  ;;  %v4669_v44 = vsel %vm1038_vm2, %v2844_v48, -inf }
 0x4b3   :  { %4670 = vmax.xlane.f32.xlu0 %v4669_v44 }
 0x4b7   :  { %4676 = vmax.xlane.f32.xlu0 %v4675_v45 }
 0x4bc   :  { %v4662_v46 = vpop.xlane.xlu0 %4661 }
 0x4bd   :  { %v4684_v47 = vsub.f32 %v1485_v25, %v4662_v46 }
 0x4bf   :  { %v4692_v50 = vmul.f32 1.442695, %v4684_v47 }
 0x4c1   :  { %18789 = vpow2.f32 %v4692_v50 }
 0x4cb   :  { %v18790_v51 = vpop.eup %18789 }
 0x4cc   :  { %v4708_v52 = vsel %vm1038_vm2, %v18790_v51, 0.0 }
 0x4cd   :  { %4709 = vadd.xlane.f32.xlu1 %v4708_v52 }
 0x4dd   :  { %v3297_v49 = vpop.f32.mrb[8].mxu1 }
 0x4de   :  { %v17364_v55 = vpop.f32.mrb[9].mxu1  ;;  %v4672_v53 = vsel %vm1038_vm2, %v3297_v49, -inf }
 0x4df   :  { %4673 = vmax.xlane.f32.xlu0 %v4672_v53 }
 0x4e8   :  { %v4665_v56 = vpop.xlane.xlu1 %4664 }
 0x4e9   :  { %v4685_v57 = vsub.f32 %v1938_v31, %v4665_v56 }
 0x4eb   :  { %v4694_v59 = vmul.f32 1.442695, %v4685_v57 }
 0x4ed   :  { %18791 = vpow2.f32 %v4694_v59 }
 0x4f5   :  { %4756 = vrot.lane.b32.xlu0 %v19290_v24, %s18980_s3 }
 0x4f7   :  { %v19549_v61 = vpop.eup %18791 }
 0x4f8   :  { %v4711_v62 = vsel %vm1038_vm2, %v19549_v61, 0.0 }
 0x4f9   :  { %4712 = vadd.xlane.f32.xlu1 %v4711_v62 }
 0x509   :  { %v19553_v63 = vpop.f32.mrb[10].mxu1 }
 0x50a   :  { %5208 = vrot.lane.b32.xlu1 %v19288_v22, %s18980_s3  ;;  %v17424_v0 = vpop.f32.mrb[11].mxu1  ;;  %v4678_v20 = vsel %vm1038_vm2, %v19553_v63, -inf }
 0x514   :  { %v4668_v3 = vpop.xlane.xlu0 %4667  ;;  %4682 = vmax.xlane.f32.xlu0 %v4681_v2 }
 0x515   :  { %v4686_v4 = vsub.f32 %v2391_v40, %v4668_v3 }
 0x517   :  { %v4696_v54 = vmul.f32 1.442695, %v4686_v4 }
 0x519   :  { %18793 = vpow2.f32 %v4696_v54 }
 0x523   :  { %v19559_v5 = vpop.eup %18793 }
 0x524   :  { %v4714_v6 = vsel %vm1038_vm2, %v19559_v5, 0.0 }
 0x525   :  { %4715 = vadd.xlane.f32.xlu0 %v4714_v6 }
 0x52e   :  { %4679 = vmax.xlane.f32.xlu1 %v4678_v20 }
 0x53b   :  { %5660 = vrot.lane.b32.xlu0 %v19294_v13, %s18980_s3 }
 0x540   :  { %v4671_v58 = vpop.xlane.xlu0 %4670 }
 0x541   :  { %v4687_v8 = vsub.f32 %v2844_v48, %v4671_v58 }
 0x543   :  { %v4698_v9 = vmul.f32 1.442695, %v4687_v8 }
 0x544   :  { %v4677_v10 = vpop.xlane.xlu0 %4676 }
 0x545   :  { %18795 = vpow2.f32 %v4698_v9  ;;  %v4689_v11 = vsub.f32 %v3750_v17, %v4677_v10 }
 0x547   :  { %v4702_v28 = vmul.f32 1.442695, %v4689_v11 }
 0x549   :  { %18797 = vpow2.f32 %v4702_v28 }
 0x54f   :  { %v19567_v21 = vpop.eup %18795 }
 0x550   :  { %v4717_v12 = vsel %vm1038_vm2, %v19567_v21, 0.0 }
 0x551   :  { %4718 = vadd.xlane.f32.xlu1 %v4717_v12 }
 0x553   :  { %v19571_v14 = vpop.eup %18797 }
 0x554   :  { %v4723_v15 = vsel %vm1038_vm2, %v19571_v14, 0.0 }
 0x55a   :  { %v4710_v18 = vpop.xlane.xlu1 %4709  ;;  %4724 = vadd.xlane.f32.xlu0 %v4723_v15 }
 0x55b   :  { %18799 = vrcp.f32 %v4710_v18 }
 0x562   :  { %6112 = vrot.lane.b32.xlu1 %v19297_v29, %s18980_s3 }
 0x565   :  { %v18800_v26 = vpop.eup %18799 }
 0x566   :  { %v4748_v27 = vmul.f32 %v18800_v26, %v18790_v51 }
 0x568   :  { %v4760_v1 = vsel %vm1038_vm2, %v4748_v27, 0 }
 0x569   :  { %v4828_v19 = vand.u32 4294901760, %v4760_v1 }
 0x56b   :  { %v4829_v23 = vsub.f32 %v4760_v1, %v4828_v19 }
 0x56c   :  { %v4674_v25 = vpop.xlane.xlu0 %4673 }
 0x56d   :  { %v4830_v7 = vand.u32 4294901760, %v4829_v23  ;;  %v4688_v17 = vsub.f32 %v3297_v49, %v4674_v25 }
 0x56f   :  { %v4831_v16 = vsub.f32 %v4829_v23, %v4830_v7  ;;  %v4700_v39 = vmul.f32 1.442695, %v4688_v17 }
 0x570   :  { %6564 = vrot.lane.b32.xlu0 %v19299_v30, %s18980_s3  ;;  %v4757_v38 = vpop.permute.xlu0 %4756 }
 0x571   :  { %v4763_v31 = vand.u32 4294901760, %v4757_v38  ;;  %v4832_v35 = vand.u32 4294901760, %v4831_v16  ;;  %18801 = vpow2.f32 %v4700_v39 }
 0x573   :  { %v4840_v36 = vsub.f32 %v4757_v38, %v4763_v31  ;;  %17456 = vmatpush3.msra.mxu1 %v4763_v31 }
 0x574   :  { %17458 = vmatmul.mubr.f32.vlgmr.msra.gmra.mrb[12].mxu1 %v4832_v35  ;;  %17460 = vmatprep.subr.mxu1 %v18977_v60 }
 0x575   :  { %v4841_v40 = vand.u32 4294901760, %v4840_v36  ;;  %17462 = vmatprep.mubr.msk.f32.mxu1 %vm18978_vm1, %v18977_v60 }
 0x577   :  { %v4842_v41 = vsub.f32 %v4840_v36, %v4841_v40 }
 0x579   :  { %v4843_v42 = vand.u32 4294901760, %v4842_v41 }
 0x57b   :  { %17461 = vmatpush3.msra.mxu1 %v4843_v42  ;;  %v19587_v48 = vpop.eup %18801 }
 0x57c   :  { %17463 = vmatmul.mubr.f32.vlgmr.msra.gmra.mrb[12].mxu1 %v4828_v19  ;;  %17465 = vmatprep.subr.mxu1 %v18977_v60  ;;  %v4720_v43 = vsel %vm1038_vm2, %v19587_v48, 0.0 }
 0x57d   :  { %17466 = vmatpush3.msra.mxu1 %v4840_v36  ;;  %17467 = vmatprep.mubr.msk.f32.mxu1 %vm18978_vm1, %v18977_v60 }
 0x57e   :  { %17470 = vmatprep.subr.mxu1 %v18977_v60 }
 0x584   :  { %17468 = vmatmul.mubr.f32.vlgmr.msra.gmra.mrb[12].mxu1 %v4829_v23 }
 0x585   :  { %17471 = vmatpush3.msra.mxu1 %v4763_v31  ;;  %17472 = vmatprep.mubr.msk.f32.mxu1 %vm18978_vm1, %v18977_v60 }
 0x586   :  { %v4713_v44 = vpop.xlane.xlu1 %4712  ;;  %4721 = vadd.xlane.f32.xlu1 %v4720_v43  ;;  %17475 = vmatprep.subr.mxu1 %v18977_v60 }
 0x587   :  { %18803 = vrcp.f32 %v4713_v44 }
 0x58a   :  { %v5209_v45 = vpop.permute.xlu1 %5208 }
 0x58b   :  { %v5215_v46 = vand.u32 4294901760, %v5209_v45 }
 0x58c   :  { %17473 = vmatmul.mubr.f32.vlgmr.msra.gmra.mrb[12].mxu1 %v4830_v7 }
 0x58d   :  { %17476 = vmatpush3.msra.mxu1 %v4841_v40  ;;  %17486 = vmatpush3.msra.mxu0 %v5215_v46  ;;  %v5292_v51 = vsub.f32 %v5209_v45, %v5215_v46 }
 0x58e   :  { %17477 = vmatprep.mubr.msk.f32.mxu1 %vm18978_vm1, %v18977_v60  ;;  %17480 = vmatprep.subr.mxu1 %v18977_v60 }
 0x58f   :  { %17490 = vmatprep.subr.mxu0 %v18977_v60  ;;  %v5293_v55 = vand.u32 4294901760, %v5292_v51 }
 0x591   :  { %v18804_v47 = vpop.eup %18803  ;;  %v5294_v57 = vsub.f32 %v5292_v51, %v5293_v55 }
 0x592   :  { %v4749_v50 = vmul.f32 %v18804_v47, %v19549_v61 }
 0x593   :  { %v5295_v62 = vand.u32 4294901760, %v5294_v57 }
 0x594   :  { %17478 = vmatmul.mubr.f32.vlgmr.msra.gmra.mrb[12].mxu1 %v4828_v19  ;;  %v5212_v52 = vsel %vm1038_vm2, %v4749_v50, 0 }
 0x595   :  { %17481 = vmatpush3.msra.mxu1 %v4763_v31  ;;  %17482 = vmatprep.mubr.msk.f32.mxu1 %vm18978_vm1, %v18977_v60  ;;  %v5280_v49 = vand.u32 4294901760, %v5212_v52 }
 0x596   :  { %17515 = vmatprep.subr.mxu1 %v18977_v60 }
 0x597   :  { %7016 = vrot.lane.b32.xlu1 %v19303_v32, %s18980_s3  ;;  %v5281_v53 = vsub.f32 %v5212_v52, %v5280_v49 }
 0x599   :  { %v5282_v56 = vand.u32 4294901760, %v5281_v53 }
 0x59b   :  { %v5283_v59 = vsub.f32 %v5281_v53, %v5282_v56 }
 0x59c   :  { %17483 = vmatmul.mubr.f32.vlgmr.msra.gmra.mrb[12].mxu1 %v4828_v19 }
 0x59d   :  { %v5284_v61 = vand.u32 4294901760, %v5283_v59  ;;  %17517 = vmatprep.mubr.msk.f32.mxu1 %vm18978_vm1, %v18977_v60 }
 0x59f   :  { %17488 = vmatmul.mubr.f32.vlgmr.msra.gmra.mrb[12].mxu0 %v5284_v61 }
 0x5a0   :  { %17491 = vmatpush3.msra.mxu0 %v5295_v62  ;;  %17492 = vmatprep.mubr.msk.f32.mxu0 %vm18978_vm1, %v18977_v60 }
 0x5a1   :  { %v4683_v0 = vpop.xlane.xlu0 %4682  ;;  %17495 = vmatprep.subr.mxu0 %v18977_v60 }
 0x5a2   :  { %v4691_v2 = vsub.f32 %v19540_v37, %v4683_v0 }
 0x5a4   :  { %v4706_v3 = vmul.f32 1.442695, %v4691_v2 }
 0x5a6   :  { %18805 = vpow2.f32 %v4706_v3 }
 0x5a7   :  { %17493 = vmatmul.mubr.f32.vlgmr.msra.gmra.mrb[12].mxu0 %v5280_v49 }
 0x5a8   :  { %17496 = vmatpush3.msra.mxu0 %v5292_v51  ;;  %17497 = vmatprep.mubr.msk.f32.mxu0 %vm18978_vm1, %v18977_v60 }
 0x5a9   :  { %17500 = vmatprep.subr.mxu0 %v18977_v60 }
 0x5af   :  { %17498 = vmatmul.mubr.f32.vlgmr.msra.gmra.mrb[12].mxu0 %v5281_v53 }
 0x5b0   :  { %v19614_v4 = vpop.eup %18805  ;;  %17501 = vmatpush3.msra.mxu0 %v5215_v46  ;;  %17502 = vmatprep.mubr.msk.f32.mxu0 %vm18978_vm1, %v18977_v60 }
 0x5b1   :  { %v4729_v54 = vsel %vm1038_vm2, %v19614_v4, 0.0  ;;  %17505 = vmatprep.subr.mxu0 %v18977_v60 }
 0x5b2   :  { %4730 = vadd.xlane.f32.xlu0 %v4729_v54  ;;  %v4716_v37 = vpop.xlane.xlu0 %4715 }
 0x5b3   :  { %18807 = vrcp.f32 %v4716_v37 }
 0x5b6   :  { %v5661_v6 = vpop.permute.xlu0 %5660 }
 0x5b7   :  { %v19621_v20 = vand.u32 4294901760, %v5661_v6  ;;  %17503 = vmatmul.mubr.f32.vlgmr.msra.gmra.mrb[12].mxu0 %v5282_v56 }
 0x5b8   :  { %17506 = vmatpush3.msra.mxu0 %v5293_v55  ;;  %17507 = vmatprep.mubr.msk.f32.mxu0 %vm18978_vm1, %v18977_v60 }
 0x5b9   :  { %17516 = vmatpush3.msra.mxu1 %v19621_v20  ;;  %17510 = vmatprep.subr.mxu0 %v18977_v60  ;;  %v5744_v11 = vsub.f32 %v5661_v6, %v19621_v20 }
 0x5ba   :  { %17520 = vmatprep.subr.mxu1 %v18977_v60 }
 0x5bb   :  { %v4680_v58 = vpop.xlane.xlu1 %4679  ;;  %v5745_v18 = vand.u32 4294901760, %v5744_v11 }
 0x5bc   :  { %v4690_v8 = vsub.f32 %v19553_v63, %v4680_v58 }
 0x5bd   :  { %v18808_v9 = vpop.eup %18807 }
 0x5be   :  { %v4750_v10 = vmul.f32 %v18808_v9, %v19559_v5  ;;  %v4704_v28 = vmul.f32 1.442695, %v4690_v8  ;;  %v5746_v5 = vsub.f32 %v5744_v11, %v5745_v18 }
 0x5bf   :  { %17508 = vmatmul.mubr.f32.vlgmr.msra.gmra.mrb[12].mxu0 %v5280_v49 }
 0x5c0   :  { %18809 = vpow2.f32 %v4704_v28  ;;  %17511 = vmatpush3.msra.mxu0 %v5215_v46  ;;  %17512 = vmatprep.mubr.msk.f32.mxu0 %vm18978_vm1, %v18977_v60  ;;  %v5664_v12 = vsel %vm1038_vm2, %v4750_v10, 0  ;;  %v5747_v23 = vand.u32 4294901760, %v5746_v5 }
 0x5c1   :  { %v19634_v15 = vand.u32 4294901760, %v5664_v12  ;;  %17545 = vmatprep.subr.mxu0 %v18977_v60 }
 0x5c3   :  { %v5733_v63 = vsub.f32 %v5664_v12, %v19634_v15 }
 0x5c5   :  { %v5734_v26 = vand.u32 4294901760, %v5733_v63 }
 0x5c7   :  { %17513 = vmatmul.mubr.f32.vlgmr.msra.gmra.mrb[12].mxu0 %v5280_v49  ;;  %v5735_v27 = vsub.f32 %v5733_v63, %v5734_v26 }
 0x5c8   :  { %7468 = vrot.lane.b32.xlu0 %v19305_v33, %s18980_s3  ;;  %17547 = vmatprep.mubr.msk.f32.mxu0 %vm18978_vm1, %v18977_v60 }
 0x5c9   :  { %v5736_v1 = vand.u32 4294901760, %v5735_v27 }
 0x5ca   :  { %v19642_v19 = vpop.eup %18809 }
 0x5cb   :  { %17518 = vmatmul.mubr.f32.vlgmr.msra.gmra.mrb[14].mxu1 %v5736_v1  ;;  %v4726_v25 = vsel %vm1038_vm2, %v19642_v19, 0.0 }
 0x5cc   :  { %17521 = vmatpush3.msra.mxu1 %v5747_v23  ;;  %8374 = vrot.lane.b32.xlu0 %v19290_v24, %s18981_s18 }
 0x5cd   :  { %4727 = vadd.xlane.f32.xlu1 %v4726_v25  ;;  %17522 = vmatprep.mubr.msk.f32.mxu1 %vm18978_vm1, %v18977_v60 }
 0x5ce   :  { %17525 = vmatprep.subr.mxu1 %v18977_v60 }
 0x5d0   :  { %9280 = vrot.lane.b32.xlu0 %v19294_v13, %s18982_s19 }
 0x5d3   :  { %17523 = vmatmul.mubr.f32.vlgmr.msra.gmra.mrb[14].mxu1 %v19634_v15 }
 0x5d4   :  { %17526 = vmatpush3.msra.mxu1 %v5744_v11  ;;  %9282 = vrot.lane.b32.xlu0 %v19294_v13, %s18981_s18 }
 0x5d5   :  { %17527 = vmatprep.mubr.msk.f32.mxu1 %vm18978_vm1, %v18977_v60  ;;  %17530 = vmatprep.subr.mxu1 %v18977_v60 }
 0x5d8   :  { %10188 = vrot.lane.b32.xlu0 %v19299_v30, %s18982_s19 }
 0x5db   :  { %17528 = vmatmul.mubr.f32.vlgmr.msra.gmra.mrb[14].mxu1 %v5733_v63 }
 0x5dc   :  { %17531 = vmatpush3.msra.mxu1 %v19621_v20  ;;  %10190 = vrot.lane.b32.xlu0 %v19299_v30, %s18981_s18 }
 0x5dd   :  { %17532 = vmatprep.mubr.msk.f32.mxu1 %vm18978_vm1, %v18977_v60  ;;  %17535 = vmatprep.subr.mxu1 %v18977_v60 }
 0x5de   :  { %7920 = vrot.lane.b32.xlu1 %v19309_v34, %s18980_s3  ;;  %v4719_v7 = vpop.xlane.xlu1 %4718 }
 0x5df   :  { %18811 = vrcp.f32 %v4719_v7 }
 0x5e0   :  { %11096 = vrot.lane.b32.xlu0 %v19305_v33, %s18982_s19 }
 0x5e2   :  { %8372 = vrot.lane.b32.xlu1 %v19290_v24, %s18982_s19  ;;  %v6113_v16 = vpop.permute.xlu1 %6112 }
 0x5e3   :  { %v19673_v17 = vand.u32 4294901760, %v6113_v16  ;;  %17533 = vmatmul.mubr.f32.vlgmr.msra.gmra.mrb[14].mxu1 %v5734_v26 }
 0x5e4   :  { %17536 = vmatpush3.msra.mxu1 %v5745_v18  ;;  %11098 = vrot.lane.b32.xlu0 %v19305_v33, %s18981_s18 }
 0x5e5   :  { %17546 = vmatpush3.msra.mxu0 %v19673_v17  ;;  %17537 = vmatprep.mubr.msk.f32.mxu1 %vm18978_vm1, %v18977_v60  ;;  %v6196_v36 = vsub.f32 %v6113_v16, %v19673_v17 }
 0x5e6   :  { %8826 = vrot.lane.b32.xlu1 %v19288_v22, %s18982_s19  ;;  %17540 = vmatprep.subr.mxu1 %v18977_v60 }
 0x5e7   :  { %17550 = vmatprep.subr.mxu0 %v18977_v60  ;;  %v4725_v31 = vpop.xlane.xlu0 %4724  ;;  %v6197_v41 = vand.u32 4294901760, %v6196_v36 }
 0x5e8   :  { %18813 = vrcp.f32 %v4725_v31 }
 0x5e9   :  { %v18812_v38 = vpop.eup %18811  ;;  %v6198_v44 = vsub.f32 %v6196_v36, %v6197_v41 }
 0x5ea   :  { %v4751_v35 = vmul.f32 %v18812_v38, %v19567_v21  ;;  %8828 = vrot.lane.b32.xlu1 %v19288_v22, %s18981_s18 }
 0x5eb   :  { %17538 = vmatmul.mubr.f32.vlgmr.msra.gmra.mrb[14].mxu1 %v19634_v15  ;;  %v6565_v21 = vpop.permute.xlu0 %6564  ;;  %v6199_v50 = vand.u32 4294901760, %v6198_v44 }
 0x5ec   :  { %17541 = vmatpush3.msra.mxu1 %v19621_v20  ;;  %17542 = vmatprep.mubr.msk.f32.mxu1 %vm18978_vm1, %v18977_v60  ;;  %v6116_v39 = vsel %vm1038_vm2, %v4751_v35, 0  ;;  %v19696_v45 = vand.u32 4294901760, %v6565_v21 }
 0x5ed   :  { %17575 = vmatprep.subr.mxu1 %v18977_v60  ;;  %v6184_v40 = vand.u32 4294901760, %v6116_v39 }
 0x5ee   :  { %9734 = vrot.lane.b32.xlu1 %v19297_v29, %s18982_s19  ;;  %v6648_v54 = vsub.f32 %v6565_v21, %v19696_v45 }
 0x5ef   :  { %v6185_v42 = vsub.f32 %v6116_v39, %v6184_v40 }
 0x5f0   :  { %v6649_v9 = vand.u32 4294901760, %v6648_v54 }
 0x5f1   :  { %v6186_v43 = vand.u32 4294901760, %v6185_v42 }
 0x5f2   :  { %9736 = vrot.lane.b32.xlu1 %v19297_v29, %s18981_s18  ;;  %v18814_v51 = vpop.eup %18813  ;;  %v6650_v11 = vsub.f32 %v6648_v54, %v6649_v9 }
 0x5f3   :  { %17543 = vmatmul.mubr.f32.vlgmr.msra.gmra.mrb[14].mxu1 %v19634_v15  ;;  %v6187_v46 = vsub.f32 %v6185_v42, %v6186_v43  ;;  %v4753_v52 = vmul.f32 %v18814_v51, %v19571_v14 }
 0x5f4   :  { %17576 = vmatpush3.msra.mxu1 %v19696_v45  ;;  %17577 = vmatprep.mubr.msk.f32.mxu1 %vm18978_vm1, %v18977_v60  ;;  %v6651_v15 = vand.u32 4294901760, %v6650_v11 }
 0x5f5   :  { %v6188_v47 = vand.u32 4294901760, %v6187_v46  ;;  %17580 = vmatprep.subr.mxu1 %v18977_v60  ;;  %v7020_v49 = vsel %vm1038_vm2, %v4753_v52, 0 }
 0x5f6   :  { %10642 = vrot.lane.b32.xlu1 %v19303_v32, %s18982_s19  ;;  %v19728_v55 = vand.u32 4294901760, %v7020_v49 }
 0x5f7   :  { %17548 = vmatmul.mubr.f32.vlgmr.msra.gmra.mrb[14].mxu0 %v6188_v47 }
 0x5f8   :  { %17551 = vmatpush3.msra.mxu0 %v6199_v50  ;;  %17552 = vmatprep.mubr.msk.f32.mxu0 %vm18978_vm1, %v18977_v60  ;;  %v7089_v56 = vsub.f32 %v7020_v49, %v19728_v55 }
 0x5f9   :  { %17555 = vmatprep.subr.mxu0 %v18977_v60 }
 0x5fa   :  { %10644 = vrot.lane.b32.xlu1 %v19303_v32, %s18981_s18  ;;  %v7090_v59 = vand.u32 4294901760, %v7089_v56 }
 0x5fc   :  { %v7091_v0 = vsub.f32 %v7089_v56, %v7090_v59 }
 0x5fe   :  { %11550 = vrot.lane.b32.xlu1 %v19309_v34, %s18982_s19  ;;  %v7092_v20 = vand.u32 4294901760, %v7091_v0 }
 0x5ff   :  { %17553 = vmatmul.mubr.f32.vlgmr.msra.gmra.mrb[14].mxu0 %v6184_v40 }
 0x600   :  { %17556 = vmatpush3.msra.mxu0 %v6196_v36  ;;  %17557 = vmatprep.mubr.msk.f32.mxu0 %vm18978_vm1, %v18977_v60 }
 0x601   :  { %17560 = vmatprep.subr.mxu0 %v18977_v60 }
 0x602   :  { %11552 = vrot.lane.b32.xlu1 %v19309_v34, %s18981_s18 }
 0x607   :  { %17558 = vmatmul.mubr.f32.vlgmr.msra.gmra.mrb[14].mxu0 %v6185_v42 }
 0x608   :  { %17561 = vmatpush3.msra.mxu0 %v19673_v17  ;;  %17562 = vmatprep.mubr.msk.f32.mxu0 %vm18978_vm1, %v18977_v60 }
 0x609   :  { %17565 = vmatprep.subr.mxu0 %v18977_v60 }
 0x60f   :  { %17563 = vmatmul.mubr.f32.vlgmr.msra.gmra.mrb[14].mxu0 %v6186_v43 }
 0x610   :  { %17566 = vmatpush3.msra.mxu0 %v6197_v41  ;;  %17567 = vmatprep.mubr.msk.f32.mxu0 %vm18978_vm1, %v18977_v60 }
 0x611   :  { %17570 = vmatprep.subr.mxu0 %v18977_v60 }
 0x613   :  { %v4722_v53 = vpop.xlane.xlu1 %4721 }
 0x614   :  { %18815 = vrcp.f32 %v4722_v53 }
 0x617   :  { %17568 = vmatmul.mubr.f32.vlgmr.msra.gmra.mrb[14].mxu0 %v6184_v40  ;;  %v7017_v57 = vpop.permute.xlu1 %7016 }
 0x618   :  { %17571 = vmatpush3.msra.mxu0 %v19673_v17  ;;  %v7023_v14 = vand.u32 4294901760, %v7017_v57  ;;  %17572 = vmatprep.mubr.msk.f32.mxu0 %vm18978_vm1, %v18977_v60 }
 0x619   :  { %17605 = vmatprep.subr.mxu0 %v18977_v60 }
 0x61a   :  { %v7100_v61 = vsub.f32 %v7017_v57, %v7023_v14 }
 0x61c   :  { %v7101_v62 = vand.u32 4294901760, %v7100_v61 }
 0x61e   :  { %v18816_v2 = vpop.eup %18815  ;;  %v7102_v3 = vsub.f32 %v7100_v61, %v7101_v62 }
 0x61f   :  { %v4752_v37 = vmul.f32 %v18816_v2, %v19587_v48  ;;  %17573 = vmatmul.mubr.f32.vlgmr.msra.gmra.mrb[14].mxu0 %v6184_v40 }
 0x620   :  { %v7103_v6 = vand.u32 4294901760, %v7102_v3  ;;  %17606 = vmatpush3.msra.mxu0 %v7023_v14  ;;  %17607 = vmatprep.mubr.msk.f32.mxu0 %vm18978_vm1, %v18977_v60 }
 0x621   :  { %17610 = vmatprep.subr.mxu0 %v18977_v60  ;;  %v6568_v58 = vsel %vm1038_vm2, %v4752_v37, 0 }
 0x622   :  { %v6636_v8 = vand.u32 4294901760, %v6568_v58 }
 0x623   :  { %17608 = vmatmul.mubr.f32.vlgmr.msra.gmra.mrb[16].mxu0 %v7092_v20 }
 0x624   :  { %17611 = vmatpush3.msra.mxu0 %v7103_v6  ;;  %17612 = vmatprep.mubr.msk.f32.mxu0 %vm18978_vm1, %v18977_v60  ;;  %v6637_v10 = vsub.f32 %v6568_v58, %v6636_v8 }
 0x625   :  { %17615 = vmatprep.subr.mxu0 %v18977_v60 }
 0x626   :  { %v6638_v48 = vand.u32 4294901760, %v6637_v10 }
 0x628   :  { %v6639_v28 = vsub.f32 %v6637_v10, %v6638_v48 }
 0x62a   :  { %v6640_v12 = vand.u32 4294901760, %v6639_v28 }
 0x62b   :  { %17613 = vmatmul.mubr.f32.vlgmr.msra.gmra.mrb[16].mxu0 %v19728_v55 }
 0x62c   :  { %17616 = vmatpush3.msra.mxu0 %v7100_v61  ;;  %17578 = vmatmul.mubr.f32.vlgmr.msra.gmra.mrb[16].mxu1 %v6640_v12 }
 0x62d   :  { %17581 = vmatpush3.msra.mxu1 %v6651_v15  ;;  %17617 = vmatprep.mubr.msk.f32.mxu0 %vm18978_vm1, %v18977_v60 }
 0x62e   :  { %17620 = vmatprep.subr.mxu0 %v18977_v60  ;;  %17582 = vmatprep.mubr.msk.f32.mxu1 %vm18978_vm1, %v18977_v60 }
 0x62f   :  { %17585 = vmatprep.subr.mxu1 %v18977_v60 }
 0x633   :  { %17618 = vmatmul.mubr.f32.vlgmr.msra.gmra.mrb[16].mxu0 %v7089_v56 }
 0x634   :  { %17621 = vmatpush3.msra.mxu0 %v7023_v14  ;;  %17583 = vmatmul.mubr.f32.vlgmr.msra.gmra.mrb[16].mxu1 %v6636_v8 }
 0x635   :  { %17586 = vmatpush3.msra.mxu1 %v6648_v54  ;;  %17622 = vmatprep.mubr.msk.f32.mxu0 %vm18978_vm1, %v18977_v60 }
 0x636   :  { %17625 = vmatprep.subr.mxu0 %v18977_v60  ;;  %17587 = vmatprep.mubr.msk.f32.mxu1 %vm18978_vm1, %v18977_v60 }
 0x637   :  { %17590 = vmatprep.subr.mxu1 %v18977_v60 }
 0x63b   :  { %17623 = vmatmul.mubr.f32.vlgmr.msra.gmra.mrb[16].mxu0 %v7090_v59 }
 0x63c   :  { %17626 = vmatpush3.msra.mxu0 %v7101_v62  ;;  %17588 = vmatmul.mubr.f32.vlgmr.msra.gmra.mrb[16].mxu1 %v6637_v10 }
 0x63d   :  { %17591 = vmatpush3.msra.mxu1 %v19696_v45  ;;  %17627 = vmatprep.mubr.msk.f32.mxu0 %vm18978_vm1, %v18977_v60 }
 0x63e   :  { %17630 = vmatprep.subr.mxu0 %v18977_v60  ;;  %17592 = vmatprep.mubr.msk.f32.mxu1 %vm18978_vm1, %v18977_v60 }
 0x63f   :  { %v4731_v18 = vpop.xlane.xlu0 %4730  ;;  %17595 = vmatprep.subr.mxu1 %v18977_v60 }
 0x640   :  { %18817 = vrcp.f32 %v4731_v18 }
 0x643   :  { %17628 = vmatmul.mubr.f32.vlgmr.msra.gmra.mrb[16].mxu0 %v19728_v55  ;;  %v7469_v27 = vpop.permute.xlu0 %7468 }
 0x644   :  { %17631 = vmatpush3.msra.mxu0 %v7023_v14  ;;  %17593 = vmatmul.mubr.f32.vlgmr.msra.gmra.mrb[16].mxu1 %v6638_v48  ;;  %v19782_v23 = vand.u32 4294901760, %v7469_v27 }
 0x645   :  { %17596 = vmatpush3.msra.mxu1 %v6649_v9  ;;  %17632 = vmatprep.mubr.msk.f32.mxu0 %vm18978_vm1, %v18977_v60 }
 0x646   :  { %17597 = vmatprep.mubr.msk.f32.mxu1 %vm18978_vm1, %v18977_v60  ;;  %17600 = vmatprep.subr.mxu1 %v18977_v60  ;;  %v19793_v41 = vsub.f32 %v7469_v27, %v19782_v23 }
 0x647   :  { %17665 = vmatprep.subr.mxu0 %v18977_v60  ;;  %v8375_v37 = vpop.permute.xlu0 %8374 }
 0x64a   :  { %v18818_v63 = vpop.eup %18817 }
 0x64b   :  { %v4755_v26 = vmul.f32 %v18818_v63, %v19614_v4  ;;  %17633 = vmatmul.mubr.f32.vlgmr.msra.gmra.mrb[16].mxu0 %v19728_v55 }
 0x64c   :  { %17598 = vmatmul.mubr.f32.vlgmr.msra.gmra.mrb[16].mxu1 %v6636_v8  ;;  %17667 = vmatprep.mubr.msk.f32.mxu0 %vm18978_vm1, %v18977_v60 }
 0x64d   :  { %17601 = vmatpush3.msra.mxu1 %v19696_v45  ;;  %17602 = vmatprep.mubr.msk.f32.mxu1 %vm18978_vm1, %v18977_v60  ;;  %v7924_v5 = vsel %vm1038_vm2, %v4755_v26, 0  ;;  %v7553_v45 = vand.u32 4294901760, %v19793_v41 }
 0x64e   :  { %17635 = vmatprep.subr.mxu1 %v18977_v60  ;;  %v19780_v1 = vand.u32 4294901760, %v7924_v5 }
 0x64f   :  { %v7554_v50 = vsub.f32 %v19793_v41, %v7553_v45 }
 0x650   :  { %v7993_v4 = vsub.f32 %v7924_v5, %v19780_v1 }
 0x651   :  { %v7555_v56 = vand.u32 4294901760, %v7554_v50 }
 0x652   :  { %v7994_v25 = vand.u32 4294901760, %v7993_v4 }
 0x654   :  { %17603 = vmatmul.mubr.f32.vlgmr.msra.gmra.mrb[16].mxu1 %v6636_v8  ;;  %v7995_v16 = vsub.f32 %v7993_v4, %v7994_v25  ;;  %v8378_v8 = vsel %vm1038_vm2, %v8375_v37, 0 }
 0x655   :  { %17636 = vmatpush3.msra.mxu1 %v19782_v23  ;;  %17637 = vmatprep.mubr.msk.f32.mxu1 %vm18978_vm1, %v18977_v60  ;;  %v19858_v11 = vand.u32 4294901760, %v8378_v8 }
 0x656   :  { %17640 = vmatprep.subr.mxu1 %v18977_v60  ;;  %v7996_v31 = vand.u32 4294901760, %v7995_v16 }
 0x657   :  { %v19868_v12 = vsub.f32 %v8378_v8, %v19858_v11 }
 0x659   :  { %v8459_v18 = vand.u32 4294901760, %v19868_v12 }
 0x65a   :  { %v4728_v7 = vpop.xlane.xlu1 %4727 }
 0x65b   :  { %18819 = vrcp.f32 %v4728_v7  ;;  %v8460_v26 = vsub.f32 %v19868_v12, %v8459_v18 }
 0x65e   :  { %v7921_v17 = vpop.permute.xlu1 %7920 }
 0x65f   :  { %v7927_v38 = vand.u32 4294901760, %v7921_v17 }
 0x661   :  { %v8004_v35 = vsub.f32 %v7921_v17, %v7927_v38  ;;  %17666 = vmatpush3.msra.mxu0 %v7927_v38 }
 0x662   :  { %17668 = vmatmul.mubr.f32.vlgmr.msra.gmra.mrb[18].mxu0 %v7996_v31  ;;  %17670 = vmatprep.subr.mxu0 %v18977_v60  ;;  %v8373_v46 = vpop.permute.xlu1 %8372 }
 0x663   :  { %v8005_v36 = vand.u32 4294901760, %v8004_v35  ;;  %17672 = vmatprep.mubr.msk.f32.mxu0 %vm18978_vm1, %v18977_v60  ;;  %v8376_v58 = vsel %vm1038_vm2, %v8373_v46, 0 }
 0x664   :  { %v19853_v10 = vand.u32 4294901760, %v8376_v58 }
 0x665   :  { %v18820_v39 = vpop.eup %18819  ;;  %v8006_v40 = vsub.f32 %v8004_v35, %v8005_v36 }
 0x666   :  { %v4754_v21 = vmul.f32 %v18820_v39, %v19642_v19  ;;  %v8827_v55 = vpop.permute.xlu1 %8826  ;;  %v19865_v28 = vsub.f32 %v8376_v58, %v19853_v10 }
 0x667   :  { %v8007_v42 = vand.u32 4294901760, %v8006_v40  ;;  %v8830_v14 = vsel %vm1038_vm2, %v8827_v55, 0 }
 0x668   :  { %v7472_v43 = vsel %vm1038_vm2, %v4754_v21, 0  ;;  %v19818_v61 = vand.u32 4294901760, %v8830_v14  ;;  %v8448_v15 = vand.u32 4294901760, %v19865_v28 }
 0x669   :  { %17671 = vmatpush3.msra.mxu0 %v8007_v42  ;;  %v19797_v44 = vand.u32 4294901760, %v7472_v43 }
 0x66a   :  { %17673 = vmatmul.mubr.f32.vlgmr.msra.gmra.mrb[18].mxu0 %v19780_v1  ;;  %17675 = vmatprep.subr.mxu0 %v18977_v60  ;;  %v8829_v57 = vpop.permute.xlu1 %8828  ;;  %v19830_v0 = vsub.f32 %v8830_v14, %v19818_v61  ;;  %v8449_v63 = vsub.f32 %v19865_v28, %v8448_v15 }
 0x66b   :  { %17676 = vmatpush3.msra.mxu0 %v8004_v35  ;;  %17677 = vmatprep.mubr.msk.f32.mxu0 %vm18978_vm1, %v18977_v60  ;;  %v7541_v47 = vsub.f32 %v7472_v43, %v19797_v44  ;;  %v8832_v59 = vsel %vm1038_vm2, %v8829_v57, 0 }
 0x66c   :  { %17680 = vmatprep.subr.mxu0 %v18977_v60  ;;  %v19823_v62 = vand.u32 4294901760, %v8832_v59  ;;  %v8902_v3 = vand.u32 4294901760, %v19830_v0 }
 0x66d   :  { %v7542_v19 = vand.u32 4294901760, %v7541_v47 }
 0x66e   :  { %v19833_v2 = vsub.f32 %v8832_v59, %v19823_v62  ;;  %v8903_v6 = vsub.f32 %v19830_v0, %v8902_v3 }
 0x66f   :  { %v19807_v51 = vpop.f32.mrb[12].mxu1  ;;  %v7543_v52 = vsub.f32 %v7541_v47, %v7542_v19 }
 0x670   :  { %v17484_v49 = vpop.f32.mrb[13].mxu1  ;;  %v8913_v54 = vand.u32 4294901760, %v19833_v2  ;;  %v8904_v9 = vand.u32 4294901760, %v8903_v6 }
 0x671   :  { %v7544_v53 = vand.u32 4294901760, %v7543_v52 }
 0x672   :  { %17678 = vmatmul.mubr.f32.vlgmr.msra.gmra.mrb[18].mxu0 %v7993_v4  ;;  %v8914_v20 = vsub.f32 %v19833_v2, %v8913_v54  ;;  %v8461_v4 = vand.u32 4294901760, %v8460_v26 }
 0x673   :  { %17681 = vmatpush3.msra.mxu0 %v7927_v38  ;;  %17638 = vmatmul.mubr.f32.vlgmr.msra.gmra.mrb[18].mxu1 %v7544_v53 }
 0x674   :  { %17641 = vmatpush3.msra.mxu1 %v7555_v56  ;;  %17682 = vmatprep.mubr.msk.f32.mxu0 %vm18978_vm1, %v18977_v60  ;;  %v8915_v48 = vand.u32 4294901760, %v8914_v20 }
 0x675   :  { %17685 = vmatprep.subr.mxu0 %v18977_v60  ;;  %17642 = vmatprep.mubr.msk.f32.mxu1 %vm18978_vm1, %v18977_v60 }
 0x676   :  { %17645 = vmatprep.subr.mxu1 %v18977_v60 }
 0x67a   :  { %17683 = vmatmul.mubr.f32.vlgmr.msra.gmra.mrb[18].mxu0 %v7994_v25 }
 0x67b   :  { %17686 = vmatpush3.msra.mxu0 %v8005_v36  ;;  %17643 = vmatmul.mubr.f32.vlgmr.msra.gmra.mrb[18].mxu1 %v19797_v44  ;;  %v9281_v36 = vpop.permute.xlu0 %9280 }
 0x67c   :  { %17646 = vmatpush3.msra.mxu1 %v19793_v41  ;;  %17687 = vmatprep.mubr.msk.f32.mxu0 %vm18978_vm1, %v18977_v60  ;;  %v9284_v43 = vsel %vm1038_vm2, %v9281_v36, 0 }
 0x67d   :  { %17690 = vmatprep.subr.mxu0 %v18977_v60  ;;  %17647 = vmatprep.mubr.msk.f32.mxu1 %vm18978_vm1, %v18977_v60  ;;  %v19939_v46 = vand.u32 4294901760, %v9284_v43 }
 0x67e   :  { %17650 = vmatprep.subr.mxu1 %v18977_v60 }
 0x67f   :  { %v9283_v41 = vpop.permute.xlu0 %9282  ;;  %v19951_v50 = vsub.f32 %v9284_v43, %v19939_v46 }
 0x681   :  { %v9356_v49 = vand.u32 4294901760, %v19951_v50 }
 0x682   :  { %17688 = vmatmul.mubr.f32.vlgmr.msra.gmra.mrb[18].mxu0 %v19780_v1 }
 0x683   :  { %17691 = vmatpush3.msra.mxu0 %v7927_v38  ;;  %17648 = vmatmul.mubr.f32.vlgmr.msra.gmra.mrb[18].mxu1 %v7541_v47  ;;  %v9357_v53 = vsub.f32 %v19951_v50, %v9356_v49  ;;  %v10189_v58 = vpop.permute.xlu0 %10188 }
 0x684   :  { %17651 = vmatpush3.msra.mxu1 %v19782_v23  ;;  %17692 = vmatprep.mubr.msk.f32.mxu0 %vm18978_vm1, %v18977_v60 }
 0x685   :  { %17725 = vmatprep.subr.mxu0 %v18977_v60  ;;  %17652 = vmatprep.mubr.msk.f32.mxu1 %vm18978_vm1, %v18977_v60  ;;  %v9358_v59 = vand.u32 4294901760, %v9357_v53 }
 0x686   :  { %17655 = vmatprep.subr.mxu1 %v18977_v60 }
 0x68a   :  { %17693 = vmatmul.mubr.f32.vlgmr.msra.gmra.mrb[18].mxu0 %v19780_v1  ;;  %v8450_v1 = vand.u32 4294901760, %v8449_v63 }
 0x68b   :  { %17726 = vmatpush3.xpose.msra.mxu0 %v19823_v62  ;;  %17653 = vmatmul.mubr.f32.vlgmr.msra.gmra.mrb[18].mxu1 %v7542_v19 }
 0x68c   :  { %17656 = vmatpush3.msra.mxu1 %v7553_v45  ;;  %17727 = vmatprep.mubr.msk.f32.mxu0 %vm18978_vm1, %v18977_v60 }
 0x68d   :  { %17730 = vmatprep.subr.mxu0 %v18977_v60  ;;  %17657 = vmatprep.mubr.msk.f32.mxu1 %vm18978_vm1, %v18977_v60 }
 0x68e   :  { %17728 = vmatmul.mubr.f32.vlgmr.msra.gmra.mrb[20].mxu0 %v8904_v9  ;;  %17660 = vmatprep.subr.mxu1 %v18977_v60 }
 0x68f   :  { %17731 = vmatpush3.xpose.msra.mxu0 %v8915_v48  ;;  %17732 = vmatprep.mubr.msk.f32.mxu0 %vm18978_vm1, %v18977_v60 }
 0x690   :  { %17735 = vmatprep.subr.mxu0 %v18977_v60 }
 0x693   :  { %17658 = vmatmul.mubr.f32.vlgmr.msra.gmra.mrb[18].mxu1 %v19797_v44 }
 0x694   :  { %17661 = vmatpush3.msra.mxu1 %v19782_v23  ;;  %17662 = vmatprep.mubr.msk.f32.mxu1 %vm18978_vm1, %v18977_v60  ;;  %v9735_v23 = vpop.permute.xlu1 %9734 }
 0x695   :  { %17695 = vmatprep.subr.mxu1 %v18977_v60  ;;  %v9738_v7 = vsel %vm1038_vm2, %v9735_v23, 0 }
 0x696   :  { %17733 = vmatmul.mubr.f32.vlgmr.msra.gmra.mrb[20].mxu0 %v19818_v61  ;;  %v19902_v17 = vand.u32 4294901760, %v9738_v7 }
 0x697   :  { %17736 = vmatpush3.xpose.msra.mxu0 %v19833_v2  ;;  %17737 = vmatprep.mubr.msk.f32.mxu0 %vm18978_vm1, %v18977_v60 }
 0x698   :  { %17740 = vmatprep.subr.mxu0 %v18977_v60  ;;  %v9737_v25 = vpop.permute.xlu1 %9736  ;;  %v19914_v31 = vsub.f32 %v9738_v7, %v19902_v17 }
 0x699   :  { %v9740_v16 = vsel %vm1038_vm2, %v9737_v25, 0 }
 0x69a   :  { %v19884_v5 = vpop.f32.mrb[12].mxu0  ;;  %v19907_v38 = vand.u32 4294901760, %v9740_v16  ;;  %v9810_v39 = vand.u32 4294901760, %v19914_v31 }
 0x69b   :  { %17663 = vmatmul.mubr.f32.vlgmr.msra.gmra.mrb[18].mxu1 %v19797_v44  ;;  %v17514_v27 = vpop.f32.mrb[13].mxu0  ;;  %v9286_v44 = vsel %vm1038_vm2, %v9283_v41, 0 }
 0x69c   :  { %17696 = vmatpush3.xpose.msra.mxu1 %v19858_v11  ;;  %17697 = vmatprep.mubr.msk.f32.mxu1 %vm18978_vm1, %v18977_v60  ;;  %v19917_v35 = vsub.f32 %v9740_v16, %v19907_v38  ;;  %v9811_v21 = vsub.f32 %v19914_v31, %v9810_v39  ;;  %v19944_v19 = vand.u32 4294901760, %v9286_v44 }
 0x69d   :  { %17700 = vmatprep.subr.mxu1 %v18977_v60 }
 0x69e   :  { %17738 = vmatmul.mubr.f32.vlgmr.msra.gmra.mrb[20].mxu0 %v19830_v0  ;;  %v9821_v40 = vand.u32 4294901760, %v19917_v35  ;;  %v9812_v45 = vand.u32 4294901760, %v9811_v21  ;;  %v19954_v52 = vsub.f32 %v9286_v44, %v19944_v19 }
 0x69f   :  { %17741 = vmatpush3.xpose.msra.mxu0 %v19823_v62  ;;  %17698 = vmatmul.mubr.f32.vlgmr.msra.gmra.mrb[20].mxu1 %v8450_v1 }
 0x6a0   :  { %17701 = vmatpush3.xpose.msra.mxu1 %v8461_v4  ;;  %17742 = vmatprep.mubr.msk.f32.mxu0 %vm18978_vm1, %v18977_v60  ;;  %v9822_v42 = vsub.f32 %v19917_v35, %v9821_v40  ;;  %v9367_v55 = vand.u32 4294901760, %v19954_v52 }
 0x6a1   :  { %17745 = vmatprep.subr.mxu0 %v18977_v60  ;;  %17702 = vmatprep.mubr.msk.f32.mxu1 %vm18978_vm1, %v18977_v60 }
 0x6a2   :  { %17705 = vmatprep.subr.mxu1 %v18977_v60  ;;  %v9823_v47 = vand.u32 4294901760, %v9822_v42  ;;  %v9368_v56 = vsub.f32 %v19954_v52, %v9367_v55 }
 0x6a6   :  { %17743 = vmatmul.mubr.f32.vlgmr.msra.gmra.mrb[20].mxu0 %v8902_v3 }
 0x6a7   :  { %17746 = vmatpush3.xpose.msra.mxu0 %v8913_v54  ;;  %17703 = vmatmul.mubr.f32.vlgmr.msra.gmra.mrb[20].mxu1 %v19853_v10 }
 0x6a8   :  { %17706 = vmatpush3.xpose.msra.mxu1 %v19868_v12  ;;  %17747 = vmatprep.mubr.msk.f32.mxu0 %vm18978_vm1, %v18977_v60 }
 0x6a9   :  { %17750 = vmatprep.subr.mxu0 %v18977_v60  ;;  %17707 = vmatprep.mubr.msk.f32.mxu1 %vm18978_vm1, %v18977_v60 }
 0x6aa   :  { %17710 = vmatprep.subr.mxu1 %v18977_v60 }
 0x6ae   :  { %17748 = vmatmul.mubr.f32.vlgmr.msra.gmra.mrb[20].mxu0 %v19818_v61 }
 0x6af   :  { %17751 = vmatpush3.xpose.msra.mxu0 %v19823_v62  ;;  %17708 = vmatmul.mubr.f32.vlgmr.msra.gmra.mrb[20].mxu1 %v19865_v28  ;;  %v9369_v62 = vand.u32 4294901760, %v9368_v56  ;;  %v10192_v28 = vsel %vm1038_vm2, %v10189_v58, 0 }
 0x6b0   :  { %17711 = vmatpush3.xpose.msra.mxu1 %v19858_v11  ;;  %17752 = vmatprep.mubr.msk.f32.mxu0 %vm18978_vm1, %v18977_v60 }
 0x6b1   :  { %17785 = vmatprep.subr.mxu0 %v18977_v60  ;;  %17712 = vmatprep.mubr.msk.f32.mxu1 %vm18978_vm1, %v18977_v60 }
 0x6b2   :  { %17715 = vmatprep.subr.mxu1 %v18977_v60 }
 0x6b6   :  { %17753 = vmatmul.mubr.f32.vlgmr.msra.gmra.mrb[20].mxu0 %v19818_v61  ;;  %v10643_v61 = vpop.permute.xlu1 %10642 }
 0x6b7   :  { %17786 = vmatpush3.xpose.msra.mxu0 %v19907_v38  ;;  %17713 = vmatmul.mubr.f32.vlgmr.msra.gmra.mrb[20].mxu1 %v8448_v15  ;;  %v10646_v2 = vsel %vm1038_vm2, %v10643_v61, 0 }
 0x6b8   :  { %17716 = vmatpush3.xpose.msra.mxu1 %v8459_v18  ;;  %17787 = vmatprep.mubr.msk.f32.mxu0 %vm18978_vm1, %v18977_v60  ;;  %v19988_v54 = vand.u32 4294901760, %v10646_v2  ;;  %v20025_v18 = vand.u32 4294901760, %v10192_v28 }
 0x6b9   :  { %17790 = vmatprep.subr.mxu0 %v18977_v60  ;;  %17717 = vmatprep.mubr.msk.f32.mxu1 %vm18978_vm1, %v18977_v60 }
 0x6ba   :  { %17788 = vmatmul.mubr.f32.vlgmr.msra.gmra.mrb[22].mxu0 %v9812_v45  ;;  %17720 = vmatprep.subr.mxu1 %v18977_v60  ;;  %v10645_v0 = vpop.permute.xlu1 %10644  ;;  %v20000_v6 = vsub.f32 %v10646_v2, %v19988_v54  ;;  %v20037_v27 = vsub.f32 %v10192_v28, %v20025_v18 }
 0x6bb   :  { %17791 = vmatpush3.xpose.msra.mxu0 %v9823_v47  ;;  %17792 = vmatprep.mubr.msk.f32.mxu0 %vm18978_vm1, %v18977_v60  ;;  %v10648_v3 = vsel %vm1038_vm2, %v10645_v0, 0 }
 0x6bc   :  { %17795 = vmatprep.subr.mxu0 %v18977_v60  ;;  %v19993_v37 = vand.u32 4294901760, %v10648_v3  ;;  %v10718_v8 = vand.u32 4294901760, %v20000_v6  ;;  %v10264_v23 = vand.u32 4294901760, %v20037_v27 }
 0x6be   :  { %v20003_v20 = vsub.f32 %v10648_v3, %v19993_v37  ;;  %v10719_v48 = vsub.f32 %v20000_v6, %v10718_v8  ;;  %v10265_v25 = vsub.f32 %v20037_v27, %v10264_v23 }
 0x6bf   :  { %17718 = vmatmul.mubr.f32.vlgmr.msra.gmra.mrb[20].mxu1 %v19853_v10 }
 0x6c0   :  { %17721 = vmatpush3.xpose.msra.mxu1 %v19858_v11  ;;  %17722 = vmatprep.mubr.msk.f32.mxu1 %vm18978_vm1, %v18977_v60  ;;  %v10729_v9 = vand.u32 4294901760, %v20003_v20  ;;  %v10720_v15 = vand.u32 4294901760, %v10719_v48 }
 0x6c1   :  { %17755 = vmatprep.subr.mxu1 %v18977_v60 }
 0x6c2   :  { %17793 = vmatmul.mubr.f32.vlgmr.msra.gmra.mrb[22].mxu0 %v19902_v17  ;;  %v10730_v11 = vsub.f32 %v20003_v20, %v10729_v9 }
 0x6c3   :  { %17796 = vmatpush3.xpose.msra.mxu0 %v19917_v35  ;;  %17797 = vmatprep.mubr.msk.f32.mxu0 %vm18978_vm1, %v18977_v60 }
 0x6c4   :  { %17800 = vmatprep.subr.mxu0 %v18977_v60  ;;  %v10731_v63 = vand.u32 4294901760, %v10730_v11 }
 0x6c6   :  { %v19970_v57 = vpop.f32.mrb[14].mxu1 }
 0x6c7   :  { %17723 = vmatmul.mubr.f32.vlgmr.msra.gmra.mrb[20].mxu1 %v19853_v10  ;;  %v17544_v14 = vpop.f32.mrb[15].mxu1  ;;  %v10191_v10 = vpop.permute.xlu0 %10190 }
 0x6c8   :  { %17756 = vmatpush3.xpose.msra.mxu1 %v19944_v19  ;;  %17757 = vmatprep.mubr.msk.f32.mxu1 %vm18978_vm1, %v18977_v60  ;;  %v10194_v12 = vsel %vm1038_vm2, %v10191_v10, 0 }
 0x6c9   :  { %17760 = vmatprep.subr.mxu1 %v18977_v60  ;;  %v20030_v26 = vand.u32 4294901760, %v10194_v12 }
 0x6ca   :  { %17798 = vmatmul.mubr.f32.vlgmr.msra.gmra.mrb[22].mxu0 %v19914_v31  ;;  %v11551_v31 = vpop.permute.xlu1 %11550 }
 0x6cb   :  { %17801 = vmatpush3.xpose.msra.mxu0 %v19907_v38  ;;  %17758 = vmatmul.mubr.f32.vlgmr.msra.gmra.mrb[22].mxu1 %v9358_v59  ;;  %v20040_v1 = vsub.f32 %v10194_v12, %v20030_v26  ;;  %v11097_v44 = vpop.permute.xlu0 %11096 }
 0x6cc   :  { %17761 = vmatpush3.xpose.msra.mxu1 %v9369_v62  ;;  %17802 = vmatprep.mubr.msk.f32.mxu0 %vm18978_vm1, %v18977_v60 }
 0x6cd   :  { %17805 = vmatprep.subr.mxu0 %v18977_v60  ;;  %17762 = vmatprep.mubr.msk.f32.mxu1 %vm18978_vm1, %v18977_v60  ;;  %v10275_v4 = vand.u32 4294901760, %v20040_v1 }
 0x6ce   :  { %17765 = vmatprep.subr.mxu1 %v18977_v60  ;;  %v11553_v36 = vpop.permute.xlu1 %11552 }
 0x6cf   :  { %v10276_v7 = vsub.f32 %v20040_v1, %v10275_v4  ;;  %v11099_v47 = vpop.permute.xlu0 %11098 }
 0x6d1   :  { %v10277_v35 = vand.u32 4294901760, %v10276_v7 }
 0x6d2   :  { %17803 = vmatmul.mubr.f32.vlgmr.msra.gmra.mrb[22].mxu0 %v9810_v39  ;;  %v11554_v39 = vsel %vm1038_vm2, %v11551_v31, 0 }
 0x6d3   :  { %17806 = vmatpush3.xpose.msra.mxu0 %v9821_v40  ;;  %17763 = vmatmul.mubr.f32.vlgmr.msra.gmra.mrb[22].mxu1 %v19939_v46  ;;  %v11556_v40 = vsel %vm1038_vm2, %v11553_v36, 0  ;;  %v20074_v41 = vand.u32 4294901760, %v11554_v39 }
 0x6d4   :  { %17766 = vmatpush3.xpose.msra.mxu1 %v19954_v52  ;;  %17807 = vmatprep.mubr.msk.f32.mxu0 %vm18978_vm1, %v18977_v60  ;;  %v20079_v21 = vand.u32 4294901760, %v11556_v40  ;;  %v11100_v52 = vsel %vm1038_vm2, %v11097_v44, 0 }
 0x6d5   :  { %17810 = vmatprep.subr.mxu0 %v18977_v60  ;;  %17767 = vmatprep.mubr.msk.f32.mxu1 %vm18978_vm1, %v18977_v60  ;;  %v20086_v42 = vsub.f32 %v11554_v39, %v20074_v41  ;;  %v20111_v53 = vand.u32 4294901760, %v11100_v52 }
 0x6d6   :  { %17770 = vmatprep.subr.mxu1 %v18977_v60  ;;  %v20089_v43 = vsub.f32 %v11556_v40, %v20079_v21 }
 0x6d7   :  { %v11626_v45 = vand.u32 4294901760, %v20086_v42  ;;  %v11171_v59 = vsub.f32 %v11100_v52, %v20111_v53 }
 0x6d9   :  { %v11172_v62 = vand.u32 4294901760, %v11171_v59 }
 0x6da   :  { %17808 = vmatmul.mubr.f32.vlgmr.msra.gmra.mrb[22].mxu0 %v19902_v17 }
 0x6db   :  { %17811 = vmatpush3.xpose.msra.mxu0 %v19907_v38  ;;  %17768 = vmatmul.mubr.f32.vlgmr.msra.gmra.mrb[22].mxu1 %v19951_v50  ;;  %v10266_v38 = vand.u32 4294901760, %v10265_v25  ;;  %v11173_v2 = vsub.f32 %v11171_v59, %v11172_v62 }
 0x6dc   :  { %17771 = vmatpush3.xpose.msra.mxu1 %v19944_v19  ;;  %17812 = vmatprep.mubr.msk.f32.mxu0 %vm18978_vm1, %v18977_v60 }
 0x6dd   :  { %17845 = vmatprep.subr.mxu0 %v18977_v60  ;;  %17772 = vmatprep.mubr.msk.f32.mxu1 %vm18978_vm1, %v18977_v60 }
 0x6de   :  { %17775 = vmatprep.subr.mxu1 %v18977_v60 }
 0x6e2   :  { %17813 = vmatmul.mubr.f32.vlgmr.msra.gmra.mrb[22].mxu0 %v19902_v17 }
 0x6e3   :  { %17846 = vmatpush3.xpose.msra.mxu0 %v19993_v37  ;;  %17773 = vmatmul.mubr.f32.vlgmr.msra.gmra.mrb[22].mxu1 %v9356_v49  ;;  %v11102_v49 = vsel %vm1038_vm2, %v11099_v47, 0 }
 0x6e4   :  { %17776 = vmatpush3.xpose.msra.mxu1 %v9367_v55  ;;  %17847 = vmatprep.mubr.msk.f32.mxu0 %vm18978_vm1, %v18977_v60  ;;  %v11105_v14 = vand.u32 4294901760, %v11102_v49 }
 0x6e5   :  { %17850 = vmatprep.subr.mxu0 %v18977_v60  ;;  %17777 = vmatprep.mubr.msk.f32.mxu1 %vm18978_vm1, %v18977_v60 }
 0x6e6   :  { %17848 = vmatmul.mubr.f32.vlgmr.msra.gmra.mrb[24].mxu0 %v10720_v15  ;;  %17780 = vmatprep.subr.mxu1 %v18977_v60  ;;  %v11182_v61 = vsub.f32 %v11102_v49, %v11105_v14 }
 0x6e7   :  { %17851 = vmatpush3.xpose.msra.mxu0 %v10731_v63  ;;  %17852 = vmatprep.mubr.msk.f32.mxu0 %vm18978_vm1, %v18977_v60 }
 0x6e8   :  { %17855 = vmatprep.subr.mxu0 %v18977_v60  ;;  %v11183_v0 = vand.u32 4294901760, %v11182_v61 }
 0x6ea   :  { %v11184_v3 = vsub.f32 %v11182_v61, %v11183_v0 }
 0x6eb   :  { %17778 = vmatmul.mubr.f32.vlgmr.msra.gmra.mrb[22].mxu1 %v19939_v46 }
 0x6ec   :  { %17781 = vmatpush3.xpose.msra.mxu1 %v19944_v19  ;;  %17782 = vmatprep.mubr.msk.f32.mxu1 %vm18978_vm1, %v18977_v60  ;;  %v11627_v19 = vsub.f32 %v20086_v42, %v11626_v45 }
 0x6ed   :  { %17815 = vmatprep.subr.mxu1 %v18977_v60 }
 0x6ee   :  { %17853 = vmatmul.mubr.f32.vlgmr.msra.gmra.mrb[24].mxu0 %v19988_v54  ;;  %v11628_v55 = vand.u32 4294901760, %v11627_v19 }
 0x6ef   :  { %17856 = vmatpush3.xpose.msra.mxu0 %v20003_v20  ;;  %17857 = vmatprep.mubr.msk.f32.mxu0 %vm18978_vm1, %v18977_v60  ;;  %v11185_v20 = vand.u32 4294901760, %v11184_v3 }
 0x6f0   :  { %17860 = vmatprep.subr.mxu0 %v18977_v60 }
 0x6f2   :  { %v20056_v16 = vpop.f32.mrb[14].mxu0 }
 0x6f3   :  { %17783 = vmatmul.mubr.f32.vlgmr.msra.gmra.mrb[22].mxu1 %v19939_v46  ;;  %v17574_v17 = vpop.f32.mrb[15].mxu0  ;;  %v11637_v46 = vand.u32 4294901760, %v20089_v43 }
 0x6f4   :  { %17816 = vmatpush3.xpose.msra.mxu1 %v20030_v26  ;;  %17817 = vmatprep.mubr.msk.f32.mxu1 %vm18978_vm1, %v18977_v60 }
 0x6f5   :  { %17820 = vmatprep.subr.mxu1 %v18977_v60  ;;  %v11638_v50 = vsub.f32 %v20089_v43, %v11637_v46 }
 0x6f6   :  { %17858 = vmatmul.mubr.f32.vlgmr.msra.gmra.mrb[24].mxu0 %v20000_v6  ;;  %v11174_v6 = vand.u32 4294901760, %v11173_v2 }
 0x6f7   :  { %17861 = vmatpush3.xpose.msra.mxu0 %v19993_v37  ;;  %17818 = vmatmul.mubr.f32.vlgmr.msra.gmra.mrb[24].mxu1 %v10266_v38  ;;  %v11639_v56 = vand.u32 4294901760, %v11638_v50 }
 0x6f8   :  { %17821 = vmatpush3.xpose.msra.mxu1 %v10277_v35  ;;  %17862 = vmatprep.mubr.msk.f32.mxu0 %vm18978_vm1, %v18977_v60 }
 0x6f9   :  { %17865 = vmatprep.subr.mxu0 %v18977_v60  ;;  %17822 = vmatprep.mubr.msk.f32.mxu1 %vm18978_vm1, %v18977_v60 }
 0x6fa   :  { %17825 = vmatprep.subr.mxu1 %v18977_v60 }
 0x6fe   :  { %17863 = vmatmul.mubr.f32.vlgmr.msra.gmra.mrb[24].mxu0 %v10718_v8 }
 0x6ff   :  { %17866 = vmatpush3.xpose.msra.mxu0 %v10729_v9  ;;  %17823 = vmatmul.mubr.f32.vlgmr.msra.gmra.mrb[24].mxu1 %v20025_v18 }
 0x700   :  { %17826 = vmatpush3.xpose.msra.mxu1 %v20040_v1  ;;  %17867 = vmatprep.mubr.msk.f32.mxu0 %vm18978_vm1, %v18977_v60 }
 0x701   :  { %17870 = vmatprep.subr.mxu0 %v18977_v60  ;;  %17827 = vmatprep.mubr.msk.f32.mxu1 %vm18978_vm1, %v18977_v60 }
 0x702   :  { %17830 = vmatprep.subr.mxu1 %v18977_v60 }
 0x706   :  { %17868 = vmatmul.mubr.f32.vlgmr.msra.gmra.mrb[24].mxu0 %v19988_v54 }
 0x707   :  { %17871 = vmatpush3.xpose.msra.mxu0 %v19993_v37  ;;  %17828 = vmatmul.mubr.f32.vlgmr.msra.gmra.mrb[24].mxu1 %v20037_v27 }
 0x708   :  { %17831 = vmatpush3.xpose.msra.mxu1 %v20030_v26  ;;  %17872 = vmatprep.mubr.msk.f32.mxu0 %vm18978_vm1, %v18977_v60 }
 0x709   :  { %17905 = vmatprep.subr.mxu0 %v18977_v60  ;;  %17832 = vmatprep.mubr.msk.f32.mxu1 %vm18978_vm1, %v18977_v60 }
 0x70a   :  { %17835 = vmatprep.subr.mxu1 %v18977_v60 }
 0x70e   :  { %17873 = vmatmul.mubr.f32.vlgmr.msra.gmra.mrb[24].mxu0 %v19988_v54 }
 0x70f   :  { %17906 = vmatpush3.xpose.msra.mxu0 %v20079_v21  ;;  %17833 = vmatmul.mubr.f32.vlgmr.msra.gmra.mrb[24].mxu1 %v10264_v23 }
 0x710   :  { %17836 = vmatpush3.xpose.msra.mxu1 %v10275_v4  ;;  %17907 = vmatprep.mubr.msk.f32.mxu0 %vm18978_vm1, %v18977_v60 }
 0x711   :  { %17910 = vmatprep.subr.mxu0 %v18977_v60  ;;  %17837 = vmatprep.mubr.msk.f32.mxu1 %vm18978_vm1, %v18977_v60 }
 0x712   :  { %17908 = vmatmul.mubr.f32.vlgmr.msra.gmra.mrb[26].mxu0 %v11628_v55  ;;  %17840 = vmatprep.subr.mxu1 %v18977_v60 }
 0x713   :  { %17911 = vmatpush3.xpose.msra.mxu0 %v11639_v56  ;;  %17912 = vmatprep.mubr.msk.f32.mxu0 %vm18978_vm1, %v18977_v60 }
 0x714   :  { %17915 = vmatprep.subr.mxu0 %v18977_v60 }
 0x717   :  { %17838 = vmatmul.mubr.f32.vlgmr.msra.gmra.mrb[24].mxu1 %v20025_v18 }
 0x718   :  { %17841 = vmatpush3.xpose.msra.mxu1 %v20030_v26  ;;  %17842 = vmatprep.mubr.msk.f32.mxu1 %vm18978_vm1, %v18977_v60 }
 0x719   :  { %17875 = vmatprep.subr.mxu1 %v18977_v60 }
 0x71a   :  { %17913 = vmatmul.mubr.f32.vlgmr.msra.gmra.mrb[26].mxu0 %v20074_v41 }
 0x71b   :  { %17916 = vmatpush3.xpose.msra.mxu0 %v20089_v43  ;;  %17917 = vmatprep.mubr.msk.f32.mxu0 %vm18978_vm1, %v18977_v60 }
 0x71c   :  { %17920 = vmatprep.subr.mxu0 %v18977_v60 }
 0x71e   :  { %v20131_v54 = vpop.f32.mrb[16].mxu0 }
 0x71f   :  { %17843 = vmatmul.mubr.f32.vlgmr.msra.gmra.mrb[24].mxu1 %v20025_v18  ;;  %v17634_v37 = vpop.f32.mrb[17].mxu0 }
 0x720   :  { %17876 = vmatpush3.xpose.msra.mxu1 %v11105_v14  ;;  %17877 = vmatprep.mubr.msk.f32.mxu1 %vm18978_vm1, %v18977_v60 }
 0x721   :  { %17880 = vmatprep.subr.mxu1 %v18977_v60 }
 0x722   :  { %17918 = vmatmul.mubr.f32.vlgmr.msra.gmra.mrb[26].mxu0 %v20086_v42 }
 0x723   :  { %17921 = vmatpush3.xpose.msra.mxu0 %v20079_v21  ;;  %17878 = vmatmul.mubr.f32.vlgmr.msra.gmra.mrb[26].mxu1 %v11174_v6 }
 0x724   :  { %17881 = vmatpush3.xpose.msra.mxu1 %v11185_v20  ;;  %17922 = vmatprep.mubr.msk.f32.mxu0 %vm18978_vm1, %v18977_v60 }
 0x725   :  { %17925 = vmatprep.subr.mxu0 %v18977_v60  ;;  %17882 = vmatprep.mubr.msk.f32.mxu1 %vm18978_vm1, %v18977_v60 }
 0x726   :  { %17885 = vmatprep.subr.mxu1 %v18977_v60 }
 0x727   :  { %v20145_v58 = vpop.f32.mrb[16].mxu1 }
 0x728   :  { %v17604_v8 = vpop.f32.mrb[17].mxu1 }
 0x72a   :  { %17923 = vmatmul.mubr.f32.vlgmr.msra.gmra.mrb[26].mxu0 %v11626_v45 }
 0x72b   :  { %17926 = vmatpush3.xpose.msra.mxu0 %v11637_v46  ;;  %17883 = vmatmul.mubr.f32.vlgmr.msra.gmra.mrb[26].mxu1 %v20111_v53 }
 0x72c   :  { %17886 = vmatpush3.xpose.msra.mxu1 %v11182_v61  ;;  %17927 = vmatprep.mubr.msk.f32.mxu0 %vm18978_vm1, %v18977_v60 }
 0x72d   :  { %17930 = vmatprep.subr.mxu0 %v18977_v60  ;;  %17887 = vmatprep.mubr.msk.f32.mxu1 %vm18978_vm1, %v18977_v60 }
 0x72e   :  { %17890 = vmatprep.subr.mxu1 %v18977_v60 }
 0x732   :  { %17928 = vmatmul.mubr.f32.vlgmr.msra.gmra.mrb[26].mxu0 %v20074_v41 }
 0x733   :  { %17931 = vmatpush3.xpose.msra.mxu0 %v20079_v21  ;;  %17888 = vmatmul.mubr.f32.vlgmr.msra.gmra.mrb[26].mxu1 %v11171_v59 }
 0x734   :  { %17891 = vmatpush3.xpose.msra.mxu1 %v11105_v14  ;;  %17932 = vmatprep.mubr.msk.f32.mxu0 %vm18978_vm1, %v18977_v60 }
 0x735   :  { %17892 = vmatprep.mubr.msk.f32.mxu1 %vm18978_vm1, %v18977_v60  ;;  %17895 = vmatprep.subr.mxu1 %v18977_v60 }
 0x736   :  { %17965 = vmatprep.subr.mxu0 %v18977_v60 }
 0x73a   :  { %17933 = vmatmul.mubr.f32.vlgmr.msra.gmra.mrb[26].mxu0 %v20074_v41 }
 0x73b   :  { %17893 = vmatmul.mubr.f32.vlgmr.msra.gmra.mrb[26].mxu1 %v11172_v62  ;;  %17967 = vmatprep.mubr.msk.f32.mxu0 %vm18978_vm1, %v18977_v60 }
 0x73c   :  { %17896 = vmatpush3.xpose.msra.mxu1 %v11183_v0  ;;  %17897 = vmatprep.mubr.msk.f32.mxu1 %vm18978_vm1, %v18977_v60 }
 0x73d   :  { %17900 = vmatprep.subr.mxu1 %v18977_v60 }
 0x743   :  { %17898 = vmatmul.mubr.f32.vlgmr.msra.gmra.mrb[26].mxu1 %v20111_v53 }
 0x744   :  { %17901 = vmatpush3.xpose.msra.mxu1 %v11105_v14  ;;  %17902 = vmatprep.mubr.msk.f32.mxu1 %vm18978_vm1, %v18977_v60 }
 0x745   :  { %17935 = vmatprep.subr.mxu1 %v18977_v60 }
 0x74b   :  { %17903 = vmatmul.mubr.f32.vlgmr.msra.gmra.mrb[26].mxu1 %v20111_v53 }
 0x74c   :  { %17937 = vmatprep.mubr.msk.f32.mxu1 %vm18978_vm1, %v18977_v60 }
 0x75d   :  { %v20175_v9 = vpop.f32.mrb[18].mxu0 }
 0x75e   :  { %v17694_v10 = vpop.f32.mrb[19].mxu0 }
 0x76e   :  { %v20177_v48 = vpop.f32.mrb[18].mxu1 }
 0x76f   :  { %v17664_v11 = vpop.f32.mrb[19].mxu1 }
 0x789   :  { %v9276_v28 = vpop.f32.mrb[20].mxu0 }
 0x78a   :  { %v17754_v12 = vpop.f32.mrb[21].mxu0  ;;  %v12007_v15 = vsel %vm1038_vm2, %v9276_v28, -inf }
 0x78b   :  { %12008 = vmax.xlane.f32.xlu1 %v12007_v15 }
 0x79a   :  { %v8822_v18 = vpop.f32.mrb[20].mxu1 }
 0x79b   :  { %v17724_v63 = vpop.f32.mrb[21].mxu1  ;;  %v12004_v26 = vsel %vm1038_vm2, %v8822_v18, -inf }
 0x79c   :  { %12005 = vmax.xlane.f32.xlu0 %v12004_v26 }
 0x7b5   :  { %v10184_v27 = vpop.f32.mrb[22].mxu0 }
 0x7b6   :  { %v17814_v1 = vpop.f32.mrb[23].mxu0  ;;  %v12013_v7 = vsel %vm1038_vm2, %v10184_v27, -inf }
 0x7c6   :  { %v9730_v23 = vpop.f32.mrb[22].mxu1 }
 0x7c7   :  { %v17784_v4 = vpop.f32.mrb[23].mxu1  ;;  %v12010_v25 = vsel %vm1038_vm2, %v9730_v23, -inf }
 0x7c8   :  { %12011 = vmax.xlane.f32.xlu0 %v12010_v25 }
 0x7cc   :  { %12014 = vmax.xlane.f32.xlu0 %v12013_v7 }
 0x7e1   :  { %v11092_v17 = vpop.f32.mrb[24].mxu0 }
 0x7e2   :  { %v17874_v38 = vpop.f32.mrb[25].mxu0  ;;  %v12019_v39 = vsel %vm1038_vm2, %v11092_v17, -inf }
 0x7f2   :  { %v10638_v31 = vpop.f32.mrb[24].mxu1 }
 0x7f3   :  { %v17844_v35 = vpop.f32.mrb[25].mxu1  ;;  %v12016_v36 = vsel %vm1038_vm2, %v10638_v31, -inf }
 0x7f4   :  { %12017 = vmax.xlane.f32.xlu0 %v12016_v36 }
 0x7f8   :  { %12020 = vmax.xlane.f32.xlu0 %v12019_v39 }
 0x80d   :  { %v20185_v40 = vpop.f32.mrb[26].mxu0 }
 0x80e   :  { %v17934_v41 = vpop.f32.mrb[27].mxu0  ;;  %12100 = vrot.lane.b32.xlu0 %v19290_v24, %s18983_s20  ;;  %v12025_v50 = vsel %vm1038_vm2, %v20185_v40, -inf }
 0x818   :  { %v12009_v43 = vpop.xlane.xlu1 %12008 }
 0x819   :  { %v12029_v44 = vsub.f32 %v9276_v28, %v12009_v43 }
 0x81b   :  { %v12038_v47 = vmul.f32 1.442695, %v12029_v44 }
 0x81e   :  { %v20189_v21 = vpop.f32.mrb[26].mxu1 }
 0x81f   :  { %v17904_v42 = vpop.f32.mrb[27].mxu1  ;;  %v12022_v3 = vsel %vm1038_vm2, %v20189_v21, -inf }
 0x829   :  { %v12006_v45 = vpop.xlane.xlu0 %12005 }
 0x82a   :  { %v12028_v46 = vsub.f32 %v8822_v18, %v12006_v45 }
 0x82c   :  { %v12036_v19 = vmul.f32 1.442695, %v12028_v46 }
 0x82d   :  { %12026 = vmax.xlane.f32.xlu0 %v12025_v50 }
 0x82e   :  { %18821 = vpow2.f32 %v12036_v19 }
 0x82f   :  { %18823 = vpow2.f32 %v12038_v47 }
 0x838   :  { %v18822_v52 = vpop.eup %18821 }
 0x839   :  { %v12052_v49 = vsel %vm1038_vm2, %v18822_v52, 0.0  ;;  %v20194_v55 = vpop.eup %18823 }
 0x83a   :  { %12053 = vadd.xlane.f32.xlu1 %v12052_v49  ;;  %v12055_v24 = vsel %vm1038_vm2, %v20194_v55, 0.0 }
 0x83e   :  { %12056 = vadd.xlane.f32.xlu1 %v12055_v24 }
 0x84f   :  { %12552 = vrot.lane.b32.xlu1 %v19288_v22, %s18983_s20 }
 0x855   :  { %v12012_v53 = vpop.xlane.xlu0 %12011 }
 0x856   :  { %v12030_v56 = vsub.f32 %v9730_v23, %v12012_v53 }
 0x858   :  { %v12040_v14 = vmul.f32 1.442695, %v12030_v56 }
 0x859   :  { %v12015_v59 = vpop.xlane.xlu0 %12014 }
 0x85a   :  { %18825 = vpow2.f32 %v12040_v14  ;;  %v12031_v61 = vsub.f32 %v10184_v27, %v12015_v59 }
 0x85c   :  { %v12042_v0 = vmul.f32 1.442695, %v12031_v61 }
 0x85e   :  { %18827 = vpow2.f32 %v12042_v0 }
 0x864   :  { %v20200_v62 = vpop.eup %18825 }
 0x865   :  { %v12058_v2 = vsel %vm1038_vm2, %v20200_v62, 0.0 }
 0x866   :  { %12059 = vadd.xlane.f32.xlu0 %v12058_v2 }
 0x868   :  { %v20206_v37 = vpop.eup %18827 }
 0x869   :  { %v12061_v22 = vsel %vm1038_vm2, %v20206_v37, 0.0 }
 0x873   :  { %12023 = vmax.xlane.f32.xlu1 %v12022_v3 }
 0x877   :  { %12062 = vadd.xlane.f32.xlu1 %v12061_v22 }
 0x87c   :  { %13004 = vrot.lane.b32.xlu0 %v19294_v13, %s18983_s20 }
 0x881   :  { %v12018_v6 = vpop.xlane.xlu0 %12017 }
 0x882   :  { %v12032_v12 = vsub.f32 %v10638_v31, %v12018_v6 }
 0x884   :  { %v12044_v18 = vmul.f32 1.442695, %v12032_v12 }
 0x885   :  { %v12021_v20 = vpop.xlane.xlu0 %12020 }
 0x886   :  { %v12033_v8 = vsub.f32 %v11092_v17, %v12021_v20 }
 0x888   :  { %13456 = vrot.lane.b32.xlu1 %v19297_v29, %s18983_s20  ;;  %v12046_v10 = vmul.f32 1.442695, %v12033_v8 }
 0x889   :  { %v12101_v11 = vpop.permute.xlu0 %12100 }
 0x88a   :  { %v20214_v28 = vand.u32 4294901760, %v12101_v11  ;;  %18829 = vpow2.f32 %v12046_v10 }
 0x88b   :  { %18831 = vpow2.f32 %v12044_v18 }
 0x88c   :  { %17936 = vmatpush3.msra.mxu1 %v20214_v28 }
 0x88d   :  { %17940 = vmatprep.subr.mxu1 %v18977_v60 }
 0x894   :  { %v20218_v15 = vpop.eup %18829 }
 0x895   :  { %v12067_v13 = vsel %vm1038_vm2, %v20218_v15, 0.0  ;;  %v20222_v63 = vpop.eup %18831 }
 0x896   :  { %v12064_v29 = vsel %vm1038_vm2, %v20222_v63, 0.0 }
 0x89b   :  { %12068 = vadd.xlane.f32.xlu0 %v12067_v13 }
 0x8ac   :  { %12065 = vadd.xlane.f32.xlu1 %v12064_v29 }
 0x8b1   :  { %13908 = vrot.lane.b32.xlu0 %v19299_v30, %s18983_s20 }
 0x8ba   :  { %v12027_v26 = vpop.xlane.xlu0 %12026 }
 0x8bb   :  { %v12035_v27 = vsub.f32 %v20185_v40, %v12027_v26 }
 0x8bd   :  { %14360 = vrot.lane.b32.xlu1 %v19303_v32, %s18983_s20  ;;  %v12050_v1 = vmul.f32 1.442695, %v12035_v27  ;;  %v12184_v32 = vsub.f32 %v12101_v11, %v20214_v28 }
 0x8bf   :  { %18833 = vpow2.f32 %v12050_v1  ;;  %v12185_v40 = vand.u32 4294901760, %v12184_v32 }
 0x8c1   :  { %v12186_v47 = vsub.f32 %v12184_v32, %v12185_v40 }
 0x8c3   :  { %v12187_v53 = vand.u32 4294901760, %v12186_v47 }
 0x8c7   :  { %v12054_v23 = vpop.xlane.xlu1 %12053 }
 0x8c8   :  { %18835 = vrcp.f32 %v12054_v23 }
 0x8c9   :  { %v20231_v25 = vpop.eup %18833 }
 0x8ca   :  { %v12073_v17 = vsel %vm1038_vm2, %v20231_v25, 0.0 }
 0x8cb   :  { %v12057_v4 = vpop.xlane.xlu1 %12056 }
 0x8cc   :  { %18837 = vrcp.f32 %v12057_v4 }
 0x8cf   :  { %v12553_v7 = vpop.permute.xlu1 %12552 }
 0x8d0   :  { %v20235_v38 = vand.u32 4294901760, %v12553_v7  ;;  %12074 = vadd.xlane.f32.xlu0 %v12073_v17 }
 0x8d2   :  { %v18836_v30 = vpop.eup %18835  ;;  %17966 = vmatpush3.msra.mxu0 %v20235_v38  ;;  %v12636_v42 = vsub.f32 %v12553_v7, %v20235_v38 }
 0x8d3   :  { %v12092_v31 = vmul.f32 %v18836_v30, %v18822_v52  ;;  %17970 = vmatprep.subr.mxu0 %v18977_v60 }
 0x8d4   :  { %v12637_v19 = vand.u32 4294901760, %v12636_v42 }
 0x8d5   :  { %v12104_v35 = vsel %vm1038_vm2, %v12092_v31, 0 }
 0x8d6   :  { %v18838_v36 = vpop.eup %18837  ;;  %v20241_v39 = vand.u32 4294901760, %v12104_v35  ;;  %v12638_v56 = vsub.f32 %v12636_v42, %v12637_v19 }
 0x8d7   :  { %v12093_v41 = vmul.f32 %v18838_v36, %v20194_v55 }
 0x8d8   :  { %v12173_v43 = vsub.f32 %v12104_v35, %v20241_v39  ;;  %v12639_v59 = vand.u32 4294901760, %v12638_v56 }
 0x8d9   :  { %v12556_v44 = vsel %vm1038_vm2, %v12093_v41, 0 }
 0x8da   :  { %v12174_v45 = vand.u32 4294901760, %v12173_v43  ;;  %v20247_v46 = vand.u32 4294901760, %v12556_v44 }
 0x8dc   :  { %v12175_v50 = vsub.f32 %v12173_v43, %v12174_v45  ;;  %v12625_v52 = vsub.f32 %v12556_v44, %v20247_v46 }
 0x8de   :  { %v12176_v49 = vand.u32 4294901760, %v12175_v50  ;;  %v12626_v24 = vand.u32 4294901760, %v12625_v52 }
 0x8e0   :  { %17938 = vmatmul.mubr.f32.vlgmr.msra.gmra.mrb[28].mxu1 %v12176_v49  ;;  %v12627_v55 = vsub.f32 %v12625_v52, %v12626_v24 }
 0x8e1   :  { %17941 = vmatpush3.msra.mxu1 %v12187_v53  ;;  %17942 = vmatprep.mubr.msk.f32.mxu1 %vm18978_vm1, %v18977_v60 }
 0x8e2   :  { %v12628_v14 = vand.u32 4294901760, %v12627_v55  ;;  %17945 = vmatprep.subr.mxu1 %v18977_v60 }
 0x8e4   :  { %17968 = vmatmul.mubr.f32.vlgmr.msra.gmra.mrb[28].mxu0 %v12628_v14 }
 0x8e5   :  { %17971 = vmatpush3.msra.mxu0 %v12639_v59  ;;  %17972 = vmatprep.mubr.msk.f32.mxu0 %vm18978_vm1, %v18977_v60 }
 0x8e6   :  { %14812 = vrot.lane.b32.xlu0 %v19305_v33, %s18983_s20  ;;  %17975 = vmatprep.subr.mxu0 %v18977_v60 }
 0x8e8   :  { %17943 = vmatmul.mubr.f32.vlgmr.msra.gmra.mrb[28].mxu1 %v20241_v39 }
 0x8e9   :  { %17946 = vmatpush3.msra.mxu1 %v12184_v32  ;;  %17947 = vmatprep.mubr.msk.f32.mxu1 %vm18978_vm1, %v18977_v60 }
 0x8ea   :  { %17950 = vmatprep.subr.mxu1 %v18977_v60 }
 0x8ec   :  { %17973 = vmatmul.mubr.f32.vlgmr.msra.gmra.mrb[28].mxu0 %v20247_v46 }
 0x8ed   :  { %17976 = vmatpush3.msra.mxu0 %v12636_v42  ;;  %17977 = vmatprep.mubr.msk.f32.mxu0 %vm18978_vm1, %v18977_v60 }
 0x8ee   :  { %17980 = vmatprep.subr.mxu0 %v18977_v60 }
 0x8f0   :  { %17948 = vmatmul.mubr.f32.vlgmr.msra.gmra.mrb[28].mxu1 %v12173_v43 }
 0x8f1   :  { %17951 = vmatpush3.msra.mxu1 %v20214_v28  ;;  %17952 = vmatprep.mubr.msk.f32.mxu1 %vm18978_vm1, %v18977_v60 }
 0x8f2   :  { %17955 = vmatprep.subr.mxu1 %v18977_v60 }
 0x8f3   :  { %v12060_v33 = vpop.xlane.xlu0 %12059 }
 0x8f4   :  { %18839 = vrcp.f32 %v12060_v33  ;;  %17978 = vmatmul.mubr.f32.vlgmr.msra.gmra.mrb[28].mxu0 %v12625_v52 }
 0x8f5   :  { %17981 = vmatpush3.msra.mxu0 %v20235_v38  ;;  %17982 = vmatprep.mubr.msk.f32.mxu0 %vm18978_vm1, %v18977_v60 }
 0x8f6   :  { %17985 = vmatprep.subr.mxu0 %v18977_v60 }
 0x8f7   :  { %v13005_v61 = vpop.permute.xlu0 %13004 }
 0x8f8   :  { %17953 = vmatmul.mubr.f32.vlgmr.msra.gmra.mrb[28].mxu1 %v12174_v45  ;;  %v20277_v0 = vand.u32 4294901760, %v13005_v61 }
 0x8f9   :  { %17956 = vmatpush3.msra.mxu1 %v12185_v40  ;;  %17957 = vmatprep.mubr.msk.f32.mxu1 %vm18978_vm1, %v18977_v60 }
 0x8fa   :  { %17960 = vmatprep.subr.mxu1 %v18977_v60  ;;  %v20284_v22 = vsub.f32 %v13005_v61, %v20277_v0 }
 0x8fc   :  { %17983 = vmatmul.mubr.f32.vlgmr.msra.gmra.mrb[28].mxu0 %v12626_v24 }
 0x8fd   :  { %17986 = vmatpush3.msra.mxu0 %v12637_v19  ;;  %17987 = vmatprep.mubr.msk.f32.mxu0 %vm18978_vm1, %v18977_v60 }
 0x8fe   :  { %v18840_v2 = vpop.eup %18839  ;;  %17990 = vmatprep.subr.mxu0 %v18977_v60 }
 0x8ff   :  { %v12094_v3 = vmul.f32 %v18840_v2, %v20200_v62  ;;  %v13089_v62 = vand.u32 4294901760, %v20284_v22 }
 0x900   :  { %17958 = vmatmul.mubr.f32.vlgmr.msra.gmra.mrb[28].mxu1 %v20241_v39  ;;  %v12024_v6 = vpop.xlane.xlu1 %12023 }
 0x901   :  { %17961 = vmatpush3.msra.mxu1 %v20214_v28  ;;  %v12034_v20 = vsub.f32 %v20189_v21, %v12024_v6  ;;  %17962 = vmatprep.mubr.msk.f32.mxu1 %vm18978_vm1, %v18977_v60  ;;  %v13008_v8 = vsel %vm1038_vm2, %v12094_v3, 0  ;;  %v13090_v28 = vsub.f32 %v20284_v22, %v13089_v62 }
 0x902   :  { %17995 = vmatprep.subr.mxu1 %v18977_v60  ;;  %v20293_v10 = vand.u32 4294901760, %v13008_v8 }
 0x903   :  { %v12048_v11 = vmul.f32 1.442695, %v12034_v20  ;;  %v13091_v1 = vand.u32 4294901760, %v13090_v28 }
 0x904   :  { %17988 = vmatmul.mubr.f32.vlgmr.msra.gmra.mrb[28].mxu0 %v20247_v46  ;;  %v12063_v12 = vpop.xlane.xlu1 %12062  ;;  %v13077_v18 = vsub.f32 %v13008_v8, %v20293_v10 }
 0x905   :  { %18841 = vpow2.f32 %v12048_v11  ;;  %17991 = vmatpush3.msra.mxu0 %v20235_v38  ;;  %17992 = vmatprep.mubr.msk.f32.mxu0 %vm18978_vm1, %v18977_v60 }
 0x906   :  { %18843 = vrcp.f32 %v12063_v12  ;;  %18025 = vmatprep.subr.mxu0 %v18977_v60  ;;  %v13078_v21 = vand.u32 4294901760, %v13077_v18 }
 0x908   :  { %17963 = vmatmul.mubr.f32.vlgmr.msra.gmra.mrb[28].mxu1 %v20241_v39  ;;  %v13457_v13 = vpop.permute.xlu1 %13456  ;;  %v13079_v29 = vsub.f32 %v13077_v18, %v13078_v21 }
 0x909   :  { %17996 = vmatpush3.msra.mxu1 %v20277_v0  ;;  %v20305_v26 = vand.u32 4294901760, %v13457_v13  ;;  %17997 = vmatprep.mubr.msk.f32.mxu1 %vm18978_vm1, %v18977_v60 }
 0x90a   :  { %18000 = vmatprep.subr.mxu1 %v18977_v60  ;;  %v13080_v27 = vand.u32 4294901760, %v13079_v29 }
 0x90b   :  { %v13540_v38 = vsub.f32 %v13457_v13, %v20305_v26 }
 0x90c   :  { %17993 = vmatmul.mubr.f32.vlgmr.msra.gmra.mrb[28].mxu0 %v20247_v46  ;;  %17998 = vmatmul.mubr.f32.vlgmr.msra.gmra.mrb[30].mxu1 %v13080_v27 }
 0x90d   :  { %18001 = vmatpush3.msra.mxu1 %v13091_v1  ;;  %18026 = vmatpush3.msra.mxu0 %v20305_v26  ;;  %v13541_v31 = vand.u32 4294901760, %v13540_v38 }
 0x90e   :  { %18002 = vmatprep.mubr.msk.f32.mxu1 %vm18978_vm1, %v18977_v60  ;;  %18005 = vmatprep.subr.mxu1 %v18977_v60 }
 0x90f   :  { %v20315_v23 = vpop.eup %18841  ;;  %18027 = vmatprep.mubr.msk.f32.mxu0 %vm18978_vm1, %v18977_v60  ;;  %18030 = vmatprep.subr.mxu0 %v18977_v60  ;;  %v13542_v36 = vsub.f32 %v13540_v38, %v13541_v31 }
 0x910   :  { %v18844_v4 = vpop.eup %18843  ;;  %v12070_v7 = vsel %vm1038_vm2, %v20315_v23, 0.0 }
 0x911   :  { %v12095_v17 = vmul.f32 %v18844_v4, %v20206_v37  ;;  %12071 = vadd.xlane.f32.xlu1 %v12070_v7  ;;  %v13543_v41 = vand.u32 4294901760, %v13542_v36 }
 0x913   :  { %v13460_v30 = vsel %vm1038_vm2, %v12095_v17, 0 }
 0x914   :  { %18003 = vmatmul.mubr.f32.vlgmr.msra.gmra.mrb[30].mxu1 %v20293_v10  ;;  %v20326_v32 = vand.u32 4294901760, %v13460_v30 }
 0x915   :  { %18006 = vmatpush3.msra.mxu1 %v20284_v22  ;;  %18007 = vmatprep.mubr.msk.f32.mxu1 %vm18978_vm1, %v18977_v60 }
 0x916   :  { %18010 = vmatprep.subr.mxu1 %v18977_v60  ;;  %v13529_v35 = vsub.f32 %v13460_v30, %v20326_v32 }
 0x918   :  { %v13530_v37 = vand.u32 4294901760, %v13529_v35 }
 0x91a   :  { %v13531_v39 = vsub.f32 %v13529_v35, %v13530_v37 }
 0x91c   :  { %18008 = vmatmul.mubr.f32.vlgmr.msra.gmra.mrb[30].mxu1 %v13077_v18  ;;  %v13532_v40 = vand.u32 4294901760, %v13531_v39 }
 0x91d   :  { %18011 = vmatpush3.msra.mxu1 %v20277_v0  ;;  %18012 = vmatprep.mubr.msk.f32.mxu1 %vm18978_vm1, %v18977_v60 }
 0x91e   :  { %18028 = vmatmul.mubr.f32.vlgmr.msra.gmra.mrb[30].mxu0 %v13532_v40  ;;  %18015 = vmatprep.subr.mxu1 %v18977_v60 }
 0x91f   :  { %18031 = vmatpush3.msra.mxu0 %v13543_v41  ;;  %18032 = vmatprep.mubr.msk.f32.mxu0 %vm18978_vm1, %v18977_v60 }
 0x920   :  { %18035 = vmatprep.subr.mxu0 %v18977_v60 }
 0x922   :  { %15264 = vrot.lane.b32.xlu1 %v19309_v34, %s18983_s20 }
 0x924   :  { %18013 = vmatmul.mubr.f32.vlgmr.msra.gmra.mrb[30].mxu1 %v13078_v21 }
 0x925   :  { %18016 = vmatpush3.msra.mxu1 %v13089_v62  ;;  %18017 = vmatprep.mubr.msk.f32.mxu1 %vm18978_vm1, %v18977_v60 }
 0x926   :  { %18033 = vmatmul.mubr.f32.vlgmr.msra.gmra.mrb[30].mxu0 %v20326_v32  ;;  %18020 = vmatprep.subr.mxu1 %v18977_v60 }
 0x927   :  { %18036 = vmatpush3.msra.mxu0 %v13540_v38  ;;  %18037 = vmatprep.mubr.msk.f32.mxu0 %vm18978_vm1, %v18977_v60 }
 0x928   :  { %v12069_v42 = vpop.xlane.xlu0 %12068  ;;  %18040 = vmatprep.subr.mxu0 %v18977_v60 }
 0x929   :  { %18845 = vrcp.f32 %v12069_v42 }
 0x92c   :  { %18018 = vmatmul.mubr.f32.vlgmr.msra.gmra.mrb[30].mxu1 %v20293_v10  ;;  %v13909_v34 = vpop.permute.xlu0 %13908 }
 0x92d   :  { %18021 = vmatpush3.msra.mxu1 %v20277_v0  ;;  %18022 = vmatprep.mubr.msk.f32.mxu1 %vm18978_vm1, %v18977_v60  ;;  %v20358_v44 = vand.u32 4294901760, %v13909_v34 }
 0x92e   :  { %18038 = vmatmul.mubr.f32.vlgmr.msra.gmra.mrb[30].mxu0 %v13529_v35  ;;  %18055 = vmatprep.subr.mxu1 %v18977_v60 }
 0x92f   :  { %18041 = vmatpush3.msra.mxu0 %v20305_v26  ;;  %18042 = vmatprep.mubr.msk.f32.mxu0 %vm18978_vm1, %v18977_v60  ;;  %v13992_v59 = vsub.f32 %v13909_v34, %v20358_v44 }
 0x930   :  { %18045 = vmatprep.subr.mxu0 %v18977_v60 }
 0x931   :  { %v13993_v22 = vand.u32 4294901760, %v13992_v59 }
 0x933   :  { %v18846_v43 = vpop.eup %18845  ;;  %v13994_v20 = vsub.f32 %v13992_v59, %v13993_v22 }
 0x934   :  { %v12097_v45 = vmul.f32 %v18846_v43, %v20218_v15  ;;  %18023 = vmatmul.mubr.f32.vlgmr.msra.gmra.mrb[30].mxu1 %v20293_v10 }
 0x935   :  { %18056 = vmatpush3.msra.mxu1 %v20358_v44  ;;  %18057 = vmatprep.mubr.msk.f32.mxu1 %vm18978_vm1, %v18977_v60  ;;  %v13995_v62 = vand.u32 4294901760, %v13994_v20 }
 0x936   :  { %18043 = vmatmul.mubr.f32.vlgmr.msra.gmra.mrb[30].mxu0 %v13530_v37  ;;  %v14364_v46 = vsel %vm1038_vm2, %v12097_v45, 0  ;;  %18060 = vmatprep.subr.mxu1 %v18977_v60 }
 0x937   :  { %18046 = vmatpush3.msra.mxu0 %v13541_v31  ;;  %18047 = vmatprep.mubr.msk.f32.mxu0 %vm18978_vm1, %v18977_v60  ;;  %v20370_v47 = vand.u32 4294901760, %v14364_v46 }
 0x938   :  { %18050 = vmatprep.subr.mxu0 %v18977_v60 }
 0x939   :  { %v12066_v15 = vpop.xlane.xlu1 %12065  ;;  %v14433_v19 = vsub.f32 %v14364_v46, %v20370_v47  ;;  %v20461_v46 = vld [vmem:[#allocation8] sm:$0xff] }
 0x93a   :  { %18847 = vrcp.f32 %v12066_v15  ;;  %v15789_v15 = vand.u32 4294901760, %v20461_v46 }
 0x93b   :  { %v14434_v24 = vand.u32 4294901760, %v14433_v19 }
 0x93d   :  { %v14361_v50 = vpop.permute.xlu1 %14360  ;;  %v14435_v14 = vsub.f32 %v14433_v19, %v14434_v24 }
 0x93e   :  { %18048 = vmatmul.mubr.f32.vlgmr.msra.gmra.mrb[30].mxu0 %v20326_v32  ;;  %v14367_v52 = vand.u32 4294901760, %v14361_v50 }
 0x93f   :  { %18051 = vmatpush3.msra.mxu0 %v20305_v26  ;;  %18052 = vmatprep.mubr.msk.f32.mxu0 %vm18978_vm1, %v18977_v60  ;;  %v14436_v2 = vand.u32 4294901760, %v14435_v14 }
 0x940   :  { %v14444_v49 = vsub.f32 %v14361_v50, %v14367_v52  ;;  %18085 = vmatprep.subr.mxu0 %v18977_v60 }
 0x942   :  { %v14445_v53 = vand.u32 4294901760, %v14444_v49 }
 0x944   :  { %v18848_v56 = vpop.eup %18847  ;;  %v14446_v55 = vsub.f32 %v14444_v49, %v14445_v53 }
 0x945   :  { %v12096_v33 = vmul.f32 %v18848_v56, %v20222_v63 }
 0x946   :  { %18053 = vmatmul.mubr.f32.vlgmr.msra.gmra.mrb[30].mxu0 %v20326_v32  ;;  %v14447_v61 = vand.u32 4294901760, %v14446_v55 }
 0x947   :  { %18086 = vmatpush3.msra.mxu0 %v14367_v52  ;;  %18087 = vmatprep.mubr.msk.f32.mxu0 %vm18978_vm1, %v18977_v60  ;;  %v13912_v0 = vsel %vm1038_vm2, %v12096_v33, 0 }
 0x948   :  { %18090 = vmatprep.subr.mxu0 %v18977_v60  ;;  %v13980_v3 = vand.u32 4294901760, %v13912_v0 }
 0x94a   :  { %18088 = vmatmul.mubr.f32.vlgmr.msra.gmra.mrb[32].mxu0 %v14436_v2  ;;  %v13981_v6 = vsub.f32 %v13912_v0, %v13980_v3 }
 0x94b   :  { %18091 = vmatpush3.msra.mxu0 %v14447_v61  ;;  %18092 = vmatprep.mubr.msk.f32.mxu0 %vm18978_vm1, %v18977_v60 }
 0x94c   :  { %18095 = vmatprep.subr.mxu0 %v18977_v60  ;;  %v13982_v63 = vand.u32 4294901760, %v13981_v6 }
 0x94e   :  { %v13983_v8 = vsub.f32 %v13981_v6, %v13982_v63 }
 0x950   :  { %v13984_v10 = vand.u32 4294901760, %v13983_v8 }
 0x952   :  { %18093 = vmatmul.mubr.f32.vlgmr.msra.gmra.mrb[32].mxu0 %v20370_v47  ;;  %18058 = vmatmul.mubr.f32.vlgmr.msra.gmra.mrb[32].mxu1 %v13984_v10 }
 0x953   :  { %18096 = vmatpush3.msra.mxu0 %v14444_v49  ;;  %18061 = vmatpush3.msra.mxu1 %v13995_v62 }
 0x954   :  { %18097 = vmatprep.mubr.msk.f32.mxu0 %vm18978_vm1, %v18977_v60  ;;  %18100 = vmatprep.subr.mxu0 %v18977_v60 }
 0x955   :  { %18062 = vmatprep.mubr.msk.f32.mxu1 %vm18978_vm1, %v18977_v60  ;;  %18065 = vmatprep.subr.mxu1 %v18977_v60 }
 0x95a   :  { %18098 = vmatmul.mubr.f32.vlgmr.msra.gmra.mrb[32].mxu0 %v14433_v19  ;;  %18063 = vmatmul.mubr.f32.vlgmr.msra.gmra.mrb[32].mxu1 %v13980_v3 }
 0x95b   :  { %18101 = vmatpush3.msra.mxu0 %v14367_v52  ;;  %18066 = vmatpush3.msra.mxu1 %v13992_v59 }
 0x95c   :  { %18102 = vmatprep.mubr.msk.f32.mxu0 %vm18978_vm1, %v18977_v60  ;;  %18105 = vmatprep.subr.mxu0 %v18977_v60 }
 0x95d   :  { %18067 = vmatprep.mubr.msk.f32.mxu1 %vm18978_vm1, %v18977_v60  ;;  %18070 = vmatprep.subr.mxu1 %v18977_v60  ;;  %v12075_v11 = vpop.xlane.xlu0 %12074 }
 0x95e   :  { %18849 = vrcp.f32 %v12075_v11 }
 0x961   :  { %v14813_v12 = vpop.permute.xlu0 %14812 }
 0x962   :  { %18103 = vmatmul.mubr.f32.vlgmr.msra.gmra.mrb[32].mxu0 %v14434_v24  ;;  %18068 = vmatmul.mubr.f32.vlgmr.msra.gmra.mrb[32].mxu1 %v13981_v6  ;;  %v20422_v18 = vand.u32 4294901760, %v14813_v12 }
 0x963   :  { %18106 = vmatpush3.msra.mxu0 %v14445_v53  ;;  %18071 = vmatpush3.msra.mxu1 %v20358_v44 }
 0x964   :  { %18107 = vmatprep.mubr.msk.f32.mxu0 %vm18978_vm1, %v18977_v60  ;;  %18110 = vmatprep.subr.mxu0 %v18977_v60  ;;  %v14896_v35 = vsub.f32 %v14813_v12, %v20422_v18 }
 0x965   :  { %18072 = vmatprep.mubr.msk.f32.mxu1 %vm18978_vm1, %v18977_v60  ;;  %18075 = vmatprep.subr.mxu1 %v18977_v60 }
 0x966   :  { %v14897_v41 = vand.u32 4294901760, %v14896_v35 }
 0x968   :  { %v18850_v21 = vpop.eup %18849  ;;  %v14898_v43 = vsub.f32 %v14896_v35, %v14897_v41 }
 0x969   :  { %v12099_v28 = vmul.f32 %v18850_v21, %v20231_v25 }
 0x96a   :  { %18108 = vmatmul.mubr.f32.vlgmr.msra.gmra.mrb[32].mxu0 %v20370_v47  ;;  %18073 = vmatmul.mubr.f32.vlgmr.msra.gmra.mrb[32].mxu1 %v13982_v63  ;;  %v14899_v45 = vand.u32 4294901760, %v14898_v43 }
 0x96b   :  { %18111 = vmatpush3.msra.mxu0 %v14367_v52  ;;  %18076 = vmatpush3.msra.mxu1 %v13993_v22  ;;  %v15268_v13 = vsel %vm1038_vm2, %v12099_v28, 0 }
 0x96c   :  { %18112 = vmatprep.mubr.msk.f32.mxu0 %vm18978_vm1, %v18977_v60  ;;  %18077 = vmatprep.mubr.msk.f32.mxu1 %vm18978_vm1, %v18977_v60  ;;  %v15336_v29 = vand.u32 4294901760, %v15268_v13 }
 0x96d   :  { %18080 = vmatprep.subr.mxu1 %v18977_v60  ;;  %18145 = vmatprep.subr.mxu0 %v18977_v60 }
 0x96e   :  { %v15337_v26 = vsub.f32 %v15268_v13, %v15336_v29 }
 0x970   :  { %v15338_v27 = vand.u32 4294901760, %v15337_v26 }
 0x972   :  { %18113 = vmatmul.mubr.f32.vlgmr.msra.gmra.mrb[32].mxu0 %v20370_v47  ;;  %18078 = vmatmul.mubr.f32.vlgmr.msra.gmra.mrb[32].mxu1 %v13980_v3  ;;  %v15339_v4 = vsub.f32 %v15337_v26, %v15338_v27  ;;  %v20463_v47 = vld [vmem:[#allocation8 + $0x8] sm:$0xff] }
 0x973   :  { %18081 = vmatpush3.msra.mxu1 %v20358_v44  ;;  %18082 = vmatprep.mubr.msk.f32.mxu1 %vm18978_vm1, %v18977_v60  ;;  %v15792_v19 = vand.u32 4294901760, %v20463_v47 }
 0x974   :  { %18115 = vmatprep.subr.mxu1 %v18977_v60  ;;  %18147 = vmatprep.mubr.msk.f32.mxu0 %vm18978_vm1, %v18977_v60  ;;  %v15340_v38 = vand.u32 4294901760, %v15339_v4 }
 0x975   :  { %v20471_v50 = vpack.c.bf16 %v15792_v19, %v15789_v15 }
 0x97a   :  { %18083 = vmatmul.mubr.f32.vlgmr.msra.gmra.mrb[32].mxu1 %v13980_v3 }
 0x97b   :  { %18116 = vmatpush3.msra.mxu1 %v20422_v18  ;;  %18117 = vmatprep.mubr.msk.f32.mxu1 %vm18978_vm1, %v18977_v60 }
 0x97c   :  { %18120 = vmatprep.subr.mxu1 %v18977_v60 }
 0x99e   :  { %v12072_v1 = vpop.xlane.xlu1 %12071 }
 0x99f   :  { %18851 = vrcp.f32 %v12072_v1 }
 0x9a2   :  { %v15265_v7 = vpop.permute.xlu1 %15264 }
 0x9a3   :  { %v15271_v17 = vand.u32 4294901760, %v15265_v7 }
 0x9a5   :  { %v15348_v30 = vsub.f32 %v15265_v7, %v15271_v17  ;;  %18146 = vmatpush3.msra.mxu0 %v15271_v17 }
 0x9a6   :  { %18148 = vmatmul.mubr.f32.vlgmr.msra.gmra.mrb[34].mxu0 %v15340_v38  ;;  %18150 = vmatprep.subr.mxu0 %v18977_v60 }
 0x9a7   :  { %v15349_v32 = vand.u32 4294901760, %v15348_v30  ;;  %18152 = vmatprep.mubr.msk.f32.mxu0 %vm18978_vm1, %v18977_v60 }
 0x9a9   :  { %v18852_v25 = vpop.eup %18851  ;;  %v15350_v31 = vsub.f32 %v15348_v30, %v15349_v32 }
 0x9aa   :  { %v12098_v37 = vmul.f32 %v18852_v25, %v20315_v23 }
 0x9ab   :  { %v15351_v36 = vand.u32 4294901760, %v15350_v31 }
 0x9ac   :  { %v14816_v39 = vsel %vm1038_vm2, %v12098_v37, 0 }
 0x9ad   :  { %18151 = vmatpush3.msra.mxu0 %v15351_v36  ;;  %v14884_v40 = vand.u32 4294901760, %v14816_v39 }
 0x9ae   :  { %18153 = vmatmul.mubr.f32.vlgmr.msra.gmra.mrb[34].mxu0 %v15336_v29  ;;  %18155 = vmatprep.subr.mxu0 %v18977_v60 }
 0x9af   :  { %18156 = vmatpush3.msra.mxu0 %v15348_v30  ;;  %18157 = vmatprep.mubr.msk.f32.mxu0 %vm18978_vm1, %v18977_v60  ;;  %v14885_v42 = vsub.f32 %v14816_v39, %v14884_v40 }
 0x9b0   :  { %18160 = vmatprep.subr.mxu0 %v18977_v60 }
 0x9b1   :  { %v14886_v34 = vand.u32 4294901760, %v14885_v42 }
 0x9b3   :  { %v14887_v44 = vsub.f32 %v14885_v42, %v14886_v34 }
 0x9b5   :  { %v14888_v23 = vand.u32 4294901760, %v14887_v44 }
 0x9b6   :  { %18158 = vmatmul.mubr.f32.vlgmr.msra.gmra.mrb[34].mxu0 %v15337_v26 }
 0x9b7   :  { %18161 = vmatpush3.msra.mxu0 %v15271_v17  ;;  %18118 = vmatmul.mubr.f32.vlgmr.msra.gmra.mrb[34].mxu1 %v14888_v23 }
 0x9b8   :  { %18121 = vmatpush3.msra.mxu1 %v14899_v45  ;;  %18162 = vmatprep.mubr.msk.f32.mxu0 %vm18978_vm1, %v18977_v60 }
 0x9b9   :  { %18165 = vmatprep.subr.mxu0 %v18977_v60  ;;  %18122 = vmatprep.mubr.msk.f32.mxu1 %vm18978_vm1, %v18977_v60 }
 0x9ba   :  { %18125 = vmatprep.subr.mxu1 %v18977_v60 }
 0x9be   :  { %18163 = vmatmul.mubr.f32.vlgmr.msra.gmra.mrb[34].mxu0 %v15338_v27 }
 0x9bf   :  { %18166 = vmatpush3.msra.mxu0 %v15349_v32  ;;  %18123 = vmatmul.mubr.f32.vlgmr.msra.gmra.mrb[34].mxu1 %v14884_v40 }
 0x9c0   :  { %18126 = vmatpush3.msra.mxu1 %v14896_v35  ;;  %18167 = vmatprep.mubr.msk.f32.mxu0 %vm18978_vm1, %v18977_v60 }
 0x9c1   :  { %18170 = vmatprep.subr.mxu0 %v18977_v60  ;;  %18127 = vmatprep.mubr.msk.f32.mxu1 %vm18978_vm1, %v18977_v60 }
 0x9c2   :  { %18130 = vmatprep.subr.mxu1 %v18977_v60 }
 0x9c6   :  { %18168 = vmatmul.mubr.f32.vlgmr.msra.gmra.mrb[34].mxu0 %v15336_v29 }
 0x9c7   :  { %18171 = vmatpush3.msra.mxu0 %v15271_v17  ;;  %18128 = vmatmul.mubr.f32.vlgmr.msra.gmra.mrb[34].mxu1 %v14885_v42 }
 0x9c8   :  { %18131 = vmatpush3.msra.mxu1 %v20422_v18  ;;  %18172 = vmatprep.mubr.msk.f32.mxu0 %vm18978_vm1, %v18977_v60 }
 0x9c9   :  { %18132 = vmatprep.mubr.msk.f32.mxu1 %vm18978_vm1, %v18977_v60  ;;  %18135 = vmatprep.subr.mxu1 %v18977_v60 }
 0x9ca   :  { %18320 = vmatprep.subr.bf16.mxu0 %v20471_v50 }
 0x9ce   :  { %18173 = vmatmul.mubr.f32.vlgmr.msra.gmra.mrb[34].mxu0 %v15336_v29 }
 0x9cf   :  { %18133 = vmatmul.mubr.f32.vlgmr.msra.gmra.mrb[34].mxu1 %v14886_v34  ;;  %18322 = vmatpush3.bf16.msra.mxu0 %v20471_v50 }
 0x9d0   :  { %18136 = vmatpush3.msra.mxu1 %v14897_v41  ;;  %18137 = vmatprep.mubr.msk.f32.mxu1 %vm18978_vm1, %v18977_v60 }
 0x9d1   :  { %18140 = vmatprep.subr.mxu1 %v18977_v60 }
 0x9d7   :  { %18138 = vmatmul.mubr.f32.vlgmr.msra.gmra.mrb[34].mxu1 %v14884_v40 }
 0x9d8   :  { %18141 = vmatpush3.msra.mxu1 %v20422_v18  ;;  %18142 = vmatprep.mubr.msk.f32.mxu1 %vm18978_vm1, %v18977_v60 }
 0x9d9   :  { %18332 = vmatprep.subr.bf16.mxu1 %v20471_v50 }
 0x9db   :  { %v12548_v52 = vpop.f32.mrb[28].mxu1 }
 0x9dc   :  { %15724 = vrot.lane.b32.xlu1 %v12548_v52, %s18974_s15  ;;  %v17964_v49 = vpop.f32.mrb[29].mxu1 }
 0x9df   :  { %v13000_v24 = vpop.f32.mrb[28].mxu0  ;;  %18143 = vmatmul.mubr.f32.vlgmr.msra.gmra.mrb[34].mxu1 %v14884_v40  ;;  %v15944_v40 = vsub.f32 %v20463_v47, %v15792_v19 }
 0x9e0   :  { %v17994_v53 = vpop.f32.mrb[29].mxu0  ;;  %15726 = vrot.lane.b32.xlu1 %v13000_v24, %s18974_s15  ;;  %18334 = vmatpush3.bf16.msra.mxu1 %v20471_v50 }
 0x9e1   :  { %v15945_v42 = vand.u32 4294901760, %v15944_v40 }
 0x9e3   :  { %v15946_v43 = vsub.f32 %v15944_v40, %v15945_v42 }
 0x9e5   :  { %v15947_v45 = vand.u32 4294901760, %v15946_v43 }
 0xa07   :  { %v13452_v56 = vpop.f32.mrb[30].mxu1 }
 0xa08   :  { %15728 = vrot.lane.b32.xlu0 %v13452_v56, %s18974_s15  ;;  %v18024_v60 = vpop.f32.mrb[31].mxu1 }
 0xa19   :  { %v13904_v55 = vpop.f32.mrb[30].mxu0 }
 0xa1a   :  { %v18054_v14 = vpop.f32.mrb[31].mxu0  ;;  %15730 = vrot.lane.b32.xlu1 %v13904_v55, %s18974_s15 }
 0xa45   :  { %v14808_v59 = vpop.f32.mrb[32].mxu0 }
 0xa46   :  { %v18114_v33 = vpop.f32.mrb[33].mxu0  ;;  %15734 = vrot.lane.b32.xlu1 %v14808_v59, %s18974_s15 }
 0xa4d   :  { %v14356_v61 = vpop.f32.mrb[32].mxu1 }
 0xa4e   :  { %v15725_v0 = vpop.permute.xlu1 %15724  ;;  %15732 = vrot.lane.b32.xlu0 %v14356_v61, %s18974_s15  ;;  %v18084_v2 = vpop.f32.mrb[33].mxu1 }
 0xa4f   :  { %v15748_v3 = vsel %vm1038_vm2, %v19807_v51, %v15725_v0 }
 0xa50   :  { %v15765_v22 = vsel %vm15763_vm3, %v15748_v3, 0 }
 0xa51   :  { %v20489_v6 = vand.u32 4294901760, %v15765_v22 }
 0xa52   :  { %v15727_v63 = vpop.permute.xlu1 %15726 }
 0xa53   :  { %v20492_v20 = vsub.f32 %v15765_v22, %v20489_v6  ;;  %v15749_v8 = vsel %vm1038_vm2, %v19884_v5, %v15727_v63 }
 0xa54   :  { %v15768_v10 = vsel %vm15763_vm3, %v15749_v8, 0 }
 0xa55   :  { %v20497_v62 = vand.u32 4294901760, %v15768_v10  ;;  %v15857_v11 = vand.u32 4294901760, %v20492_v20 }
 0xa57   :  { %v20501_v12 = vsub.f32 %v15768_v10, %v20497_v62  ;;  %18227 = vmatprep.mubr.f32.mxu1 %v15857_v11  ;;  %v15858_v51 = vsub.f32 %v20492_v20, %v15857_v11 }
 0xa59   :  { %v15859_v18 = vand.u32 4294901760, %v15858_v51  ;;  %v15867_v21 = vand.u32 4294901760, %v20501_v12 }
 0xa5b   :  { %18179 = vmatprep.mubr.f32.mxu0 %v15859_v18  ;;  %18228 = vmatmul.mubr.f32.vlgmr.msra.gmra.mrb[36].mxu1 %v15867_v21  ;;  %v15868_v28 = vsub.f32 %v20501_v12, %v15867_v21 }
 0xa5d   :  { %v15869_v5 = vand.u32 4294901760, %v15868_v28 }
 0xa5f   :  { %18180 = vmatmul.mubr.f32.vlgmr.msra.gmra.mrb[36].mxu0 %v15869_v5 }
 0xa7a   :  { %v15729_v13 = vpop.permute.xlu0 %15728 }
 0xa7b   :  { %v15750_v29 = vsel %vm1038_vm2, %v19970_v57, %v15729_v13 }
 0xa7c   :  { %v15771_v26 = vsel %vm15763_vm3, %v15750_v29, 0 }
 0xa7d   :  { %v20509_v27 = vand.u32 4294901760, %v15771_v26 }
 0xa7f   :  { %v20512_v1 = vsub.f32 %v15771_v26, %v20509_v27 }
 0xa81   :  { %v15877_v4 = vand.u32 4294901760, %v20512_v1 }
 0xa83   :  { %18230 = vmatprep.mubr.f32.mxu1 %v15877_v4  ;;  %v15878_v7 = vsub.f32 %v20512_v1, %v15877_v4 }
 0xa85   :  { %v15879_v17 = vand.u32 4294901760, %v15878_v7 }
 0xa87   :  { %18182 = vmatprep.mubr.f32.mxu0 %v15879_v17 }
 0xa8c   :  { %v15731_v38 = vpop.permute.xlu1 %15730 }
 0xa8d   :  { %v15751_v30 = vsel %vm1038_vm2, %v20056_v16, %v15731_v38  ;;  %v15937_v16 = vsub.f32 %v20461_v46, %v15789_v15 }
 0xa8e   :  { %v15774_v57 = vsel %vm15763_vm3, %v15751_v30, 0 }
 0xa8f   :  { %v20519_v32 = vand.u32 4294901760, %v15774_v57  ;;  %v15938_v41 = vand.u32 4294901760, %v15937_v16  ;;  %v18327_v24 = vpack.c.bf16 %v15944_v40, %v15937_v16 }
 0xa91   :  { %v20522_v25 = vsub.f32 %v15774_v57, %v20519_v32  ;;  %v15939_v34 = vsub.f32 %v15937_v16, %v15938_v41  ;;  %v18335_v44 = vpack.c.bf16 %v15945_v42, %v15938_v41 }
 0xa93   :  { %v15887_v31 = vand.u32 4294901760, %v20522_v25  ;;  %v15940_v23 = vand.u32 4294901760, %v15939_v34  ;;  %18336 = vmatprep.subr.bf16.mxu1 %v18335_v44 }
 0xa94   :  { %18338 = vmatpush3.bf16.msra.mxu1 %v18335_v44 }
 0xa95   :  { %18231 = vmatmul.mubr.f32.gmra.mrb[38].mxu1 %v15887_v31  ;;  %v15888_v35 = vsub.f32 %v20522_v25, %v15887_v31  ;;  %v18323_v49 = vpack.c.bf16 %v15947_v45, %v15940_v23  ;;  %18340 = vmatprep.subr.bf16.mxu1 %v20471_v50 }
 0xa97   :  { %v15889_v37 = vand.u32 4294901760, %v15888_v35  ;;  %18324 = vmatprep.subr.bf16.mxu0 %v18323_v49 }
 0xa98   :  { %18326 = vmatpush3.bf16.msra.mxu0 %v18323_v49 }
 0xa99   :  { %18183 = vmatmul.mubr.f32.gmra.mrb[38].mxu0 %v15889_v37  ;;  %18328 = vmatprep.subr.bf16.mxu0 %v18327_v24 }
 0xaa1   :  { %v15712_v36 = vpop.f32.mrb[34].mxu0 }
 0xaa2   :  { %v18174_v39 = vpop.f32.mrb[35].mxu0  ;;  %15738 = vrot.lane.b32.xlu1 %v15712_v36, %s18974_s15 }
 0xab2   :  { %v15260_v52 = vpop.f32.mrb[34].mxu1 }
 0xab3   :  { %15736 = vrot.lane.b32.xlu0 %v15260_v52, %s18974_s15  ;;  %v18144_v46 = vpop.f32.mrb[35].mxu1 }
 0xab8   :  { %v15735_v15 = vpop.permute.xlu1 %15734 }
 0xab9   :  { %v15753_v47 = vsel %vm1038_vm2, %v20131_v54, %v15735_v15 }
 0xaba   :  { %v15780_v19 = vsel %vm15763_vm3, %v15753_v47, 0 }
 0xabb   :  { %v20538_v53 = vand.u32 4294901760, %v15780_v19 }
 0xabd   :  { %v20541_v56 = vsub.f32 %v15780_v19, %v20538_v53 }
 0xabf   :  { %v15907_v33 = vand.u32 4294901760, %v20541_v56 }
 0xac0   :  { %v15733_v60 = vpop.permute.xlu0 %15732 }
 0xac1   :  { %v15752_v55 = vsel %vm1038_vm2, %v20145_v58, %v15733_v60  ;;  %v15908_v0 = vsub.f32 %v20541_v56, %v15907_v33 }
 0xac2   :  { %v15777_v14 = vsel %vm15763_vm3, %v15752_v55, 0 }
 0xac3   :  { %v15895_v59 = vand.u32 4294901760, %v15777_v14  ;;  %v15909_v22 = vand.u32 4294901760, %v15908_v0 }
 0xac5   :  { %v15896_v61 = vsub.f32 %v15777_v14, %v15895_v59 }
 0xac7   :  { %v15897_v54 = vand.u32 4294901760, %v15896_v61 }
 0xac9   :  { %18233 = vmatprep.mubr.f32.mxu1 %v15897_v54  ;;  %v15898_v2 = vsub.f32 %v15896_v61, %v15897_v54 }
 0xaca   :  { %18234 = vmatmul.mubr.f32.gmra.mrb[40].mxu1 %v15907_v33 }
 0xacb   :  { %v15899_v3 = vand.u32 4294901760, %v15898_v2 }
 0xacd   :  { %18185 = vmatprep.mubr.f32.mxu0 %v15899_v3 }
 0xace   :  { %18186 = vmatmul.mubr.f32.gmra.mrb[40].mxu0 %v15909_v22 }
 0xb14   :  { %v15739_v63 = vpop.permute.xlu1 %15738 }
 0xb15   :  { %v15755_v58 = vsel %vm1038_vm2, %v20175_v9, %v15739_v63 }
 0xb16   :  { %v15786_v8 = vsel %vm15763_vm3, %v15755_v58, 0 }
 0xb17   :  { %v15925_v10 = vand.u32 4294901760, %v15786_v8 }
 0xb19   :  { %v15926_v11 = vsub.f32 %v15786_v8, %v15925_v10 }
 0xb1b   :  { %v15927_v5 = vand.u32 4294901760, %v15926_v11 }
 0xb1d   :  { %v15928_v26 = vsub.f32 %v15926_v11, %v15927_v5 }
 0xb1f   :  { %v15929_v7 = vand.u32 4294901760, %v15928_v26 }
 0xb25   :  { %v15737_v51 = vpop.permute.xlu0 %15736 }
 0xb26   :  { %v15754_v18 = vsel %vm1038_vm2, %v20177_v48, %v15737_v51 }
 0xb27   :  { %v15783_v21 = vsel %vm15763_vm3, %v15754_v18, 0 }
 0xb28   :  { %v15915_v28 = vand.u32 4294901760, %v15783_v21 }
 0xb2a   :  { %v15916_v13 = vsub.f32 %v15783_v21, %v15915_v28 }
 0xb2c   :  { %v15917_v29 = vand.u32 4294901760, %v15916_v13 }
 0xb2e   :  { %18236 = vmatprep.mubr.f32.mxu1 %v15917_v29  ;;  %v15918_v4 = vsub.f32 %v15916_v13, %v15917_v29 }
 0xb2f   :  { %18237 = vmatmul.mubr.f32.gmra.mrb[42].mxu1 %v15927_v5 }
 0xb30   :  { %18243 = vmatprep.mubr.f32.mxu1 %v20489_v6  ;;  %v15919_v9 = vand.u32 4294901760, %v15918_v4 }
 0xb32   :  { %18188 = vmatprep.mubr.f32.mxu0 %v15919_v9 }
 0xb33   :  { %18189 = vmatmul.mubr.f32.gmra.mrb[42].mxu0 %v15929_v7  ;;  %18244 = vmatmul.mubr.f32.vlgmr.msra.gmra.mrb[36].mxu1 %v20497_v62 }
 0xb34   :  { %18195 = vmatprep.mubr.f32.mxu0 %v20489_v6  ;;  %18246 = vmatprep.mubr.f32.mxu1 %v20509_v27 }
 0xb35   :  { %18342 = vmatpush3.bf16.msra.mxu1 %v20471_v50 }
 0xb37   :  { %18196 = vmatmul.mubr.f32.vlgmr.msra.gmra.mrb[36].mxu0 %v20497_v62  ;;  %18247 = vmatmul.mubr.f32.gmra.mrb[38].mxu1 %v20519_v32 }
 0xb38   :  { %18198 = vmatprep.mubr.f32.mxu0 %v20509_v27  ;;  %18249 = vmatprep.mubr.f32.mxu1 %v15895_v59 }
 0xb39   :  { %18330 = vmatpush3.bf16.msra.mxu0 %v18327_v24 }
 0xb3b   :  { %18199 = vmatmul.mubr.f32.gmra.mrb[38].mxu0 %v20519_v32  ;;  %18250 = vmatmul.mubr.f32.gmra.mrb[40].mxu1 %v20538_v53 }
 0xb3c   :  { %18201 = vmatprep.mubr.f32.mxu0 %v15895_v59  ;;  %18252 = vmatprep.mubr.f32.mxu1 %v15915_v28 }
 0xb3f   :  { %18202 = vmatmul.mubr.f32.gmra.mrb[40].mxu0 %v20538_v53  ;;  %18253 = vmatmul.mubr.f32.gmra.mrb[42].mxu1 %v15925_v10 }
 0xb40   :  { %18204 = vmatprep.mubr.f32.mxu0 %v15915_v28  ;;  %18259 = vmatprep.mubr.f32.mxu1 %v20489_v6  ;;  %v16578_v6 = vld [vmem:[#allocation5 + $0x2] ss:$0 sm:$0xff] }
 0xb43   :  { %18205 = vmatmul.mubr.f32.gmra.mrb[42].mxu0 %v15925_v10  ;;  %18260 = vmatmul.mubr.f32.vlgmr.msra.gmra.mrb[36].mxu1 %v20497_v62 }
 0xb44   :  { %18211 = vmatprep.mubr.f32.mxu0 %v20492_v20  ;;  %18262 = vmatprep.mubr.f32.mxu1 %v20509_v27 }
 0xb47   :  { %18212 = vmatmul.mubr.f32.vlgmr.msra.gmra.mrb[36].mxu0 %v20501_v12  ;;  %18263 = vmatmul.mubr.f32.gmra.mrb[38].mxu1 %v20519_v32 }
 0xb48   :  { %18214 = vmatprep.mubr.f32.mxu0 %v20512_v1  ;;  %18265 = vmatprep.mubr.f32.mxu1 %v15895_v59 }
 0xb4b   :  { %18215 = vmatmul.mubr.f32.gmra.mrb[38].mxu0 %v20522_v25  ;;  %18266 = vmatmul.mubr.f32.gmra.mrb[40].mxu1 %v20538_v53 }
 0xb4c   :  { %18217 = vmatprep.mubr.f32.mxu0 %v15896_v61  ;;  %18268 = vmatprep.mubr.f32.mxu1 %v15915_v28 }
 0xb4f   :  { %18218 = vmatmul.mubr.f32.gmra.mrb[40].mxu0 %v20541_v56  ;;  %18269 = vmatmul.mubr.f32.gmra.mrb[42].mxu1 %v15925_v10 }
 0xb50   :  { %18220 = vmatprep.mubr.f32.mxu0 %v15916_v13 }
 0xb53   :  { %18221 = vmatmul.mubr.f32.gmra.mrb[42].mxu0 %v15926_v11 }
 0xc16   :  { %v18261_v48 = vpop.f32.mrb[36].mxu1 }
 0xc17   :  { %v16502_v50 = vpop.f32.mrb[37].mxu1 }
 0xc1a   :  { %v18213_v20 = vpop.f32.mrb[36].mxu0  ;;  %v18264_v62 = vpop.f32.mrb[38].mxu1 }
 0xc1b   :  { %v18351_v12 = vadd.f32 %v18213_v20, %v16578_v6  ;;  %v16130_v27 = vpop.f32.mrb[37].mxu0  ;;  %v16514_v1 = vpop.f32.mrb[39].mxu1 }
 0xc1c   :  { %v18353_v17 = vadd.f32 %v16578_v6, %v16130_v27 }
 0xc1d   :  { %v18352_v38 = vadd.f32 %v18351_v12, %v18261_v48 }
 0xc1e   :  { %v18354_v30 = vadd.f32 %v18353_v17, %v16502_v50  ;;  %v18216_v57 = vpop.f32.mrb[38].mxu0  ;;  %v18267_v32 = vpop.f32.mrb[40].mxu1 }
 0xc1f   :  { %16549 = vst.msk [vmem:[#allocation10 + $0x8] sm:$0xff] %vm82_vm0, %v18352_v38  ;;  %v18355_v25 = vadd.f32 %v18216_v57, %v16578_v6  ;;  %v16144_v31 = vpop.f32.mrb[39].mxu0  ;;  %v16526_v35 = vpop.f32.mrb[41].mxu1 }
 0xc20   :  { %16548 = vst.msk [vmem:[#allocation10] sm:$0xff] %vm82_vm0, %v18354_v30  ;;  %v18357_v37 = vadd.f32 %v16578_v6, %v16144_v31 }
 0xc21   :  { %v18356_v36 = vadd.f32 %v18355_v25, %v18264_v62 }
 0xc22   :  { %v18358_v39 = vadd.f32 %v18357_v37, %v16514_v1  ;;  %v18219_v16 = vpop.f32.mrb[40].mxu0  ;;  %v18270_v40 = vpop.f32.mrb[42].mxu1 }
 0xc23   :  { %16551 = vst.msk [vmem:[#allocation10 + $0x18] sm:$0xff] %vm82_vm0, %v18356_v36  ;;  %v18359_v41 = vadd.f32 %v18219_v16, %v16578_v6  ;;  %v16158_v42 = vpop.f32.mrb[41].mxu0  ;;  %v16538_v34 = vpop.f32.mrb[43].mxu1 }
 0xc24   :  { %16550 = vst.msk [vmem:[#allocation10 + $0x10] sm:$0xff] %vm82_vm0, %v18358_v39  ;;  %v18361_v43 = vadd.f32 %v16578_v6, %v16158_v42 }
 0xc25   :  { %v18360_v44 = vadd.f32 %v18359_v41, %v18267_v32 }
 0xc26   :  { %v18362_v23 = vadd.f32 %v18361_v43, %v16526_v35  ;;  %v18222_v45 = vpop.f32.mrb[42].mxu0 }
 0xc27   :  { %16553 = vst.msk [vmem:[#allocation10 + $0x28] sm:$0xff] %vm82_vm0, %v18360_v44  ;;  %v18363_v52 = vadd.f32 %v18222_v45, %v16578_v6  ;;  %v16172_v49 = vpop.f32.mrb[43].mxu0 }
 0xc28   :  { %16552 = vst.msk [vmem:[#allocation10 + $0x20] sm:$0xff] %vm82_vm0, %v18362_v23  ;;  %v18365_v46 = vadd.f32 %v16578_v6, %v16172_v49 }
 0xc29   :  { %v18364_v15 = vadd.f32 %v18363_v52, %v18270_v40 }
 0xc2a   :  { %v18366_v47 = vadd.f32 %v18365_v46, %v16538_v34 }
 0xc2b   :  { %16555 = vst.msk [vmem:[#allocation10 + $0x38] sm:$0xff] %vm82_vm0, %v18364_v15 }
 0xc2c   :  { %16554 = vst.msk [vmem:[#allocation10 + $0x30] sm:$0xff] %vm82_vm0, %v18366_v47 }
 0xc2d   :  { %18952 = shalt.err (!%p18949_p8)
}
 0xc2e   :  { %s18953_s27 = scalar_lea.hbm %s20603_s5, 1024 }
 0xc2f   :  { %p18954_p9 = scmp.ne.s32.totalorder %s20603_s5, %s18953_s27  ;;  %p18957_p10 = scmp.lt.u32.totalorder %s18953_s27, %s20603_s5 }
 0xc31   :  { %p18959_p11 = pnand %p18957_p10, %p18954_p9 }
 0xc33   :  { %18962 = shalt.err (!%p18959_p11)
}
 0xc34   :  { %16567 = dma.vmem_to_hbm [thread:$0]  %s16562_s23, 1024, %s20603_s5, [#allocation4], %s18973_s1, %s18973_s1, %s18974_s15  }
 0xc35   :  { %18969 = dma.done.wait [#allocation4], 1024  }
 0xc36   :  { %18970 = vsyncadd [#allocation4], 4294966272 }
 0xc37   :  { %16571 = vsyncpa [#allocation3], 1 }
 0xc38   :  { %16572 = vsyncpa [#allocation6], 1 }
 0xc39   :  { %16573 = vsyncpa [#allocation9], 1 }
 0xc3a   :  { %16574 = vsyncpa [#allocation4], 1 }

</bundles_post_ra>
